<compile_context>
chip_gen: v7x
topology: tpu7x:2x2x1
jax: 0.10.0
libtpu: 0.0.40
codegen_flags: <defaults>
</compile_context>

<pallas_src>
import functools

import jax
import jax.numpy as jnp
from jax.experimental import pallas as pl
from jax.experimental.pallas import tpu as pltpu


# ------------------------------ configuration ------------------------------

VOCAB = 512
HIDDEN = 32
NUM_HEADS = 4
HEAD_DIM = HIDDEN // NUM_HEADS
NUM_LAYERS = 2
INTERMEDIATE = 64
MAX_LENGTH = 30          # module's maxlength
L_PAD = 32               # padded seq length (sublane friendly); pad keys are masked
MASK_TOKEN_ID = 103
CLS_ID, SEP_ID, PAD_ID = 101, 102, 0


# ----------------------------- kernel helpers ------------------------------

def _layernorm(x, g, b, eps=1e-12):
    mu = jnp.mean(x, axis=-1, keepdims=True)
    var = jnp.mean((x - mu) ** 2, axis=-1, keepdims=True)
    return (x - mu) * jax.lax.rsqrt(var + eps) * g + b


def _gelu(x):
    # tanh-approx GELU (HF bert-base uses erf-GELU; tanh keeps lowering simple)
    return 0.5 * x * (1.0 + jnp.tanh(0.7978845608028654 * (x + 0.044715 * x * x * x)))


# ------------------------- fused whole-model kernel -------------------------

def _fused_bert_kernel(
    # scalar-prefetch refs (SMEM)
    ids_ref, mpos_ref,
    # tensor inputs (VMEM)
    word_emb_ref, pt_emb_ref, mask_ref,
    emb_ln_g_ref, emb_ln_b_ref,
    wqkv_ref, bqkv_ref, wo_ref, bo_ref,
    ln1_g_ref, ln1_b_ref, w1_ref, b1_ref, w2_ref, b2_ref,
    ln2_g_ref, ln2_b_ref,
    mlm_w_ref, mlm_b_ref, mlm_ln_g_ref, mlm_ln_b_ref,
    dec_w_ref, dec_b_ref,
    # output
    logits_ref,
    # scratch
    x_scratch,
    *, num_layers, num_heads, head_dim, batch, seq):
    hidden = num_heads * head_dim
    bl = batch * seq
    bf16 = jnp.bfloat16

    # ---- in-kernel word-embedding gather (token ids live in SMEM) ----
    @pl.loop(0, bl)
    def _(i):
        x_scratch[pl.ds(i, 1), :] = word_emb_ref[pl.ds(ids_ref[i], 1), :]

    # embeddings + position/type embeddings + embedding LayerNorm   [BL, H] f32
    x = _layernorm(x_scratch[...] + pt_emb_ref[...],
                   emb_ln_g_ref[...], emb_ln_b_ref[...])

    # additive attention bias over the key axis: 0 for real, -1e9 for pad
    biases = [(mask_ref[b].astype(jnp.float32) - 1.0) * 1e9
              for b in range(batch)]                                  # each [1, seq]

    # --- transformer encoder layers (batch folded into the row dimension) ---
    for l in range(num_layers):
        # fused QKV projection: one [BL, H] @ [H, 3H] MXU push (scale pre-folded)
        qkv = jnp.dot(x.astype(bf16), wqkv_ref[l],
                      preferred_element_type=jnp.float32) + bqkv_ref[l]   # [BL, 3H]

        ctx = [[None] * num_heads for _ in range(batch)]
        for h in range(num_heads):
            # per-head slices hoisted out of the batch loop; bf16 MXU operands
            q_h = qkv[:, h * head_dim:(h + 1) * head_dim].astype(bf16)
            k_h = qkv[:, hidden + h * head_dim:hidden + (h + 1) * head_dim].astype(bf16)
            v_h = qkv[:, 2 * hidden + h * head_dim:2 * hidden + (h + 1) * head_dim].astype(bf16)
            for b in range(batch):
                q = q_h[b * seq:(b + 1) * seq]
                k = k_h[b * seq:(b + 1) * seq]
                v = v_h[b * seq:(b + 1) * seq]
                s = jnp.einsum("qd,kd->qk", q, k,
                               preferred_element_type=jnp.float32)    # [seq, seq]
                s = s + biases[b]                                     # mask padded keys
                s = s - jnp.max(s, axis=-1, keepdims=True)
                p = jnp.exp(s)
                p = p * pl.reciprocal(jnp.sum(p, axis=-1, keepdims=True), approx=True)
                ctx[b][h] = jnp.dot(p.astype(bf16), v,
                                    preferred_element_type=jnp.float32)  # [seq, dH]

        # concat heads along lanes, batch along sublanes -> ONE Wo matmul
        ctx_all = jnp.concatenate(
            [jnp.concatenate(ctx[b], axis=1) for b in range(batch)], axis=0)  # [BL, H]
        attn = jnp.dot(ctx_all.astype(bf16), wo_ref[l],
                       preferred_element_type=jnp.float32) + bo_ref[l]
        x = _layernorm(x + attn, ln1_g_ref[l], ln1_b_ref[l])

        ff = _gelu(jnp.dot(x.astype(bf16), w1_ref[l],
                           preferred_element_type=jnp.float32) + b1_ref[l])
        ff = jnp.dot(ff.astype(bf16), w2_ref[l],
                     preferred_element_type=jnp.float32) + b2_ref[l]
        x = _layernorm(x + ff, ln2_g_ref[l], ln2_b_ref[l])

    # --- masked-LM head ONLY at the [MASK] row of each example ---
    x_scratch[...] = x
    rows = [x_scratch[pl.ds(b * seq + mpos_ref[b], 1), :] for b in range(batch)]
    pad_rows = logits_ref.shape[0] - batch
    if pad_rows > 0:
        rows.append(jnp.zeros((pad_rows, hidden), jnp.float32))
    m = jnp.concatenate(rows, axis=0)                                 # [out_rows, H]

    hm = _gelu(jnp.dot(m.astype(bf16), mlm_w_ref[...],
                       preferred_element_type=jnp.float32) + mlm_b_ref[...])
    hm = _layernorm(hm, mlm_ln_g_ref[...], mlm_ln_b_ref[...])
    # lane-dense (512 = 4*128) unmasked store; the only HBM write of the kernel
    logits_ref[...] = (jnp.dot(hm.astype(bf16), dec_w_ref[...],
                               preferred_element_type=jnp.float32)
                       + dec_b_ref[...]).astype(logits_ref.dtype)


# ----------------------------- model definition -----------------------------

def init_params(key):
    def nrm(k, shape, scale=0.02):
        return (scale * jax.random.normal(k, shape)).astype(jnp.float32)

    keys = iter(jax.random.split(key, 64))
    word_emb = nrm(next(keys), (VOCAB, HIDDEN))
    params = {
        "word_emb": word_emb,                               # f32 for in-kernel gather
        "pos_emb": nrm(next(keys), (L_PAD, HIDDEN)),
        "type_emb": nrm(next(keys), (2, HIDDEN)),
        "emb_ln_g": jnp.ones((1, HIDDEN), jnp.float32),
        "emb_ln_b": jnp.zeros((1, HIDDEN), jnp.float32),
        "mlm_w": nrm(next(keys), (HIDDEN, HIDDEN)).astype(jnp.bfloat16),
        "mlm_b": jnp.zeros((1, HIDDEN), jnp.float32),
        "mlm_ln_g": jnp.ones((1, HIDDEN), jnp.float32),
        "mlm_ln_b": jnp.zeros((1, HIDDEN), jnp.float32),
        # tied decoder, pre-transposed ONCE at init (no per-forward transpose)
        "dec_w": word_emb.T.astype(jnp.bfloat16),           # [H, VOCAB]
        "dec_b": jnp.zeros((1, VOCAB), jnp.float32),
    }
    scale = 1.0 / (HEAD_DIM ** 0.5)
    wqkv, wo, w1, w2 = [], [], [], []
    for _ in range(NUM_LAYERS):
        # softmax 1/sqrt(dH) scale folded into the Q projection at init
        wq = nrm(next(keys), (HIDDEN, HIDDEN)) * scale
        wk = nrm(next(keys), (HIDDEN, HIDDEN))
        wv = nrm(next(keys), (HIDDEN, HIDDEN))
        wqkv.append(jnp.concatenate([wq, wk, wv], axis=1))            # [H, 3H]
        wo.append(nrm(next(keys), (HIDDEN, HIDDEN)))
        w1.append(nrm(next(keys), (HIDDEN, INTERMEDIATE)))
        w2.append(nrm(next(keys), (INTERMEDIATE, HIDDEN)))
    params.update({
        "wqkv": jnp.stack(wqkv).astype(jnp.bfloat16),                 # [nL, H, 3H]
        "bqkv": jnp.zeros((NUM_LAYERS, 1, 3 * HIDDEN), jnp.float32),
        "wo": jnp.stack(wo).astype(jnp.bfloat16),                     # [nL, H, H]
        "bo": jnp.zeros((NUM_LAYERS, 1, HIDDEN), jnp.float32),
        "ln1_g": jnp.ones((NUM_LAYERS, 1, HIDDEN), jnp.float32),
        "ln1_b": jnp.zeros((NUM_LAYERS, 1, HIDDEN), jnp.float32),
        "w1": jnp.stack(w1).astype(jnp.bfloat16),                     # [nL, H, I]
        "b1": jnp.zeros((NUM_LAYERS, 1, INTERMEDIATE), jnp.float32),
        "w2": jnp.stack(w2).astype(jnp.bfloat16),                     # [nL, I, H]
        "b2": jnp.zeros((NUM_LAYERS, 1, HIDDEN), jnp.float32),
        "ln2_g": jnp.ones((NUM_LAYERS, 1, HIDDEN), jnp.float32),
        "ln2_b": jnp.zeros((NUM_LAYERS, 1, HIDDEN), jnp.float32),
    })
    return params


_KERNEL_ARG_NAMES = [
    "emb_ln_g", "emb_ln_b",
    "wqkv", "bqkv", "wo", "bo",
    "ln1_g", "ln1_b", "w1", "b1", "w2", "b2", "ln2_g", "ln2_b",
    "mlm_w", "mlm_b", "mlm_ln_g", "mlm_ln_b",
    "dec_w", "dec_b",
]


def _full_spec(shape):
    zeros = (0,) * len(shape)
    # index_map receives (grid_idx, *scalar_prefetch_refs)
    return pl.BlockSpec(shape, lambda i, ids, mp: zeros)


def word_model_forward(params, input_ids, attention_mask, label_ids):
    """Mirrors WordModel.forward (with_image=False): returns (mask_logits, labels)."""
    B, L = input_ids.shape
    # TODO(synk): HuggingFace tokenizer (string -> ids) has no Pallas/JAX
    # equivalent; input_ids / label_ids are produced deterministically upstream.

    # pad sequence to a sublane-friendly length; padded keys get mask 0
    pad = L_PAD - L
    ids_p = jnp.pad(input_ids, ((0, 0), (0, pad)), constant_values=PAD_ID)
    mask_p = jnp.pad(attention_mask, ((0, 0), (0, pad)), constant_values=0)

    ids_flat = ids_p.reshape(B * L_PAD).astype(jnp.int32)
    mask_pos = jnp.argmax((input_ids == MASK_TOKEN_ID).astype(jnp.int32),
                          axis=1).astype(jnp.int32)                  # [B]
    mask_f = mask_p.astype(jnp.float32).reshape(B, 1, L_PAD)

    # position + token-type embeddings, pre-tiled over batch (input independent)
    pt_emb = jnp.tile(params["pos_emb"] + params["type_emb"][0][None, :], (B, 1))

    tensor_args = [params["word_emb"], pt_emb, mask_f] + \
                  [params[n] for n in _KERNEL_ARG_NAMES]

    out_rows = max(8, ((B + 7) // 8) * 8)     # sublane-padded [MASK]-row logits

    grid_spec = pltpu.PrefetchScalarGridSpec(
        num_scalar_prefetch=2,                 # (token ids, mask positions) -> SMEM
        grid=(1,),
        in_specs=[_full_spec(a.shape) for a in tensor_args],
        out_specs=pl.BlockSpec((out_rows, VOCAB), lambda i, ids, mp: (0, 0)),
        scratch_shapes=[pltpu.VMEM((B * L_PAD, HIDDEN), jnp.float32)],
    )

    logits_pad = pl.pallas_call(
        functools.partial(_fused_bert_kernel,
                          num_layers=NUM_LAYERS, num_heads=NUM_HEADS,
                          head_dim=HEAD_DIM, batch=B, seq=L_PAD),
        out_shape=jax.ShapeDtypeStruct((out_rows, VOCAB), jnp.float32),
        grid_spec=grid_spec,
        compiler_params=pltpu.CompilerParams(
            dimension_semantics=("arbitrary",)),
    )(ids_flat, mask_pos, *tensor_args)

    # rows [0, B) are the [MASK]-position logits per example
    return logits_pad[:B], label_ids


# --------------------------------- driver -----------------------------------

def make_inputs(key, batch=2):
    """Simulate tokenizer output: padded ids with CLS/SEP and one [MASK] each."""
    k_ids, k_lbl = jax.random.split(key)
    ids = jax.random.randint(k_ids, (batch, MAX_LENGTH), 200, VOCAB, dtype=jnp.int32)
    lengths = jnp.array([12, 20], dtype=jnp.int32)[:batch]
    pos = jnp.arange(MAX_LENGTH)[None, :]
    attention_mask = (pos < lengths[:, None]).astype(jnp.int32)
    ids = jnp.where(attention_mask == 1, ids, PAD_ID)
    ids = ids.at[:, 0].set(CLS_ID)
    ids = jnp.where(pos == (lengths[:, None] - 1), SEP_ID, ids)
    mask_pos = lengths // 2
    ids = jnp.where(pos == mask_pos[:, None], MASK_TOKEN_ID, ids)
    label_ids = jax.random.randint(k_lbl, (batch,), 200, VOCAB, dtype=jnp.int32)
    return ids, attention_mask, label_ids


if __name__ == "__main__":
    key = jax.random.PRNGKey(0)
    k_param, k_data = jax.random.split(key)
    params = init_params(k_param)
    input_ids, attention_mask, label_ids = make_inputs(k_data, batch=2)

    fwd = jax.jit(word_model_forward)
    mask_logits, labels = fwd(params, input_ids, attention_mask, label_ids)
    jax.block_until_ready((mask_logits, labels))

    assert mask_logits.shape == (2, VOCAB) and mask_logits.dtype == jnp.float32
    assert labels.shape == (2,)
    assert bool(jnp.all(jnp.isfinite(mask_logits)))
    print("KERNEL_OK")
</pallas_src>

<mosaic_0001>
module attributes {stable_mosaic.version = 11 : i64} {
  func.func @_fused_bert_kernel(%arg0: i32, %arg1: memref<64xi32, #tpu.memory_space<smem>>, %arg2: memref<2xi32, #tpu.memory_space<smem>>, %arg3: memref<512x32xf32, #tpu.memory_space<vmem>>, %arg4: memref<64x32xf32, #tpu.memory_space<vmem>>, %arg5: memref<2x1x32xf32, #tpu.memory_space<vmem>>, %arg6: memref<1x32xf32, #tpu.memory_space<vmem>>, %arg7: memref<1x32xf32, #tpu.memory_space<vmem>>, %arg8: memref<2x32x96xbf16, #tpu.memory_space<vmem>>, %arg9: memref<2x1x96xf32, #tpu.memory_space<vmem>>, %arg10: memref<2x32x32xbf16, #tpu.memory_space<vmem>>, %arg11: memref<2x1x32xf32, #tpu.memory_space<vmem>>, %arg12: memref<2x1x32xf32, #tpu.memory_space<vmem>>, %arg13: memref<2x1x32xf32, #tpu.memory_space<vmem>>, %arg14: memref<2x32x64xbf16, #tpu.memory_space<vmem>>, %arg15: memref<2x1x64xf32, #tpu.memory_space<vmem>>, %arg16: memref<2x64x32xbf16, #tpu.memory_space<vmem>>, %arg17: memref<2x1x32xf32, #tpu.memory_space<vmem>>, %arg18: memref<2x1x32xf32, #tpu.memory_space<vmem>>, %arg19: memref<2x1x32xf32, #tpu.memory_space<vmem>>, %arg20: memref<32x32xbf16, #tpu.memory_space<vmem>>, %arg21: memref<1x32xf32, #tpu.memory_space<vmem>>, %arg22: memref<1x32xf32, #tpu.memory_space<vmem>>, %arg23: memref<1x32xf32, #tpu.memory_space<vmem>>, %arg24: memref<32x512xbf16, #tpu.memory_space<vmem>>, %arg25: memref<1x512xf32, #tpu.memory_space<vmem>>, %arg26: memref<8x512xf32, #tpu.memory_space<vmem>>, %arg27: memref<64x32xf32, #tpu.memory_space<vmem>>) attributes {dimension_semantics = [#tpu.dimension_semantics<arbitrary>], iteration_bounds = array<i64: 1>, scalar_prefetch = 2 : i64, scratch_operands = 1 : i64, tpu.core_type = #tpu.core_type<tc>, window_params = [{pipeline_mode = #tpu.pipeline_mode<synchronous>, transform_indices = @transform_0, window_bounds = array<i64: 512, 32>}, {pipeline_mode = #tpu.pipeline_mode<synchronous>, transform_indices = @transform_1, window_bounds = array<i64: 64, 32>}, {pipeline_mode = #tpu.pipeline_mode<synchronous>, transform_indices = @transform_2, window_bounds = array<i64: 2, 1, 32>}, {pipeline_mode = #tpu.pipeline_mode<synchronous>, transform_indices = @transform_3, window_bounds = array<i64: 1, 32>}, {pipeline_mode = #tpu.pipeline_mode<synchronous>, transform_indices = @transform_4, window_bounds = array<i64: 1, 32>}, {pipeline_mode = #tpu.pipeline_mode<synchronous>, transform_indices = @transform_5, window_bounds = array<i64: 2, 32, 96>}, {pipeline_mode = #tpu.pipeline_mode<synchronous>, transform_indices = @transform_6, window_bounds = array<i64: 2, 1, 96>}, {pipeline_mode = #tpu.pipeline_mode<synchronous>, transform_indices = @transform_7, window_bounds = array<i64: 2, 32, 32>}, {pipeline_mode = #tpu.pipeline_mode<synchronous>, transform_indices = @transform_8, window_bounds = array<i64: 2, 1, 32>}, {pipeline_mode = #tpu.pipeline_mode<synchronous>, transform_indices = @transform_9, window_bounds = array<i64: 2, 1, 32>}, {pipeline_mode = #tpu.pipeline_mode<synchronous>, transform_indices = @transform_10, window_bounds = array<i64: 2, 1, 32>}, {pipeline_mode = #tpu.pipeline_mode<synchronous>, transform_indices = @transform_11, window_bounds = array<i64: 2, 32, 64>}, {pipeline_mode = #tpu.pipeline_mode<synchronous>, transform_indices = @transform_12, window_bounds = array<i64: 2, 1, 64>}, {pipeline_mode = #tpu.pipeline_mode<synchronous>, transform_indices = @transform_13, window_bounds = array<i64: 2, 64, 32>}, {pipeline_mode = #tpu.pipeline_mode<synchronous>, transform_indices = @transform_14, window_bounds = array<i64: 2, 1, 32>}, {pipeline_mode = #tpu.pipeline_mode<synchronous>, transform_indices = @transform_15, window_bounds = array<i64: 2, 1, 32>}, {pipeline_mode = #tpu.pipeline_mode<synchronous>, transform_indices = @transform_16, window_bounds = array<i64: 2, 1, 32>}, {pipeline_mode = #tpu.pipeline_mode<synchronous>, transform_indices = @transform_17, window_bounds = array<i64: 32, 32>}, {pipeline_mode = #tpu.pipeline_mode<synchronous>, transform_indices = @transform_18, window_bounds = array<i64: 1, 32>}, {pipeline_mode = #tpu.pipeline_mode<synchronous>, transform_indices = @transform_19, window_bounds = array<i64: 1, 32>}, {pipeline_mode = #tpu.pipeline_mode<synchronous>, transform_indices = @transform_20, window_bounds = array<i64: 1, 32>}, {pipeline_mode = #tpu.pipeline_mode<synchronous>, transform_indices = @transform_21, window_bounds = array<i64: 32, 512>}, {pipeline_mode = #tpu.pipeline_mode<synchronous>, transform_indices = @transform_22, window_bounds = array<i64: 1, 512>}, {pipeline_mode = #tpu.pipeline_mode<synchronous>, transform_indices = @transform_23, window_bounds = array<i64: 8, 512>}]} {
    %c0_i32 = arith.constant 0 : i32
    %c64_i32 = arith.constant 64 : i32
    %0 = arith.addi %c0_i32, %c64_i32 : i32
    %c1_i32 = arith.constant 1 : i32
    scf.for %arg28 = %c0_i32 to %0 step %c1_i32  : i32 {
      %c1_i32_226 = arith.constant 1 : i32
      %641 = arith.muli %arg28, %c1_i32_226 : i32
      %c0_i32_227 = arith.constant 0 : i32
      %642 = arith.addi %c0_i32_227, %641 : i32
      %643 = arith.index_cast %642 : i32 to index
      %644 = memref.load %arg1[%643] : memref<64xi32, #tpu.memory_space<smem>>
      %645 = arith.index_cast %644 : i32 to index
      %c0_228 = arith.constant 0 : index
      %646 = vector.load %arg3[%645, %c0_228] : memref<512x32xf32, #tpu.memory_space<vmem>>, vector<1x32xf32>
      %647 = arith.index_cast %642 : i32 to index
      %c0_229 = arith.constant 0 : index
      %648 = vector.load %arg27[%647, %c0_229] : memref<64x32xf32, #tpu.memory_space<vmem>>, vector<1x32xf32>
      tpu.vector_store %arg27[%647, %c0_229], %646 {strides = array<i32>} : memref<64x32xf32, #tpu.memory_space<vmem>>, vector<1x32xf32>,
    }
    %c64_i32_0 = arith.constant 64 : i32
    %c0 = arith.constant 0 : index
    %c0_1 = arith.constant 0 : index
    %1 = vector.load %arg27[%c0, %c0_1] : memref<64x32xf32, #tpu.memory_space<vmem>>, vector<64x32xf32>
    %c0_2 = arith.constant 0 : index
    %c0_3 = arith.constant 0 : index
    %2 = vector.load %arg4[%c0_2, %c0_3] : memref<64x32xf32, #tpu.memory_space<vmem>>, vector<64x32xf32>
    %3 = arith.addf %1, %2 : vector<64x32xf32>
    %c0_4 = arith.constant 0 : index
    %c0_5 = arith.constant 0 : index
    %4 = vector.load %arg6[%c0_4, %c0_5] : memref<1x32xf32, #tpu.memory_space<vmem>>, vector<1x32xf32>
    %c0_6 = arith.constant 0 : index
    %c0_7 = arith.constant 0 : index
    %5 = vector.load %arg7[%c0_6, %c0_7] : memref<1x32xf32, #tpu.memory_space<vmem>>, vector<1x32xf32>
    %cst = arith.constant dense<0.000000e+00> : vector<64xf32>
    %6 = vector.multi_reduction <add>, %3, %cst [1] : vector<64x32xf32> to vector<64xf32>
    %7 = vector.shape_cast %6 : vector<64xf32> to vector<64x1xf32>
    %cst_8 = arith.constant 3.200000e+01 : f32
    %8 = vector.broadcast %cst_8 : f32 to vector<64x1xf32>
    %9 = arith.divf %7, %8 : vector<64x1xf32>
    %10 = vector.broadcast %9 : vector<64x1xf32> to vector<64x32xf32>
    %11 = arith.subf %3, %10 : vector<64x32xf32>
    %12 = arith.mulf %11, %11 : vector<64x32xf32>
    %cst_9 = arith.constant dense<0.000000e+00> : vector<64xf32>
    %13 = vector.multi_reduction <add>, %12, %cst_9 [1] : vector<64x32xf32> to vector<64xf32>
    %14 = vector.shape_cast %13 : vector<64xf32> to vector<64x1xf32>
    %cst_10 = arith.constant 3.200000e+01 : f32
    %15 = vector.broadcast %cst_10 : f32 to vector<64x1xf32>
    %16 = arith.divf %14, %15 : vector<64x1xf32>
    %17 = vector.broadcast %9 : vector<64x1xf32> to vector<64x32xf32>
    %18 = arith.subf %3, %17 : vector<64x32xf32>
    %cst_11 = arith.constant 9.99999996E-13 : f32
    %19 = vector.broadcast %cst_11 : f32 to vector<64x1xf32>
    %20 = arith.addf %16, %19 : vector<64x1xf32>
    %21 = math.rsqrt %20 : vector<64x1xf32>
    %22 = vector.broadcast %21 : vector<64x1xf32> to vector<64x32xf32>
    %23 = arith.mulf %18, %22 : vector<64x32xf32>
    %24 = vector.broadcast %4 : vector<1x32xf32> to vector<64x32xf32>
    %25 = arith.mulf %23, %24 : vector<64x32xf32>
    %26 = vector.broadcast %5 : vector<1x32xf32> to vector<64x32xf32>
    %27 = arith.addf %25, %26 : vector<64x32xf32>
    %c0_12 = arith.constant 0 : index
    %c0_13 = arith.constant 0 : index
    %c0_14 = arith.constant 0 : index
    %28 = vector.load %arg5[%c0_12, %c0_13, %c0_14] : memref<2x1x32xf32, #tpu.memory_space<vmem>>, vector<1x1x32xf32>
    %29 = vector.shape_cast %28 : vector<1x1x32xf32> to vector<1x32xf32>
    %cst_15 = arith.constant 1.000000e+00 : f32
    %30 = vector.broadcast %cst_15 : f32 to vector<1x32xf32>
    %31 = arith.subf %29, %30 : vector<1x32xf32>
    %cst_16 = arith.constant 1.000000e+09 : f32
    %32 = vector.broadcast %cst_16 : f32 to vector<1x32xf32>
    %33 = arith.mulf %31, %32 : vector<1x32xf32>
    %c1 = arith.constant 1 : index
    %c0_17 = arith.constant 0 : index
    %c0_18 = arith.constant 0 : index
    %34 = vector.load %arg5[%c1, %c0_17, %c0_18] : memref<2x1x32xf32, #tpu.memory_space<vmem>>, vector<1x1x32xf32>
    %35 = vector.shape_cast %34 : vector<1x1x32xf32> to vector<1x32xf32>
    %cst_19 = arith.constant 1.000000e+00 : f32
    %36 = vector.broadcast %cst_19 : f32 to vector<1x32xf32>
    %37 = arith.subf %35, %36 : vector<1x32xf32>
    %cst_20 = arith.constant 1.000000e+09 : f32
    %38 = vector.broadcast %cst_20 : f32 to vector<1x32xf32>
    %39 = arith.mulf %37, %38 : vector<1x32xf32>
    %40 = arith.truncf %27 : vector<64x32xf32> to vector<64x32xbf16>
    %c0_21 = arith.constant 0 : index
    %c0_22 = arith.constant 0 : index
    %c0_23 = arith.constant 0 : index
    %41 = vector.load %arg8[%c0_21, %c0_22, %c0_23] : memref<2x32x96xbf16, #tpu.memory_space<vmem>>, vector<1x32x96xbf16>
    %42 = vector.shape_cast %41 : vector<1x32x96xbf16> to vector<32x96xbf16>
    %cst_24 = arith.constant dense<0.000000e+00> : vector<64x96xf32>
    %43 = tpu.matmul %40, %42, %cst_24 {dimension_numbers = #tpu.dot_dimension_numbers<[1], [0], [0], [1], [0, 0, 1, 1], [], []>} : vector<64x32xbf16>, vector<32x96xbf16>, vector<64x96xf32> -> vector<64x96xf32>
    %c0_25 = arith.constant 0 : index
    %c0_26 = arith.constant 0 : index
    %c0_27 = arith.constant 0 : index
    %44 = vector.load %arg9[%c0_25, %c0_26, %c0_27] : memref<2x1x96xf32, #tpu.memory_space<vmem>>, vector<1x1x96xf32>
    %45 = vector.shape_cast %44 : vector<1x1x96xf32> to vector<1x96xf32>
    %46 = vector.broadcast %45 : vector<1x96xf32> to vector<64x96xf32>
    %47 = arith.addf %43, %46 : vector<64x96xf32>
    %48 = vector.extract_strided_slice %47 {offsets = [0, 0], sizes = [64, 8], strides = [1, 1]} : vector<64x96xf32> to vector<64x8xf32>
    %49 = arith.truncf %48 : vector<64x8xf32> to vector<64x8xbf16>
    %50 = vector.extract_strided_slice %47 {offsets = [0, 32], sizes = [64, 8], strides = [1, 1]} : vector<64x96xf32> to vector<64x8xf32>
    %51 = arith.truncf %50 : vector<64x8xf32> to vector<64x8xbf16>
    %52 = vector.extract_strided_slice %47 {offsets = [0, 64], sizes = [64, 8], strides = [1, 1]} : vector<64x96xf32> to vector<64x8xf32>
    %53 = arith.truncf %52 : vector<64x8xf32> to vector<64x8xbf16>
    %54 = vector.extract_strided_slice %49 {offsets = [0, 0], sizes = [32, 8], strides = [1, 1]} : vector<64x8xbf16> to vector<32x8xbf16>
    %55 = vector.extract_strided_slice %51 {offsets = [0, 0], sizes = [32, 8], strides = [1, 1]} : vector<64x8xbf16> to vector<32x8xbf16>
    %56 = vector.extract_strided_slice %53 {offsets = [0, 0], sizes = [32, 8], strides = [1, 1]} : vector<64x8xbf16> to vector<32x8xbf16>
    "tpu.trace_start"() <{level = 10 : i32, message = "qd,kd->qk"}> : () -> ()
    %cst_28 = arith.constant dense<0.000000e+00> : vector<32x32xf32>
    %57 = tpu.matmul %54, %55, %cst_28 {dimension_numbers = #tpu.dot_dimension_numbers<[1], [1], [0], [0], [0, 0, 1, 0], [], []>} : vector<32x8xbf16>, vector<32x8xbf16>, vector<32x32xf32> -> vector<32x32xf32>
    "tpu.trace_stop"() : () -> ()
    %58 = vector.broadcast %33 : vector<1x32xf32> to vector<32x32xf32>
    %59 = arith.addf %57, %58 : vector<32x32xf32>
    %cst_29 = arith.constant dense<0xFF800000> : vector<32xf32>
    %60 = vector.multi_reduction <maximumf>, %59, %cst_29 [1] : vector<32x32xf32> to vector<32xf32>
    %61 = vector.shape_cast %60 : vector<32xf32> to vector<32x1xf32>
    %62 = vector.broadcast %61 : vector<32x1xf32> to vector<32x32xf32>
    %63 = arith.subf %59, %62 : vector<32x32xf32>
    %64 = math.exp %63 : vector<32x32xf32>
    %cst_30 = arith.constant dense<0.000000e+00> : vector<32xf32>
    %65 = vector.multi_reduction <add>, %64, %cst_30 [1] : vector<32x32xf32> to vector<32xf32>
    %66 = vector.shape_cast %65 : vector<32xf32> to vector<32x1xf32>
    %67 = tpu.reciprocal %66 {approx = true} : vector<32x1xf32> -> vector<32x1xf32>
    %68 = vector.broadcast %67 : vector<32x1xf32> to vector<32x32xf32>
    %69 = arith.mulf %64, %68 : vector<32x32xf32>
    %70 = arith.truncf %69 : vector<32x32xf32> to vector<32x32xbf16>
    %cst_31 = arith.constant dense<0.000000e+00> : vector<32x8xf32>
    %71 = tpu.matmul %70, %56, %cst_31 {dimension_numbers = #tpu.dot_dimension_numbers<[1], [0], [0], [1], [0, 0, 1, 1], [], []>} : vector<32x32xbf16>, vector<32x8xbf16>, vector<32x8xf32> -> vector<32x8xf32>
    %72 = vector.extract_strided_slice %49 {offsets = [32, 0], sizes = [32, 8], strides = [1, 1]} : vector<64x8xbf16> to vector<32x8xbf16>
    %73 = vector.extract_strided_slice %51 {offsets = [32, 0], sizes = [32, 8], strides = [1, 1]} : vector<64x8xbf16> to vector<32x8xbf16>
    %74 = vector.extract_strided_slice %53 {offsets = [32, 0], sizes = [32, 8], strides = [1, 1]} : vector<64x8xbf16> to vector<32x8xbf16>
    "tpu.trace_start"() <{level = 10 : i32, message = "qd,kd->qk"}> : () -> ()
    %cst_32 = arith.constant dense<0.000000e+00> : vector<32x32xf32>
    %75 = tpu.matmul %72, %73, %cst_32 {dimension_numbers = #tpu.dot_dimension_numbers<[1], [1], [0], [0], [0, 0, 1, 0], [], []>} : vector<32x8xbf16>, vector<32x8xbf16>, vector<32x32xf32> -> vector<32x32xf32>
    "tpu.trace_stop"() : () -> ()
    %76 = vector.broadcast %39 : vector<1x32xf32> to vector<32x32xf32>
    %77 = arith.addf %75, %76 : vector<32x32xf32>
    %cst_33 = arith.constant dense<0xFF800000> : vector<32xf32>
    %78 = vector.multi_reduction <maximumf>, %77, %cst_33 [1] : vector<32x32xf32> to vector<32xf32>
    %79 = vector.shape_cast %78 : vector<32xf32> to vector<32x1xf32>
    %80 = vector.broadcast %79 : vector<32x1xf32> to vector<32x32xf32>
    %81 = arith.subf %77, %80 : vector<32x32xf32>
    %82 = math.exp %81 : vector<32x32xf32>
    %cst_34 = arith.constant dense<0.000000e+00> : vector<32xf32>
    %83 = vector.multi_reduction <add>, %82, %cst_34 [1] : vector<32x32xf32> to vector<32xf32>
    %84 = vector.shape_cast %83 : vector<32xf32> to vector<32x1xf32>
    %85 = tpu.reciprocal %84 {approx = true} : vector<32x1xf32> -> vector<32x1xf32>
    %86 = vector.broadcast %85 : vector<32x1xf32> to vector<32x32xf32>
    %87 = arith.mulf %82, %86 : vector<32x32xf32>
    %88 = arith.truncf %87 : vector<32x32xf32> to vector<32x32xbf16>
    %cst_35 = arith.constant dense<0.000000e+00> : vector<32x8xf32>
    %89 = tpu.matmul %88, %74, %cst_35 {dimension_numbers = #tpu.dot_dimension_numbers<[1], [0], [0], [1], [0, 0, 1, 1], [], []>} : vector<32x32xbf16>, vector<32x8xbf16>, vector<32x8xf32> -> vector<32x8xf32>
    %90 = vector.extract_strided_slice %47 {offsets = [0, 8], sizes = [64, 8], strides = [1, 1]} : vector<64x96xf32> to vector<64x8xf32>
    %91 = arith.truncf %90 : vector<64x8xf32> to vector<64x8xbf16>
    %92 = vector.extract_strided_slice %47 {offsets = [0, 40], sizes = [64, 8], strides = [1, 1]} : vector<64x96xf32> to vector<64x8xf32>
    %93 = arith.truncf %92 : vector<64x8xf32> to vector<64x8xbf16>
    %94 = vector.extract_strided_slice %47 {offsets = [0, 72], sizes = [64, 8], strides = [1, 1]} : vector<64x96xf32> to vector<64x8xf32>
    %95 = arith.truncf %94 : vector<64x8xf32> to vector<64x8xbf16>
    %96 = vector.extract_strided_slice %91 {offsets = [0, 0], sizes = [32, 8], strides = [1, 1]} : vector<64x8xbf16> to vector<32x8xbf16>
    %97 = vector.extract_strided_slice %93 {offsets = [0, 0], sizes = [32, 8], strides = [1, 1]} : vector<64x8xbf16> to vector<32x8xbf16>
    %98 = vector.extract_strided_slice %95 {offsets = [0, 0], sizes = [32, 8], strides = [1, 1]} : vector<64x8xbf16> to vector<32x8xbf16>
    "tpu.trace_start"() <{level = 10 : i32, message = "qd,kd->qk"}> : () -> ()
    %cst_36 = arith.constant dense<0.000000e+00> : vector<32x32xf32>
    %99 = tpu.matmul %96, %97, %cst_36 {dimension_numbers = #tpu.dot_dimension_numbers<[1], [1], [0], [0], [0, 0, 1, 0], [], []>} : vector<32x8xbf16>, vector<32x8xbf16>, vector<32x32xf32> -> vector<32x32xf32>
    "tpu.trace_stop"() : () -> ()
    %100 = vector.broadcast %33 : vector<1x32xf32> to vector<32x32xf32>
    %101 = arith.addf %99, %100 : vector<32x32xf32>
    %cst_37 = arith.constant dense<0xFF800000> : vector<32xf32>
    %102 = vector.multi_reduction <maximumf>, %101, %cst_37 [1] : vector<32x32xf32> to vector<32xf32>
    %103 = vector.shape_cast %102 : vector<32xf32> to vector<32x1xf32>
    %104 = vector.broadcast %103 : vector<32x1xf32> to vector<32x32xf32>
    %105 = arith.subf %101, %104 : vector<32x32xf32>
    %106 = math.exp %105 : vector<32x32xf32>
    %cst_38 = arith.constant dense<0.000000e+00> : vector<32xf32>
    %107 = vector.multi_reduction <add>, %106, %cst_38 [1] : vector<32x32xf32> to vector<32xf32>
    %108 = vector.shape_cast %107 : vector<32xf32> to vector<32x1xf32>
    %109 = tpu.reciprocal %108 {approx = true} : vector<32x1xf32> -> vector<32x1xf32>
    %110 = vector.broadcast %109 : vector<32x1xf32> to vector<32x32xf32>
    %111 = arith.mulf %106, %110 : vector<32x32xf32>
    %112 = arith.truncf %111 : vector<32x32xf32> to vector<32x32xbf16>
    %cst_39 = arith.constant dense<0.000000e+00> : vector<32x8xf32>
    %113 = tpu.matmul %112, %98, %cst_39 {dimension_numbers = #tpu.dot_dimension_numbers<[1], [0], [0], [1], [0, 0, 1, 1], [], []>} : vector<32x32xbf16>, vector<32x8xbf16>, vector<32x8xf32> -> vector<32x8xf32>
    %114 = vector.extract_strided_slice %91 {offsets = [32, 0], sizes = [32, 8], strides = [1, 1]} : vector<64x8xbf16> to vector<32x8xbf16>
    %115 = vector.extract_strided_slice %93 {offsets = [32, 0], sizes = [32, 8], strides = [1, 1]} : vector<64x8xbf16> to vector<32x8xbf16>
    %116 = vector.extract_strided_slice %95 {offsets = [32, 0], sizes = [32, 8], strides = [1, 1]} : vector<64x8xbf16> to vector<32x8xbf16>
    "tpu.trace_start"() <{level = 10 : i32, message = "qd,kd->qk"}> : () -> ()
    %cst_40 = arith.constant dense<0.000000e+00> : vector<32x32xf32>
    %117 = tpu.matmul %114, %115, %cst_40 {dimension_numbers = #tpu.dot_dimension_numbers<[1], [1], [0], [0], [0, 0, 1, 0], [], []>} : vector<32x8xbf16>, vector<32x8xbf16>, vector<32x32xf32> -> vector<32x32xf32>
    "tpu.trace_stop"() : () -> ()
    %118 = vector.broadcast %39 : vector<1x32xf32> to vector<32x32xf32>
    %119 = arith.addf %117, %118 : vector<32x32xf32>
    %cst_41 = arith.constant dense<0xFF800000> : vector<32xf32>
    %120 = vector.multi_reduction <maximumf>, %119, %cst_41 [1] : vector<32x32xf32> to vector<32xf32>
    %121 = vector.shape_cast %120 : vector<32xf32> to vector<32x1xf32>
    %122 = vector.broadcast %121 : vector<32x1xf32> to vector<32x32xf32>
    %123 = arith.subf %119, %122 : vector<32x32xf32>
    %124 = math.exp %123 : vector<32x32xf32>
    %cst_42 = arith.constant dense<0.000000e+00> : vector<32xf32>
    %125 = vector.multi_reduction <add>, %124, %cst_42 [1] : vector<32x32xf32> to vector<32xf32>
    %126 = vector.shape_cast %125 : vector<32xf32> to vector<32x1xf32>
    %127 = tpu.reciprocal %126 {approx = true} : vector<32x1xf32> -> vector<32x1xf32>
    %128 = vector.broadcast %127 : vector<32x1xf32> to vector<32x32xf32>
    %129 = arith.mulf %124, %128 : vector<32x32xf32>
    %130 = arith.truncf %129 : vector<32x32xf32> to vector<32x32xbf16>
    %cst_43 = arith.constant dense<0.000000e+00> : vector<32x8xf32>
    %131 = tpu.matmul %130, %116, %cst_43 {dimension_numbers = #tpu.dot_dimension_numbers<[1], [0], [0], [1], [0, 0, 1, 1], [], []>} : vector<32x32xbf16>, vector<32x8xbf16>, vector<32x8xf32> -> vector<32x8xf32>
    %132 = vector.extract_strided_slice %47 {offsets = [0, 16], sizes = [64, 8], strides = [1, 1]} : vector<64x96xf32> to vector<64x8xf32>
    %133 = arith.truncf %132 : vector<64x8xf32> to vector<64x8xbf16>
    %134 = vector.extract_strided_slice %47 {offsets = [0, 48], sizes = [64, 8], strides = [1, 1]} : vector<64x96xf32> to vector<64x8xf32>
    %135 = arith.truncf %134 : vector<64x8xf32> to vector<64x8xbf16>
    %136 = vector.extract_strided_slice %47 {offsets = [0, 80], sizes = [64, 8], strides = [1, 1]} : vector<64x96xf32> to vector<64x8xf32>
    %137 = arith.truncf %136 : vector<64x8xf32> to vector<64x8xbf16>
    %138 = vector.extract_strided_slice %133 {offsets = [0, 0], sizes = [32, 8], strides = [1, 1]} : vector<64x8xbf16> to vector<32x8xbf16>
    %139 = vector.extract_strided_slice %135 {offsets = [0, 0], sizes = [32, 8], strides = [1, 1]} : vector<64x8xbf16> to vector<32x8xbf16>
    %140 = vector.extract_strided_slice %137 {offsets = [0, 0], sizes = [32, 8], strides = [1, 1]} : vector<64x8xbf16> to vector<32x8xbf16>
    "tpu.trace_start"() <{level = 10 : i32, message = "qd,kd->qk"}> : () -> ()
    %cst_44 = arith.constant dense<0.000000e+00> : vector<32x32xf32>
    %141 = tpu.matmul %138, %139, %cst_44 {dimension_numbers = #tpu.dot_dimension_numbers<[1], [1], [0], [0], [0, 0, 1, 0], [], []>} : vector<32x8xbf16>, vector<32x8xbf16>, vector<32x32xf32> -> vector<32x32xf32>
    "tpu.trace_stop"() : () -> ()
    %142 = vector.broadcast %33 : vector<1x32xf32> to vector<32x32xf32>
    %143 = arith.addf %141, %142 : vector<32x32xf32>
    %cst_45 = arith.constant dense<0xFF800000> : vector<32xf32>
    %144 = vector.multi_reduction <maximumf>, %143, %cst_45 [1] : vector<32x32xf32> to vector<32xf32>
    %145 = vector.shape_cast %144 : vector<32xf32> to vector<32x1xf32>
    %146 = vector.broadcast %145 : vector<32x1xf32> to vector<32x32xf32>
    %147 = arith.subf %143, %146 : vector<32x32xf32>
    %148 = math.exp %147 : vector<32x32xf32>
    %cst_46 = arith.constant dense<0.000000e+00> : vector<32xf32>
    %149 = vector.multi_reduction <add>, %148, %cst_46 [1] : vector<32x32xf32> to vector<32xf32>
    %150 = vector.shape_cast %149 : vector<32xf32> to vector<32x1xf32>
    %151 = tpu.reciprocal %150 {approx = true} : vector<32x1xf32> -> vector<32x1xf32>
    %152 = vector.broadcast %151 : vector<32x1xf32> to vector<32x32xf32>
    %153 = arith.mulf %148, %152 : vector<32x32xf32>
    %154 = arith.truncf %153 : vector<32x32xf32> to vector<32x32xbf16>
    %cst_47 = arith.constant dense<0.000000e+00> : vector<32x8xf32>
    %155 = tpu.matmul %154, %140, %cst_47 {dimension_numbers = #tpu.dot_dimension_numbers<[1], [0], [0], [1], [0, 0, 1, 1], [], []>} : vector<32x32xbf16>, vector<32x8xbf16>, vector<32x8xf32> -> vector<32x8xf32>
    %156 = vector.extract_strided_slice %133 {offsets = [32, 0], sizes = [32, 8], strides = [1, 1]} : vector<64x8xbf16> to vector<32x8xbf16>
    %157 = vector.extract_strided_slice %135 {offsets = [32, 0], sizes = [32, 8], strides = [1, 1]} : vector<64x8xbf16> to vector<32x8xbf16>
    %158 = vector.extract_strided_slice %137 {offsets = [32, 0], sizes = [32, 8], strides = [1, 1]} : vector<64x8xbf16> to vector<32x8xbf16>
    "tpu.trace_start"() <{level = 10 : i32, message = "qd,kd->qk"}> : () -> ()
    %cst_48 = arith.constant dense<0.000000e+00> : vector<32x32xf32>
    %159 = tpu.matmul %156, %157, %cst_48 {dimension_numbers = #tpu.dot_dimension_numbers<[1], [1], [0], [0], [0, 0, 1, 0], [], []>} : vector<32x8xbf16>, vector<32x8xbf16>, vector<32x32xf32> -> vector<32x32xf32>
    "tpu.trace_stop"() : () -> ()
    %160 = vector.broadcast %39 : vector<1x32xf32> to vector<32x32xf32>
    %161 = arith.addf %159, %160 : vector<32x32xf32>
    %cst_49 = arith.constant dense<0xFF800000> : vector<32xf32>
    %162 = vector.multi_reduction <maximumf>, %161, %cst_49 [1] : vector<32x32xf32> to vector<32xf32>
    %163 = vector.shape_cast %162 : vector<32xf32> to vector<32x1xf32>
    %164 = vector.broadcast %163 : vector<32x1xf32> to vector<32x32xf32>
    %165 = arith.subf %161, %164 : vector<32x32xf32>
    %166 = math.exp %165 : vector<32x32xf32>
    %cst_50 = arith.constant dense<0.000000e+00> : vector<32xf32>
    %167 = vector.multi_reduction <add>, %166, %cst_50 [1] : vector<32x32xf32> to vector<32xf32>
    %168 = vector.shape_cast %167 : vector<32xf32> to vector<32x1xf32>
    %169 = tpu.reciprocal %168 {approx = true} : vector<32x1xf32> -> vector<32x1xf32>
    %170 = vector.broadcast %169 : vector<32x1xf32> to vector<32x32xf32>
    %171 = arith.mulf %166, %170 : vector<32x32xf32>
    %172 = arith.truncf %171 : vector<32x32xf32> to vector<32x32xbf16>
    %cst_51 = arith.constant dense<0.000000e+00> : vector<32x8xf32>
    %173 = tpu.matmul %172, %158, %cst_51 {dimension_numbers = #tpu.dot_dimension_numbers<[1], [0], [0], [1], [0, 0, 1, 1], [], []>} : vector<32x32xbf16>, vector<32x8xbf16>, vector<32x8xf32> -> vector<32x8xf32>
    %174 = vector.extract_strided_slice %47 {offsets = [0, 24], sizes = [64, 8], strides = [1, 1]} : vector<64x96xf32> to vector<64x8xf32>
    %175 = arith.truncf %174 : vector<64x8xf32> to vector<64x8xbf16>
    %176 = vector.extract_strided_slice %47 {offsets = [0, 56], sizes = [64, 8], strides = [1, 1]} : vector<64x96xf32> to vector<64x8xf32>
    %177 = arith.truncf %176 : vector<64x8xf32> to vector<64x8xbf16>
    %178 = vector.extract_strided_slice %47 {offsets = [0, 88], sizes = [64, 8], strides = [1, 1]} : vector<64x96xf32> to vector<64x8xf32>
    %179 = arith.truncf %178 : vector<64x8xf32> to vector<64x8xbf16>
    %180 = vector.extract_strided_slice %175 {offsets = [0, 0], sizes = [32, 8], strides = [1, 1]} : vector<64x8xbf16> to vector<32x8xbf16>
    %181 = vector.extract_strided_slice %177 {offsets = [0, 0], sizes = [32, 8], strides = [1, 1]} : vector<64x8xbf16> to vector<32x8xbf16>
    %182 = vector.extract_strided_slice %179 {offsets = [0, 0], sizes = [32, 8], strides = [1, 1]} : vector<64x8xbf16> to vector<32x8xbf16>
    "tpu.trace_start"() <{level = 10 : i32, message = "qd,kd->qk"}> : () -> ()
    %cst_52 = arith.constant dense<0.000000e+00> : vector<32x32xf32>
    %183 = tpu.matmul %180, %181, %cst_52 {dimension_numbers = #tpu.dot_dimension_numbers<[1], [1], [0], [0], [0, 0, 1, 0], [], []>} : vector<32x8xbf16>, vector<32x8xbf16>, vector<32x32xf32> -> vector<32x32xf32>
    "tpu.trace_stop"() : () -> ()
    %184 = vector.broadcast %33 : vector<1x32xf32> to vector<32x32xf32>
    %185 = arith.addf %183, %184 : vector<32x32xf32>
    %cst_53 = arith.constant dense<0xFF800000> : vector<32xf32>
    %186 = vector.multi_reduction <maximumf>, %185, %cst_53 [1] : vector<32x32xf32> to vector<32xf32>
    %187 = vector.shape_cast %186 : vector<32xf32> to vector<32x1xf32>
    %188 = vector.broadcast %187 : vector<32x1xf32> to vector<32x32xf32>
    %189 = arith.subf %185, %188 : vector<32x32xf32>
    %190 = math.exp %189 : vector<32x32xf32>
    %cst_54 = arith.constant dense<0.000000e+00> : vector<32xf32>
    %191 = vector.multi_reduction <add>, %190, %cst_54 [1] : vector<32x32xf32> to vector<32xf32>
    %192 = vector.shape_cast %191 : vector<32xf32> to vector<32x1xf32>
    %193 = tpu.reciprocal %192 {approx = true} : vector<32x1xf32> -> vector<32x1xf32>
    %194 = vector.broadcast %193 : vector<32x1xf32> to vector<32x32xf32>
    %195 = arith.mulf %190, %194 : vector<32x32xf32>
    %196 = arith.truncf %195 : vector<32x32xf32> to vector<32x32xbf16>
    %cst_55 = arith.constant dense<0.000000e+00> : vector<32x8xf32>
    %197 = tpu.matmul %196, %182, %cst_55 {dimension_numbers = #tpu.dot_dimension_numbers<[1], [0], [0], [1], [0, 0, 1, 1], [], []>} : vector<32x32xbf16>, vector<32x8xbf16>, vector<32x8xf32> -> vector<32x8xf32>
    %198 = vector.extract_strided_slice %175 {offsets = [32, 0], sizes = [32, 8], strides = [1, 1]} : vector<64x8xbf16> to vector<32x8xbf16>
    %199 = vector.extract_strided_slice %177 {offsets = [32, 0], sizes = [32, 8], strides = [1, 1]} : vector<64x8xbf16> to vector<32x8xbf16>
    %200 = vector.extract_strided_slice %179 {offsets = [32, 0], sizes = [32, 8], strides = [1, 1]} : vector<64x8xbf16> to vector<32x8xbf16>
    "tpu.trace_start"() <{level = 10 : i32, message = "qd,kd->qk"}> : () -> ()
    %cst_56 = arith.constant dense<0.000000e+00> : vector<32x32xf32>
    %201 = tpu.matmul %198, %199, %cst_56 {dimension_numbers = #tpu.dot_dimension_numbers<[1], [1], [0], [0], [0, 0, 1, 0], [], []>} : vector<32x8xbf16>, vector<32x8xbf16>, vector<32x32xf32> -> vector<32x32xf32>
    "tpu.trace_stop"() : () -> ()
    %202 = vector.broadcast %39 : vector<1x32xf32> to vector<32x32xf32>
    %203 = arith.addf %201, %202 : vector<32x32xf32>
    %cst_57 = arith.constant dense<0xFF800000> : vector<32xf32>
    %204 = vector.multi_reduction <maximumf>, %203, %cst_57 [1] : vector<32x32xf32> to vector<32xf32>
    %205 = vector.shape_cast %204 : vector<32xf32> to vector<32x1xf32>
    %206 = vector.broadcast %205 : vector<32x1xf32> to vector<32x32xf32>
    %207 = arith.subf %203, %206 : vector<32x32xf32>
    %208 = math.exp %207 : vector<32x32xf32>
    %cst_58 = arith.constant dense<0.000000e+00> : vector<32xf32>
    %209 = vector.multi_reduction <add>, %208, %cst_58 [1] : vector<32x32xf32> to vector<32xf32>
    %210 = vector.shape_cast %209 : vector<32xf32> to vector<32x1xf32>
    %211 = tpu.reciprocal %210 {approx = true} : vector<32x1xf32> -> vector<32x1xf32>
    %212 = vector.broadcast %211 : vector<32x1xf32> to vector<32x32xf32>
    %213 = arith.mulf %208, %212 : vector<32x32xf32>
    %214 = arith.truncf %213 : vector<32x32xf32> to vector<32x32xbf16>
    %cst_59 = arith.constant dense<0.000000e+00> : vector<32x8xf32>
    %215 = tpu.matmul %214, %200, %cst_59 {dimension_numbers = #tpu.dot_dimension_numbers<[1], [0], [0], [1], [0, 0, 1, 1], [], []>} : vector<32x32xbf16>, vector<32x8xbf16>, vector<32x8xf32> -> vector<32x8xf32>
    %216 = tpu.concatenate %71, %113, %155, %197 in 1 : vector<32x8xf32>, vector<32x8xf32>, vector<32x8xf32>, vector<32x8xf32> -> vector<32x32xf32>
    %217 = tpu.concatenate %89, %131, %173, %215 in 1 : vector<32x8xf32>, vector<32x8xf32>, vector<32x8xf32>, vector<32x8xf32> -> vector<32x32xf32>
    %218 = tpu.concatenate %216, %217 in 0 : vector<32x32xf32>, vector<32x32xf32> -> vector<64x32xf32>
    %219 = arith.truncf %218 : vector<64x32xf32> to vector<64x32xbf16>
    %c0_60 = arith.constant 0 : index
    %c0_61 = arith.constant 0 : index
    %c0_62 = arith.constant 0 : index
    %220 = vector.load %arg10[%c0_60, %c0_61, %c0_62] : memref<2x32x32xbf16, #tpu.memory_space<vmem>>, vector<1x32x32xbf16>
    %221 = vector.shape_cast %220 : vector<1x32x32xbf16> to vector<32x32xbf16>
    %cst_63 = arith.constant dense<0.000000e+00> : vector<64x32xf32>
    %222 = tpu.matmul %219, %221, %cst_63 {dimension_numbers = #tpu.dot_dimension_numbers<[1], [0], [0], [1], [0, 0, 1, 1], [], []>} : vector<64x32xbf16>, vector<32x32xbf16>, vector<64x32xf32> -> vector<64x32xf32>
    %c0_64 = arith.constant 0 : index
    %c0_65 = arith.constant 0 : index
    %c0_66 = arith.constant 0 : index
    %223 = vector.load %arg11[%c0_64, %c0_65, %c0_66] : memref<2x1x32xf32, #tpu.memory_space<vmem>>, vector<1x1x32xf32>
    %224 = vector.shape_cast %223 : vector<1x1x32xf32> to vector<1x32xf32>
    %225 = vector.broadcast %224 : vector<1x32xf32> to vector<64x32xf32>
    %226 = arith.addf %222, %225 : vector<64x32xf32>
    %227 = arith.addf %27, %226 : vector<64x32xf32>
    %c0_67 = arith.constant 0 : index
    %c0_68 = arith.constant 0 : index
    %c0_69 = arith.constant 0 : index
    %228 = vector.load %arg12[%c0_67, %c0_68, %c0_69] : memref<2x1x32xf32, #tpu.memory_space<vmem>>, vector<1x1x32xf32>
    %229 = vector.shape_cast %228 : vector<1x1x32xf32> to vector<1x32xf32>
    %c0_70 = arith.constant 0 : index
    %c0_71 = arith.constant 0 : index
    %c0_72 = arith.constant 0 : index
    %230 = vector.load %arg13[%c0_70, %c0_71, %c0_72] : memref<2x1x32xf32, #tpu.memory_space<vmem>>, vector<1x1x32xf32>
    %231 = vector.shape_cast %230 : vector<1x1x32xf32> to vector<1x32xf32>
    %cst_73 = arith.constant dense<0.000000e+00> : vector<64xf32>
    %232 = vector.multi_reduction <add>, %227, %cst_73 [1] : vector<64x32xf32> to vector<64xf32>
    %233 = vector.shape_cast %232 : vector<64xf32> to vector<64x1xf32>
    %cst_74 = arith.constant 3.200000e+01 : f32
    %234 = vector.broadcast %cst_74 : f32 to vector<64x1xf32>
    %235 = arith.divf %233, %234 : vector<64x1xf32>
    %236 = vector.broadcast %235 : vector<64x1xf32> to vector<64x32xf32>
    %237 = arith.subf %227, %236 : vector<64x32xf32>
    %238 = arith.mulf %237, %237 : vector<64x32xf32>
    %cst_75 = arith.constant dense<0.000000e+00> : vector<64xf32>
    %239 = vector.multi_reduction <add>, %238, %cst_75 [1] : vector<64x32xf32> to vector<64xf32>
    %240 = vector.shape_cast %239 : vector<64xf32> to vector<64x1xf32>
    %cst_76 = arith.constant 3.200000e+01 : f32
    %241 = vector.broadcast %cst_76 : f32 to vector<64x1xf32>
    %242 = arith.divf %240, %241 : vector<64x1xf32>
    %243 = vector.broadcast %235 : vector<64x1xf32> to vector<64x32xf32>
    %244 = arith.subf %227, %243 : vector<64x32xf32>
    %cst_77 = arith.constant 9.99999996E-13 : f32
    %245 = vector.broadcast %cst_77 : f32 to vector<64x1xf32>
    %246 = arith.addf %242, %245 : vector<64x1xf32>
    %247 = math.rsqrt %246 : vector<64x1xf32>
    %248 = vector.broadcast %247 : vector<64x1xf32> to vector<64x32xf32>
    %249 = arith.mulf %244, %248 : vector<64x32xf32>
    %250 = vector.broadcast %229 : vector<1x32xf32> to vector<64x32xf32>
    %251 = arith.mulf %249, %250 : vector<64x32xf32>
    %252 = vector.broadcast %231 : vector<1x32xf32> to vector<64x32xf32>
    %253 = arith.addf %251, %252 : vector<64x32xf32>
    %254 = arith.truncf %253 : vector<64x32xf32> to vector<64x32xbf16>
    %c0_78 = arith.constant 0 : index
    %c0_79 = arith.constant 0 : index
    %c0_80 = arith.constant 0 : index
    %255 = vector.load %arg14[%c0_78, %c0_79, %c0_80] : memref<2x32x64xbf16, #tpu.memory_space<vmem>>, vector<1x32x64xbf16>
    %256 = vector.shape_cast %255 : vector<1x32x64xbf16> to vector<32x64xbf16>
    %cst_81 = arith.constant dense<0.000000e+00> : vector<64x64xf32>
    %257 = tpu.matmul %254, %256, %cst_81 {dimension_numbers = #tpu.dot_dimension_numbers<[1], [0], [0], [1], [0, 0, 1, 1], [], []>} : vector<64x32xbf16>, vector<32x64xbf16>, vector<64x64xf32> -> vector<64x64xf32>
    %c0_82 = arith.constant 0 : index
    %c0_83 = arith.constant 0 : index
    %c0_84 = arith.constant 0 : index
    %258 = vector.load %arg15[%c0_82, %c0_83, %c0_84] : memref<2x1x64xf32, #tpu.memory_space<vmem>>, vector<1x1x64xf32>
    %259 = vector.shape_cast %258 : vector<1x1x64xf32> to vector<1x64xf32>
    %260 = vector.broadcast %259 : vector<1x64xf32> to vector<64x64xf32>
    %261 = arith.addf %257, %260 : vector<64x64xf32>
    %cst_85 = arith.constant 5.000000e-01 : f32
    %262 = vector.broadcast %cst_85 : f32 to vector<64x64xf32>
    %263 = arith.mulf %262, %261 : vector<64x64xf32>
    %cst_86 = arith.constant 4.471500e-02 : f32
    %264 = vector.broadcast %cst_86 : f32 to vector<64x64xf32>
    %265 = arith.mulf %264, %261 : vector<64x64xf32>
    %266 = arith.mulf %265, %261 : vector<64x64xf32>
    %267 = arith.mulf %266, %261 : vector<64x64xf32>
    %268 = arith.addf %261, %267 : vector<64x64xf32>
    %cst_87 = arith.constant 0.797884583 : f32
    %269 = vector.broadcast %cst_87 : f32 to vector<64x64xf32>
    %270 = arith.mulf %269, %268 : vector<64x64xf32>
    %271 = math.tanh %270 : vector<64x64xf32>
    %cst_88 = arith.constant 1.000000e+00 : f32
    %272 = vector.broadcast %cst_88 : f32 to vector<64x64xf32>
    %273 = arith.addf %272, %271 : vector<64x64xf32>
    %274 = arith.mulf %263, %273 : vector<64x64xf32>
    %275 = arith.truncf %274 : vector<64x64xf32> to vector<64x64xbf16>
    %c0_89 = arith.constant 0 : index
    %c0_90 = arith.constant 0 : index
    %c0_91 = arith.constant 0 : index
    %276 = vector.load %arg16[%c0_89, %c0_90, %c0_91] : memref<2x64x32xbf16, #tpu.memory_space<vmem>>, vector<1x64x32xbf16>
    %277 = vector.shape_cast %276 : vector<1x64x32xbf16> to vector<64x32xbf16>
    %cst_92 = arith.constant dense<0.000000e+00> : vector<64x32xf32>
    %278 = tpu.matmul %275, %277, %cst_92 {dimension_numbers = #tpu.dot_dimension_numbers<[1], [0], [0], [1], [0, 0, 1, 1], [], []>} : vector<64x64xbf16>, vector<64x32xbf16>, vector<64x32xf32> -> vector<64x32xf32>
    %c0_93 = arith.constant 0 : index
    %c0_94 = arith.constant 0 : index
    %c0_95 = arith.constant 0 : index
    %279 = vector.load %arg17[%c0_93, %c0_94, %c0_95] : memref<2x1x32xf32, #tpu.memory_space<vmem>>, vector<1x1x32xf32>
    %280 = vector.shape_cast %279 : vector<1x1x32xf32> to vector<1x32xf32>
    %281 = vector.broadcast %280 : vector<1x32xf32> to vector<64x32xf32>
    %282 = arith.addf %278, %281 : vector<64x32xf32>
    %283 = arith.addf %253, %282 : vector<64x32xf32>
    %c0_96 = arith.constant 0 : index
    %c0_97 = arith.constant 0 : index
    %c0_98 = arith.constant 0 : index
    %284 = vector.load %arg18[%c0_96, %c0_97, %c0_98] : memref<2x1x32xf32, #tpu.memory_space<vmem>>, vector<1x1x32xf32>
    %285 = vector.shape_cast %284 : vector<1x1x32xf32> to vector<1x32xf32>
    %c0_99 = arith.constant 0 : index
    %c0_100 = arith.constant 0 : index
    %c0_101 = arith.constant 0 : index
    %286 = vector.load %arg19[%c0_99, %c0_100, %c0_101] : memref<2x1x32xf32, #tpu.memory_space<vmem>>, vector<1x1x32xf32>
    %287 = vector.shape_cast %286 : vector<1x1x32xf32> to vector<1x32xf32>
    %cst_102 = arith.constant dense<0.000000e+00> : vector<64xf32>
    %288 = vector.multi_reduction <add>, %283, %cst_102 [1] : vector<64x32xf32> to vector<64xf32>
    %289 = vector.shape_cast %288 : vector<64xf32> to vector<64x1xf32>
    %cst_103 = arith.constant 3.200000e+01 : f32
    %290 = vector.broadcast %cst_103 : f32 to vector<64x1xf32>
    %291 = arith.divf %289, %290 : vector<64x1xf32>
    %292 = vector.broadcast %291 : vector<64x1xf32> to vector<64x32xf32>
    %293 = arith.subf %283, %292 : vector<64x32xf32>
    %294 = arith.mulf %293, %293 : vector<64x32xf32>
    %cst_104 = arith.constant dense<0.000000e+00> : vector<64xf32>
    %295 = vector.multi_reduction <add>, %294, %cst_104 [1] : vector<64x32xf32> to vector<64xf32>
    %296 = vector.shape_cast %295 : vector<64xf32> to vector<64x1xf32>
    %cst_105 = arith.constant 3.200000e+01 : f32
    %297 = vector.broadcast %cst_105 : f32 to vector<64x1xf32>
    %298 = arith.divf %296, %297 : vector<64x1xf32>
    %299 = vector.broadcast %291 : vector<64x1xf32> to vector<64x32xf32>
    %300 = arith.subf %283, %299 : vector<64x32xf32>
    %cst_106 = arith.constant 9.99999996E-13 : f32
    %301 = vector.broadcast %cst_106 : f32 to vector<64x1xf32>
    %302 = arith.addf %298, %301 : vector<64x1xf32>
    %303 = math.rsqrt %302 : vector<64x1xf32>
    %304 = vector.broadcast %303 : vector<64x1xf32> to vector<64x32xf32>
    %305 = arith.mulf %300, %304 : vector<64x32xf32>
    %306 = vector.broadcast %285 : vector<1x32xf32> to vector<64x32xf32>
    %307 = arith.mulf %305, %306 : vector<64x32xf32>
    %308 = vector.broadcast %287 : vector<1x32xf32> to vector<64x32xf32>
    %309 = arith.addf %307, %308 : vector<64x32xf32>
    %310 = arith.truncf %309 : vector<64x32xf32> to vector<64x32xbf16>
    %c1_107 = arith.constant 1 : index
    %c0_108 = arith.constant 0 : index
    %c0_109 = arith.constant 0 : index
    %311 = vector.load %arg8[%c1_107, %c0_108, %c0_109] : memref<2x32x96xbf16, #tpu.memory_space<vmem>>, vector<1x32x96xbf16>
    %312 = vector.shape_cast %311 : vector<1x32x96xbf16> to vector<32x96xbf16>
    %cst_110 = arith.constant dense<0.000000e+00> : vector<64x96xf32>
    %313 = tpu.matmul %310, %312, %cst_110 {dimension_numbers = #tpu.dot_dimension_numbers<[1], [0], [0], [1], [0, 0, 1, 1], [], []>} : vector<64x32xbf16>, vector<32x96xbf16>, vector<64x96xf32> -> vector<64x96xf32>
    %c1_111 = arith.constant 1 : index
    %c0_112 = arith.constant 0 : index
    %c0_113 = arith.constant 0 : index
    %314 = vector.load %arg9[%c1_111, %c0_112, %c0_113] : memref<2x1x96xf32, #tpu.memory_space<vmem>>, vector<1x1x96xf32>
    %315 = vector.shape_cast %314 : vector<1x1x96xf32> to vector<1x96xf32>
    %316 = vector.broadcast %315 : vector<1x96xf32> to vector<64x96xf32>
    %317 = arith.addf %313, %316 : vector<64x96xf32>
    %318 = vector.extract_strided_slice %317 {offsets = [0, 0], sizes = [64, 8], strides = [1, 1]} : vector<64x96xf32> to vector<64x8xf32>
    %319 = arith.truncf %318 : vector<64x8xf32> to vector<64x8xbf16>
    %320 = vector.extract_strided_slice %317 {offsets = [0, 32], sizes = [64, 8], strides = [1, 1]} : vector<64x96xf32> to vector<64x8xf32>
    %321 = arith.truncf %320 : vector<64x8xf32> to vector<64x8xbf16>
    %322 = vector.extract_strided_slice %317 {offsets = [0, 64], sizes = [64, 8], strides = [1, 1]} : vector<64x96xf32> to vector<64x8xf32>
    %323 = arith.truncf %322 : vector<64x8xf32> to vector<64x8xbf16>
    %324 = vector.extract_strided_slice %319 {offsets = [0, 0], sizes = [32, 8], strides = [1, 1]} : vector<64x8xbf16> to vector<32x8xbf16>
    %325 = vector.extract_strided_slice %321 {offsets = [0, 0], sizes = [32, 8], strides = [1, 1]} : vector<64x8xbf16> to vector<32x8xbf16>
    %326 = vector.extract_strided_slice %323 {offsets = [0, 0], sizes = [32, 8], strides = [1, 1]} : vector<64x8xbf16> to vector<32x8xbf16>
    "tpu.trace_start"() <{level = 10 : i32, message = "qd,kd->qk"}> : () -> ()
    %cst_114 = arith.constant dense<0.000000e+00> : vector<32x32xf32>
    %327 = tpu.matmul %324, %325, %cst_114 {dimension_numbers = #tpu.dot_dimension_numbers<[1], [1], [0], [0], [0, 0, 1, 0], [], []>} : vector<32x8xbf16>, vector<32x8xbf16>, vector<32x32xf32> -> vector<32x32xf32>
    "tpu.trace_stop"() : () -> ()
    %328 = vector.broadcast %33 : vector<1x32xf32> to vector<32x32xf32>
    %329 = arith.addf %327, %328 : vector<32x32xf32>
    %cst_115 = arith.constant dense<0xFF800000> : vector<32xf32>
    %330 = vector.multi_reduction <maximumf>, %329, %cst_115 [1] : vector<32x32xf32> to vector<32xf32>
    %331 = vector.shape_cast %330 : vector<32xf32> to vector<32x1xf32>
    %332 = vector.broadcast %331 : vector<32x1xf32> to vector<32x32xf32>
    %333 = arith.subf %329, %332 : vector<32x32xf32>
    %334 = math.exp %333 : vector<32x32xf32>
    %cst_116 = arith.constant dense<0.000000e+00> : vector<32xf32>
    %335 = vector.multi_reduction <add>, %334, %cst_116 [1] : vector<32x32xf32> to vector<32xf32>
    %336 = vector.shape_cast %335 : vector<32xf32> to vector<32x1xf32>
    %337 = tpu.reciprocal %336 {approx = true} : vector<32x1xf32> -> vector<32x1xf32>
    %338 = vector.broadcast %337 : vector<32x1xf32> to vector<32x32xf32>
    %339 = arith.mulf %334, %338 : vector<32x32xf32>
    %340 = arith.truncf %339 : vector<32x32xf32> to vector<32x32xbf16>
    %cst_117 = arith.constant dense<0.000000e+00> : vector<32x8xf32>
    %341 = tpu.matmul %340, %326, %cst_117 {dimension_numbers = #tpu.dot_dimension_numbers<[1], [0], [0], [1], [0, 0, 1, 1], [], []>} : vector<32x32xbf16>, vector<32x8xbf16>, vector<32x8xf32> -> vector<32x8xf32>
    %342 = vector.extract_strided_slice %319 {offsets = [32, 0], sizes = [32, 8], strides = [1, 1]} : vector<64x8xbf16> to vector<32x8xbf16>
    %343 = vector.extract_strided_slice %321 {offsets = [32, 0], sizes = [32, 8], strides = [1, 1]} : vector<64x8xbf16> to vector<32x8xbf16>
    %344 = vector.extract_strided_slice %323 {offsets = [32, 0], sizes = [32, 8], strides = [1, 1]} : vector<64x8xbf16> to vector<32x8xbf16>
    "tpu.trace_start"() <{level = 10 : i32, message = "qd,kd->qk"}> : () -> ()
    %cst_118 = arith.constant dense<0.000000e+00> : vector<32x32xf32>
    %345 = tpu.matmul %342, %343, %cst_118 {dimension_numbers = #tpu.dot_dimension_numbers<[1], [1], [0], [0], [0, 0, 1, 0], [], []>} : vector<32x8xbf16>, vector<32x8xbf16>, vector<32x32xf32> -> vector<32x32xf32>
    "tpu.trace_stop"() : () -> ()
    %346 = vector.broadcast %39 : vector<1x32xf32> to vector<32x32xf32>
    %347 = arith.addf %345, %346 : vector<32x32xf32>
    %cst_119 = arith.constant dense<0xFF800000> : vector<32xf32>
    %348 = vector.multi_reduction <maximumf>, %347, %cst_119 [1] : vector<32x32xf32> to vector<32xf32>
    %349 = vector.shape_cast %348 : vector<32xf32> to vector<32x1xf32>
    %350 = vector.broadcast %349 : vector<32x1xf32> to vector<32x32xf32>
    %351 = arith.subf %347, %350 : vector<32x32xf32>
    %352 = math.exp %351 : vector<32x32xf32>
    %cst_120 = arith.constant dense<0.000000e+00> : vector<32xf32>
    %353 = vector.multi_reduction <add>, %352, %cst_120 [1] : vector<32x32xf32> to vector<32xf32>
    %354 = vector.shape_cast %353 : vector<32xf32> to vector<32x1xf32>
    %355 = tpu.reciprocal %354 {approx = true} : vector<32x1xf32> -> vector<32x1xf32>
    %356 = vector.broadcast %355 : vector<32x1xf32> to vector<32x32xf32>
    %357 = arith.mulf %352, %356 : vector<32x32xf32>
    %358 = arith.truncf %357 : vector<32x32xf32> to vector<32x32xbf16>
    %cst_121 = arith.constant dense<0.000000e+00> : vector<32x8xf32>
    %359 = tpu.matmul %358, %344, %cst_121 {dimension_numbers = #tpu.dot_dimension_numbers<[1], [0], [0], [1], [0, 0, 1, 1], [], []>} : vector<32x32xbf16>, vector<32x8xbf16>, vector<32x8xf32> -> vector<32x8xf32>
    %360 = vector.extract_strided_slice %317 {offsets = [0, 8], sizes = [64, 8], strides = [1, 1]} : vector<64x96xf32> to vector<64x8xf32>
    %361 = arith.truncf %360 : vector<64x8xf32> to vector<64x8xbf16>
    %362 = vector.extract_strided_slice %317 {offsets = [0, 40], sizes = [64, 8], strides = [1, 1]} : vector<64x96xf32> to vector<64x8xf32>
    %363 = arith.truncf %362 : vector<64x8xf32> to vector<64x8xbf16>
    %364 = vector.extract_strided_slice %317 {offsets = [0, 72], sizes = [64, 8], strides = [1, 1]} : vector<64x96xf32> to vector<64x8xf32>
    %365 = arith.truncf %364 : vector<64x8xf32> to vector<64x8xbf16>
    %366 = vector.extract_strided_slice %361 {offsets = [0, 0], sizes = [32, 8], strides = [1, 1]} : vector<64x8xbf16> to vector<32x8xbf16>
    %367 = vector.extract_strided_slice %363 {offsets = [0, 0], sizes = [32, 8], strides = [1, 1]} : vector<64x8xbf16> to vector<32x8xbf16>
    %368 = vector.extract_strided_slice %365 {offsets = [0, 0], sizes = [32, 8], strides = [1, 1]} : vector<64x8xbf16> to vector<32x8xbf16>
    "tpu.trace_start"() <{level = 10 : i32, message = "qd,kd->qk"}> : () -> ()
    %cst_122 = arith.constant dense<0.000000e+00> : vector<32x32xf32>
    %369 = tpu.matmul %366, %367, %cst_122 {dimension_numbers = #tpu.dot_dimension_numbers<[1], [1], [0], [0], [0, 0, 1, 0], [], []>} : vector<32x8xbf16>, vector<32x8xbf16>, vector<32x32xf32> -> vector<32x32xf32>
    "tpu.trace_stop"() : () -> ()
    %370 = vector.broadcast %33 : vector<1x32xf32> to vector<32x32xf32>
    %371 = arith.addf %369, %370 : vector<32x32xf32>
    %cst_123 = arith.constant dense<0xFF800000> : vector<32xf32>
    %372 = vector.multi_reduction <maximumf>, %371, %cst_123 [1] : vector<32x32xf32> to vector<32xf32>
    %373 = vector.shape_cast %372 : vector<32xf32> to vector<32x1xf32>
    %374 = vector.broadcast %373 : vector<32x1xf32> to vector<32x32xf32>
    %375 = arith.subf %371, %374 : vector<32x32xf32>
    %376 = math.exp %375 : vector<32x32xf32>
    %cst_124 = arith.constant dense<0.000000e+00> : vector<32xf32>
    %377 = vector.multi_reduction <add>, %376, %cst_124 [1] : vector<32x32xf32> to vector<32xf32>
    %378 = vector.shape_cast %377 : vector<32xf32> to vector<32x1xf32>
    %379 = tpu.reciprocal %378 {approx = true} : vector<32x1xf32> -> vector<32x1xf32>
    %380 = vector.broadcast %379 : vector<32x1xf32> to vector<32x32xf32>
    %381 = arith.mulf %376, %380 : vector<32x32xf32>
    %382 = arith.truncf %381 : vector<32x32xf32> to vector<32x32xbf16>
    %cst_125 = arith.constant dense<0.000000e+00> : vector<32x8xf32>
    %383 = tpu.matmul %382, %368, %cst_125 {dimension_numbers = #tpu.dot_dimension_numbers<[1], [0], [0], [1], [0, 0, 1, 1], [], []>} : vector<32x32xbf16>, vector<32x8xbf16>, vector<32x8xf32> -> vector<32x8xf32>
    %384 = vector.extract_strided_slice %361 {offsets = [32, 0], sizes = [32, 8], strides = [1, 1]} : vector<64x8xbf16> to vector<32x8xbf16>
    %385 = vector.extract_strided_slice %363 {offsets = [32, 0], sizes = [32, 8], strides = [1, 1]} : vector<64x8xbf16> to vector<32x8xbf16>
    %386 = vector.extract_strided_slice %365 {offsets = [32, 0], sizes = [32, 8], strides = [1, 1]} : vector<64x8xbf16> to vector<32x8xbf16>
    "tpu.trace_start"() <{level = 10 : i32, message = "qd,kd->qk"}> : () -> ()
    %cst_126 = arith.constant dense<0.000000e+00> : vector<32x32xf32>
    %387 = tpu.matmul %384, %385, %cst_126 {dimension_numbers = #tpu.dot_dimension_numbers<[1], [1], [0], [0], [0, 0, 1, 0], [], []>} : vector<32x8xbf16>, vector<32x8xbf16>, vector<32x32xf32> -> vector<32x32xf32>
    "tpu.trace_stop"() : () -> ()
    %388 = vector.broadcast %39 : vector<1x32xf32> to vector<32x32xf32>
    %389 = arith.addf %387, %388 : vector<32x32xf32>
    %cst_127 = arith.constant dense<0xFF800000> : vector<32xf32>
    %390 = vector.multi_reduction <maximumf>, %389, %cst_127 [1] : vector<32x32xf32> to vector<32xf32>
    %391 = vector.shape_cast %390 : vector<32xf32> to vector<32x1xf32>
    %392 = vector.broadcast %391 : vector<32x1xf32> to vector<32x32xf32>
    %393 = arith.subf %389, %392 : vector<32x32xf32>
    %394 = math.exp %393 : vector<32x32xf32>
    %cst_128 = arith.constant dense<0.000000e+00> : vector<32xf32>
    %395 = vector.multi_reduction <add>, %394, %cst_128 [1] : vector<32x32xf32> to vector<32xf32>
    %396 = vector.shape_cast %395 : vector<32xf32> to vector<32x1xf32>
    %397 = tpu.reciprocal %396 {approx = true} : vector<32x1xf32> -> vector<32x1xf32>
    %398 = vector.broadcast %397 : vector<32x1xf32> to vector<32x32xf32>
    %399 = arith.mulf %394, %398 : vector<32x32xf32>
    %400 = arith.truncf %399 : vector<32x32xf32> to vector<32x32xbf16>
    %cst_129 = arith.constant dense<0.000000e+00> : vector<32x8xf32>
    %401 = tpu.matmul %400, %386, %cst_129 {dimension_numbers = #tpu.dot_dimension_numbers<[1], [0], [0], [1], [0, 0, 1, 1], [], []>} : vector<32x32xbf16>, vector<32x8xbf16>, vector<32x8xf32> -> vector<32x8xf32>
    %402 = vector.extract_strided_slice %317 {offsets = [0, 16], sizes = [64, 8], strides = [1, 1]} : vector<64x96xf32> to vector<64x8xf32>
    %403 = arith.truncf %402 : vector<64x8xf32> to vector<64x8xbf16>
    %404 = vector.extract_strided_slice %317 {offsets = [0, 48], sizes = [64, 8], strides = [1, 1]} : vector<64x96xf32> to vector<64x8xf32>
    %405 = arith.truncf %404 : vector<64x8xf32> to vector<64x8xbf16>
    %406 = vector.extract_strided_slice %317 {offsets = [0, 80], sizes = [64, 8], strides = [1, 1]} : vector<64x96xf32> to vector<64x8xf32>
    %407 = arith.truncf %406 : vector<64x8xf32> to vector<64x8xbf16>
    %408 = vector.extract_strided_slice %403 {offsets = [0, 0], sizes = [32, 8], strides = [1, 1]} : vector<64x8xbf16> to vector<32x8xbf16>
    %409 = vector.extract_strided_slice %405 {offsets = [0, 0], sizes = [32, 8], strides = [1, 1]} : vector<64x8xbf16> to vector<32x8xbf16>
    %410 = vector.extract_strided_slice %407 {offsets = [0, 0], sizes = [32, 8], strides = [1, 1]} : vector<64x8xbf16> to vector<32x8xbf16>
    "tpu.trace_start"() <{level = 10 : i32, message = "qd,kd->qk"}> : () -> ()
    %cst_130 = arith.constant dense<0.000000e+00> : vector<32x32xf32>
    %411 = tpu.matmul %408, %409, %cst_130 {dimension_numbers = #tpu.dot_dimension_numbers<[1], [1], [0], [0], [0, 0, 1, 0], [], []>} : vector<32x8xbf16>, vector<32x8xbf16>, vector<32x32xf32> -> vector<32x32xf32>
    "tpu.trace_stop"() : () -> ()
    %412 = vector.broadcast %33 : vector<1x32xf32> to vector<32x32xf32>
    %413 = arith.addf %411, %412 : vector<32x32xf32>
    %cst_131 = arith.constant dense<0xFF800000> : vector<32xf32>
    %414 = vector.multi_reduction <maximumf>, %413, %cst_131 [1] : vector<32x32xf32> to vector<32xf32>
    %415 = vector.shape_cast %414 : vector<32xf32> to vector<32x1xf32>
    %416 = vector.broadcast %415 : vector<32x1xf32> to vector<32x32xf32>
    %417 = arith.subf %413, %416 : vector<32x32xf32>
    %418 = math.exp %417 : vector<32x32xf32>
    %cst_132 = arith.constant dense<0.000000e+00> : vector<32xf32>
    %419 = vector.multi_reduction <add>, %418, %cst_132 [1] : vector<32x32xf32> to vector<32xf32>
    %420 = vector.shape_cast %419 : vector<32xf32> to vector<32x1xf32>
    %421 = tpu.reciprocal %420 {approx = true} : vector<32x1xf32> -> vector<32x1xf32>
    %422 = vector.broadcast %421 : vector<32x1xf32> to vector<32x32xf32>
    %423 = arith.mulf %418, %422 : vector<32x32xf32>
    %424 = arith.truncf %423 : vector<32x32xf32> to vector<32x32xbf16>
    %cst_133 = arith.constant dense<0.000000e+00> : vector<32x8xf32>
    %425 = tpu.matmul %424, %410, %cst_133 {dimension_numbers = #tpu.dot_dimension_numbers<[1], [0], [0], [1], [0, 0, 1, 1], [], []>} : vector<32x32xbf16>, vector<32x8xbf16>, vector<32x8xf32> -> vector<32x8xf32>
    %426 = vector.extract_strided_slice %403 {offsets = [32, 0], sizes = [32, 8], strides = [1, 1]} : vector<64x8xbf16> to vector<32x8xbf16>
    %427 = vector.extract_strided_slice %405 {offsets = [32, 0], sizes = [32, 8], strides = [1, 1]} : vector<64x8xbf16> to vector<32x8xbf16>
    %428 = vector.extract_strided_slice %407 {offsets = [32, 0], sizes = [32, 8], strides = [1, 1]} : vector<64x8xbf16> to vector<32x8xbf16>
    "tpu.trace_start"() <{level = 10 : i32, message = "qd,kd->qk"}> : () -> ()
    %cst_134 = arith.constant dense<0.000000e+00> : vector<32x32xf32>
    %429 = tpu.matmul %426, %427, %cst_134 {dimension_numbers = #tpu.dot_dimension_numbers<[1], [1], [0], [0], [0, 0, 1, 0], [], []>} : vector<32x8xbf16>, vector<32x8xbf16>, vector<32x32xf32> -> vector<32x32xf32>
    "tpu.trace_stop"() : () -> ()
    %430 = vector.broadcast %39 : vector<1x32xf32> to vector<32x32xf32>
    %431 = arith.addf %429, %430 : vector<32x32xf32>
    %cst_135 = arith.constant dense<0xFF800000> : vector<32xf32>
    %432 = vector.multi_reduction <maximumf>, %431, %cst_135 [1] : vector<32x32xf32> to vector<32xf32>
    %433 = vector.shape_cast %432 : vector<32xf32> to vector<32x1xf32>
    %434 = vector.broadcast %433 : vector<32x1xf32> to vector<32x32xf32>
    %435 = arith.subf %431, %434 : vector<32x32xf32>
    %436 = math.exp %435 : vector<32x32xf32>
    %cst_136 = arith.constant dense<0.000000e+00> : vector<32xf32>
    %437 = vector.multi_reduction <add>, %436, %cst_136 [1] : vector<32x32xf32> to vector<32xf32>
    %438 = vector.shape_cast %437 : vector<32xf32> to vector<32x1xf32>
    %439 = tpu.reciprocal %438 {approx = true} : vector<32x1xf32> -> vector<32x1xf32>
    %440 = vector.broadcast %439 : vector<32x1xf32> to vector<32x32xf32>
    %441 = arith.mulf %436, %440 : vector<32x32xf32>
    %442 = arith.truncf %441 : vector<32x32xf32> to vector<32x32xbf16>
    %cst_137 = arith.constant dense<0.000000e+00> : vector<32x8xf32>
    %443 = tpu.matmul %442, %428, %cst_137 {dimension_numbers = #tpu.dot_dimension_numbers<[1], [0], [0], [1], [0, 0, 1, 1], [], []>} : vector<32x32xbf16>, vector<32x8xbf16>, vector<32x8xf32> -> vector<32x8xf32>
    %444 = vector.extract_strided_slice %317 {offsets = [0, 24], sizes = [64, 8], strides = [1, 1]} : vector<64x96xf32> to vector<64x8xf32>
    %445 = arith.truncf %444 : vector<64x8xf32> to vector<64x8xbf16>
    %446 = vector.extract_strided_slice %317 {offsets = [0, 56], sizes = [64, 8], strides = [1, 1]} : vector<64x96xf32> to vector<64x8xf32>
    %447 = arith.truncf %446 : vector<64x8xf32> to vector<64x8xbf16>
    %448 = vector.extract_strided_slice %317 {offsets = [0, 88], sizes = [64, 8], strides = [1, 1]} : vector<64x96xf32> to vector<64x8xf32>
    %449 = arith.truncf %448 : vector<64x8xf32> to vector<64x8xbf16>
    %450 = vector.extract_strided_slice %445 {offsets = [0, 0], sizes = [32, 8], strides = [1, 1]} : vector<64x8xbf16> to vector<32x8xbf16>
    %451 = vector.extract_strided_slice %447 {offsets = [0, 0], sizes = [32, 8], strides = [1, 1]} : vector<64x8xbf16> to vector<32x8xbf16>
    %452 = vector.extract_strided_slice %449 {offsets = [0, 0], sizes = [32, 8], strides = [1, 1]} : vector<64x8xbf16> to vector<32x8xbf16>
    "tpu.trace_start"() <{level = 10 : i32, message = "qd,kd->qk"}> : () -> ()
    %cst_138 = arith.constant dense<0.000000e+00> : vector<32x32xf32>
    %453 = tpu.matmul %450, %451, %cst_138 {dimension_numbers = #tpu.dot_dimension_numbers<[1], [1], [0], [0], [0, 0, 1, 0], [], []>} : vector<32x8xbf16>, vector<32x8xbf16>, vector<32x32xf32> -> vector<32x32xf32>
    "tpu.trace_stop"() : () -> ()
    %454 = vector.broadcast %33 : vector<1x32xf32> to vector<32x32xf32>
    %455 = arith.addf %453, %454 : vector<32x32xf32>
    %cst_139 = arith.constant dense<0xFF800000> : vector<32xf32>
    %456 = vector.multi_reduction <maximumf>, %455, %cst_139 [1] : vector<32x32xf32> to vector<32xf32>
    %457 = vector.shape_cast %456 : vector<32xf32> to vector<32x1xf32>
    %458 = vector.broadcast %457 : vector<32x1xf32> to vector<32x32xf32>
    %459 = arith.subf %455, %458 : vector<32x32xf32>
    %460 = math.exp %459 : vector<32x32xf32>
    %cst_140 = arith.constant dense<0.000000e+00> : vector<32xf32>
    %461 = vector.multi_reduction <add>, %460, %cst_140 [1] : vector<32x32xf32> to vector<32xf32>
    %462 = vector.shape_cast %461 : vector<32xf32> to vector<32x1xf32>
    %463 = tpu.reciprocal %462 {approx = true} : vector<32x1xf32> -> vector<32x1xf32>
    %464 = vector.broadcast %463 : vector<32x1xf32> to vector<32x32xf32>
    %465 = arith.mulf %460, %464 : vector<32x32xf32>
    %466 = arith.truncf %465 : vector<32x32xf32> to vector<32x32xbf16>
    %cst_141 = arith.constant dense<0.000000e+00> : vector<32x8xf32>
    %467 = tpu.matmul %466, %452, %cst_141 {dimension_numbers = #tpu.dot_dimension_numbers<[1], [0], [0], [1], [0, 0, 1, 1], [], []>} : vector<32x32xbf16>, vector<32x8xbf16>, vector<32x8xf32> -> vector<32x8xf32>
    %468 = vector.extract_strided_slice %445 {offsets = [32, 0], sizes = [32, 8], strides = [1, 1]} : vector<64x8xbf16> to vector<32x8xbf16>
    %469 = vector.extract_strided_slice %447 {offsets = [32, 0], sizes = [32, 8], strides = [1, 1]} : vector<64x8xbf16> to vector<32x8xbf16>
    %470 = vector.extract_strided_slice %449 {offsets = [32, 0], sizes = [32, 8], strides = [1, 1]} : vector<64x8xbf16> to vector<32x8xbf16>
    "tpu.trace_start"() <{level = 10 : i32, message = "qd,kd->qk"}> : () -> ()
    %cst_142 = arith.constant dense<0.000000e+00> : vector<32x32xf32>
    %471 = tpu.matmul %468, %469, %cst_142 {dimension_numbers = #tpu.dot_dimension_numbers<[1], [1], [0], [0], [0, 0, 1, 0], [], []>} : vector<32x8xbf16>, vector<32x8xbf16>, vector<32x32xf32> -> vector<32x32xf32>
    "tpu.trace_stop"() : () -> ()
    %472 = vector.broadcast %39 : vector<1x32xf32> to vector<32x32xf32>
    %473 = arith.addf %471, %472 : vector<32x32xf32>
    %cst_143 = arith.constant dense<0xFF800000> : vector<32xf32>
    %474 = vector.multi_reduction <maximumf>, %473, %cst_143 [1] : vector<32x32xf32> to vector<32xf32>
    %475 = vector.shape_cast %474 : vector<32xf32> to vector<32x1xf32>
    %476 = vector.broadcast %475 : vector<32x1xf32> to vector<32x32xf32>
    %477 = arith.subf %473, %476 : vector<32x32xf32>
    %478 = math.exp %477 : vector<32x32xf32>
    %cst_144 = arith.constant dense<0.000000e+00> : vector<32xf32>
    %479 = vector.multi_reduction <add>, %478, %cst_144 [1] : vector<32x32xf32> to vector<32xf32>
    %480 = vector.shape_cast %479 : vector<32xf32> to vector<32x1xf32>
    %481 = tpu.reciprocal %480 {approx = true} : vector<32x1xf32> -> vector<32x1xf32>
    %482 = vector.broadcast %481 : vector<32x1xf32> to vector<32x32xf32>
    %483 = arith.mulf %478, %482 : vector<32x32xf32>
    %484 = arith.truncf %483 : vector<32x32xf32> to vector<32x32xbf16>
    %cst_145 = arith.constant dense<0.000000e+00> : vector<32x8xf32>
    %485 = tpu.matmul %484, %470, %cst_145 {dimension_numbers = #tpu.dot_dimension_numbers<[1], [0], [0], [1], [0, 0, 1, 1], [], []>} : vector<32x32xbf16>, vector<32x8xbf16>, vector<32x8xf32> -> vector<32x8xf32>
    %486 = tpu.concatenate %341, %383, %425, %467 in 1 : vector<32x8xf32>, vector<32x8xf32>, vector<32x8xf32>, vector<32x8xf32> -> vector<32x32xf32>
    %487 = tpu.concatenate %359, %401, %443, %485 in 1 : vector<32x8xf32>, vector<32x8xf32>, vector<32x8xf32>, vector<32x8xf32> -> vector<32x32xf32>
    %488 = tpu.concatenate %486, %487 in 0 : vector<32x32xf32>, vector<32x32xf32> -> vector<64x32xf32>
    %489 = arith.truncf %488 : vector<64x32xf32> to vector<64x32xbf16>
    %c1_146 = arith.constant 1 : index
    %c0_147 = arith.constant 0 : index
    %c0_148 = arith.constant 0 : index
    %490 = vector.load %arg10[%c1_146, %c0_147, %c0_148] : memref<2x32x32xbf16, #tpu.memory_space<vmem>>, vector<1x32x32xbf16>
    %491 = vector.shape_cast %490 : vector<1x32x32xbf16> to vector<32x32xbf16>
    %cst_149 = arith.constant dense<0.000000e+00> : vector<64x32xf32>
    %492 = tpu.matmul %489, %491, %cst_149 {dimension_numbers = #tpu.dot_dimension_numbers<[1], [0], [0], [1], [0, 0, 1, 1], [], []>} : vector<64x32xbf16>, vector<32x32xbf16>, vector<64x32xf32> -> vector<64x32xf32>
    %c1_150 = arith.constant 1 : index
    %c0_151 = arith.constant 0 : index
    %c0_152 = arith.constant 0 : index
    %493 = vector.load %arg11[%c1_150, %c0_151, %c0_152] : memref<2x1x32xf32, #tpu.memory_space<vmem>>, vector<1x1x32xf32>
    %494 = vector.shape_cast %493 : vector<1x1x32xf32> to vector<1x32xf32>
    %495 = vector.broadcast %494 : vector<1x32xf32> to vector<64x32xf32>
    %496 = arith.addf %492, %495 : vector<64x32xf32>
    %497 = arith.addf %309, %496 : vector<64x32xf32>
    %c1_153 = arith.constant 1 : index
    %c0_154 = arith.constant 0 : index
    %c0_155 = arith.constant 0 : index
    %498 = vector.load %arg12[%c1_153, %c0_154, %c0_155] : memref<2x1x32xf32, #tpu.memory_space<vmem>>, vector<1x1x32xf32>
    %499 = vector.shape_cast %498 : vector<1x1x32xf32> to vector<1x32xf32>
    %c1_156 = arith.constant 1 : index
    %c0_157 = arith.constant 0 : index
    %c0_158 = arith.constant 0 : index
    %500 = vector.load %arg13[%c1_156, %c0_157, %c0_158] : memref<2x1x32xf32, #tpu.memory_space<vmem>>, vector<1x1x32xf32>
    %501 = vector.shape_cast %500 : vector<1x1x32xf32> to vector<1x32xf32>
    %cst_159 = arith.constant dense<0.000000e+00> : vector<64xf32>
    %502 = vector.multi_reduction <add>, %497, %cst_159 [1] : vector<64x32xf32> to vector<64xf32>
    %503 = vector.shape_cast %502 : vector<64xf32> to vector<64x1xf32>
    %cst_160 = arith.constant 3.200000e+01 : f32
    %504 = vector.broadcast %cst_160 : f32 to vector<64x1xf32>
    %505 = arith.divf %503, %504 : vector<64x1xf32>
    %506 = vector.broadcast %505 : vector<64x1xf32> to vector<64x32xf32>
    %507 = arith.subf %497, %506 : vector<64x32xf32>
    %508 = arith.mulf %507, %507 : vector<64x32xf32>
    %cst_161 = arith.constant dense<0.000000e+00> : vector<64xf32>
    %509 = vector.multi_reduction <add>, %508, %cst_161 [1] : vector<64x32xf32> to vector<64xf32>
    %510 = vector.shape_cast %509 : vector<64xf32> to vector<64x1xf32>
    %cst_162 = arith.constant 3.200000e+01 : f32
    %511 = vector.broadcast %cst_162 : f32 to vector<64x1xf32>
    %512 = arith.divf %510, %511 : vector<64x1xf32>
    %513 = vector.broadcast %505 : vector<64x1xf32> to vector<64x32xf32>
    %514 = arith.subf %497, %513 : vector<64x32xf32>
    %cst_163 = arith.constant 9.99999996E-13 : f32
    %515 = vector.broadcast %cst_163 : f32 to vector<64x1xf32>
    %516 = arith.addf %512, %515 : vector<64x1xf32>
    %517 = math.rsqrt %516 : vector<64x1xf32>
    %518 = vector.broadcast %517 : vector<64x1xf32> to vector<64x32xf32>
    %519 = arith.mulf %514, %518 : vector<64x32xf32>
    %520 = vector.broadcast %499 : vector<1x32xf32> to vector<64x32xf32>
    %521 = arith.mulf %519, %520 : vector<64x32xf32>
    %522 = vector.broadcast %501 : vector<1x32xf32> to vector<64x32xf32>
    %523 = arith.addf %521, %522 : vector<64x32xf32>
    %524 = arith.truncf %523 : vector<64x32xf32> to vector<64x32xbf16>
    %c1_164 = arith.constant 1 : index
    %c0_165 = arith.constant 0 : index
    %c0_166 = arith.constant 0 : index
    %525 = vector.load %arg14[%c1_164, %c0_165, %c0_166] : memref<2x32x64xbf16, #tpu.memory_space<vmem>>, vector<1x32x64xbf16>
    %526 = vector.shape_cast %525 : vector<1x32x64xbf16> to vector<32x64xbf16>
    %cst_167 = arith.constant dense<0.000000e+00> : vector<64x64xf32>
    %527 = tpu.matmul %524, %526, %cst_167 {dimension_numbers = #tpu.dot_dimension_numbers<[1], [0], [0], [1], [0, 0, 1, 1], [], []>} : vector<64x32xbf16>, vector<32x64xbf16>, vector<64x64xf32> -> vector<64x64xf32>
    %c1_168 = arith.constant 1 : index
    %c0_169 = arith.constant 0 : index
    %c0_170 = arith.constant 0 : index
    %528 = vector.load %arg15[%c1_168, %c0_169, %c0_170] : memref<2x1x64xf32, #tpu.memory_space<vmem>>, vector<1x1x64xf32>
    %529 = vector.shape_cast %528 : vector<1x1x64xf32> to vector<1x64xf32>
    %530 = vector.broadcast %529 : vector<1x64xf32> to vector<64x64xf32>
    %531 = arith.addf %527, %530 : vector<64x64xf32>
    %cst_171 = arith.constant 5.000000e-01 : f32
    %532 = vector.broadcast %cst_171 : f32 to vector<64x64xf32>
    %533 = arith.mulf %532, %531 : vector<64x64xf32>
    %cst_172 = arith.constant 4.471500e-02 : f32
    %534 = vector.broadcast %cst_172 : f32 to vector<64x64xf32>
    %535 = arith.mulf %534, %531 : vector<64x64xf32>
    %536 = arith.mulf %535, %531 : vector<64x64xf32>
    %537 = arith.mulf %536, %531 : vector<64x64xf32>
    %538 = arith.addf %531, %537 : vector<64x64xf32>
    %cst_173 = arith.constant 0.797884583 : f32
    %539 = vector.broadcast %cst_173 : f32 to vector<64x64xf32>
    %540 = arith.mulf %539, %538 : vector<64x64xf32>
    %541 = math.tanh %540 : vector<64x64xf32>
    %cst_174 = arith.constant 1.000000e+00 : f32
    %542 = vector.broadcast %cst_174 : f32 to vector<64x64xf32>
    %543 = arith.addf %542, %541 : vector<64x64xf32>
    %544 = arith.mulf %533, %543 : vector<64x64xf32>
    %545 = arith.truncf %544 : vector<64x64xf32> to vector<64x64xbf16>
    %c1_175 = arith.constant 1 : index
    %c0_176 = arith.constant 0 : index
    %c0_177 = arith.constant 0 : index
    %546 = vector.load %arg16[%c1_175, %c0_176, %c0_177] : memref<2x64x32xbf16, #tpu.memory_space<vmem>>, vector<1x64x32xbf16>
    %547 = vector.shape_cast %546 : vector<1x64x32xbf16> to vector<64x32xbf16>
    %cst_178 = arith.constant dense<0.000000e+00> : vector<64x32xf32>
    %548 = tpu.matmul %545, %547, %cst_178 {dimension_numbers = #tpu.dot_dimension_numbers<[1], [0], [0], [1], [0, 0, 1, 1], [], []>} : vector<64x64xbf16>, vector<64x32xbf16>, vector<64x32xf32> -> vector<64x32xf32>
    %c1_179 = arith.constant 1 : index
    %c0_180 = arith.constant 0 : index
    %c0_181 = arith.constant 0 : index
    %549 = vector.load %arg17[%c1_179, %c0_180, %c0_181] : memref<2x1x32xf32, #tpu.memory_space<vmem>>, vector<1x1x32xf32>
    %550 = vector.shape_cast %549 : vector<1x1x32xf32> to vector<1x32xf32>
    %551 = vector.broadcast %550 : vector<1x32xf32> to vector<64x32xf32>
    %552 = arith.addf %548, %551 : vector<64x32xf32>
    %553 = arith.addf %523, %552 : vector<64x32xf32>
    %c1_182 = arith.constant 1 : index
    %c0_183 = arith.constant 0 : index
    %c0_184 = arith.constant 0 : index
    %554 = vector.load %arg18[%c1_182, %c0_183, %c0_184] : memref<2x1x32xf32, #tpu.memory_space<vmem>>, vector<1x1x32xf32>
    %555 = vector.shape_cast %554 : vector<1x1x32xf32> to vector<1x32xf32>
    %c1_185 = arith.constant 1 : index
    %c0_186 = arith.constant 0 : index
    %c0_187 = arith.constant 0 : index
    %556 = vector.load %arg19[%c1_185, %c0_186, %c0_187] : memref<2x1x32xf32, #tpu.memory_space<vmem>>, vector<1x1x32xf32>
    %557 = vector.shape_cast %556 : vector<1x1x32xf32> to vector<1x32xf32>
    %cst_188 = arith.constant dense<0.000000e+00> : vector<64xf32>
    %558 = vector.multi_reduction <add>, %553, %cst_188 [1] : vector<64x32xf32> to vector<64xf32>
    %559 = vector.shape_cast %558 : vector<64xf32> to vector<64x1xf32>
    %cst_189 = arith.constant 3.200000e+01 : f32
    %560 = vector.broadcast %cst_189 : f32 to vector<64x1xf32>
    %561 = arith.divf %559, %560 : vector<64x1xf32>
    %562 = vector.broadcast %561 : vector<64x1xf32> to vector<64x32xf32>
    %563 = arith.subf %553, %562 : vector<64x32xf32>
    %564 = arith.mulf %563, %563 : vector<64x32xf32>
    %cst_190 = arith.constant dense<0.000000e+00> : vector<64xf32>
    %565 = vector.multi_reduction <add>, %564, %cst_190 [1] : vector<64x32xf32> to vector<64xf32>
    %566 = vector.shape_cast %565 : vector<64xf32> to vector<64x1xf32>
    %cst_191 = arith.constant 3.200000e+01 : f32
    %567 = vector.broadcast %cst_191 : f32 to vector<64x1xf32>
    %568 = arith.divf %566, %567 : vector<64x1xf32>
    %569 = vector.broadcast %561 : vector<64x1xf32> to vector<64x32xf32>
    %570 = arith.subf %553, %569 : vector<64x32xf32>
    %cst_192 = arith.constant 9.99999996E-13 : f32
    %571 = vector.broadcast %cst_192 : f32 to vector<64x1xf32>
    %572 = arith.addf %568, %571 : vector<64x1xf32>
    %573 = math.rsqrt %572 : vector<64x1xf32>
    %574 = vector.broadcast %573 : vector<64x1xf32> to vector<64x32xf32>
    %575 = arith.mulf %570, %574 : vector<64x32xf32>
    %576 = vector.broadcast %555 : vector<1x32xf32> to vector<64x32xf32>
    %577 = arith.mulf %575, %576 : vector<64x32xf32>
    %578 = vector.broadcast %557 : vector<1x32xf32> to vector<64x32xf32>
    %579 = arith.addf %577, %578 : vector<64x32xf32>
    %c0_193 = arith.constant 0 : index
    %c0_194 = arith.constant 0 : index
    %580 = vector.load %arg27[%c0_193, %c0_194] : memref<64x32xf32, #tpu.memory_space<vmem>>, vector<64x32xf32>
    tpu.vector_store %arg27[%c0_193, %c0_194], %579 {strides = array<i32>} : memref<64x32xf32, #tpu.memory_space<vmem>>, vector<64x32xf32>,
    %c0_195 = arith.constant 0 : index
    %581 = memref.load %arg2[%c0_195] : memref<2xi32, #tpu.memory_space<smem>>
    %c0_i32_196 = arith.constant 0 : i32
    %582 = arith.addi %c0_i32_196, %581 : i32
    %583 = arith.index_cast %582 : i32 to index
    %c0_197 = arith.constant 0 : index
    %584 = vector.load %arg27[%583, %c0_197] : memref<64x32xf32, #tpu.memory_space<vmem>>, vector<1x32xf32>
    %c1_198 = arith.constant 1 : index
    %585 = memref.load %arg2[%c1_198] : memref<2xi32, #tpu.memory_space<smem>>
    %c32_i32 = arith.constant 32 : i32
    %586 = arith.addi %c32_i32, %585 : i32
    %587 = arith.index_cast %586 : i32 to index
    %c0_199 = arith.constant 0 : index
    %588 = vector.load %arg27[%587, %c0_199] : memref<64x32xf32, #tpu.memory_space<vmem>>, vector<1x32xf32>
    %cst_200 = arith.constant 0.000000e+00 : f32
    %589 = vector.broadcast %cst_200 : f32 to vector<6x32xf32>
    %590 = tpu.concatenate %584, %588, %589 in 0 : vector<1x32xf32>, vector<1x32xf32>, vector<6x32xf32> -> vector<8x32xf32>
    %591 = arith.truncf %590 : vector<8x32xf32> to vector<8x32xbf16>
    %c0_201 = arith.constant 0 : index
    %c0_202 = arith.constant 0 : index
    %592 = vector.load %arg20[%c0_201, %c0_202] : memref<32x32xbf16, #tpu.memory_space<vmem>>, vector<32x32xbf16>
    %cst_203 = arith.constant dense<0.000000e+00> : vector<8x32xf32>
    %593 = tpu.matmul %591, %592, %cst_203 {dimension_numbers = #tpu.dot_dimension_numbers<[1], [0], [0], [1], [0, 0, 1, 1], [], []>} : vector<8x32xbf16>, vector<32x32xbf16>, vector<8x32xf32> -> vector<8x32xf32>
    %c0_204 = arith.constant 0 : index
    %c0_205 = arith.constant 0 : index
    %594 = vector.load %arg21[%c0_204, %c0_205] : memref<1x32xf32, #tpu.memory_space<vmem>>, vector<1x32xf32>
    %595 = vector.broadcast %594 : vector<1x32xf32> to vector<8x32xf32>
    %596 = arith.addf %593, %595 : vector<8x32xf32>
    %cst_206 = arith.constant 5.000000e-01 : f32
    %597 = vector.broadcast %cst_206 : f32 to vector<8x32xf32>
    %598 = arith.mulf %597, %596 : vector<8x32xf32>
    %cst_207 = arith.constant 4.471500e-02 : f32
    %599 = vector.broadcast %cst_207 : f32 to vector<8x32xf32>
    %600 = arith.mulf %599, %596 : vector<8x32xf32>
    %601 = arith.mulf %600, %596 : vector<8x32xf32>
    %602 = arith.mulf %601, %596 : vector<8x32xf32>
    %603 = arith.addf %596, %602 : vector<8x32xf32>
    %cst_208 = arith.constant 0.797884583 : f32
    %604 = vector.broadcast %cst_208 : f32 to vector<8x32xf32>
    %605 = arith.mulf %604, %603 : vector<8x32xf32>
    %606 = math.tanh %605 : vector<8x32xf32>
    %cst_209 = arith.constant 1.000000e+00 : f32
    %607 = vector.broadcast %cst_209 : f32 to vector<8x32xf32>
    %608 = arith.addf %607, %606 : vector<8x32xf32>
    %609 = arith.mulf %598, %608 : vector<8x32xf32>
    %c0_210 = arith.constant 0 : index
    %c0_211 = arith.constant 0 : index
    %610 = vector.load %arg22[%c0_210, %c0_211] : memref<1x32xf32, #tpu.memory_space<vmem>>, vector<1x32xf32>
    %c0_212 = arith.constant 0 : index
    %c0_213 = arith.constant 0 : index
    %611 = vector.load %arg23[%c0_212, %c0_213] : memref<1x32xf32, #tpu.memory_space<vmem>>, vector<1x32xf32>
    %cst_214 = arith.constant dense<0.000000e+00> : vector<8xf32>
    %612 = vector.multi_reduction <add>, %609, %cst_214 [1] : vector<8x32xf32> to vector<8xf32>
    %613 = vector.shape_cast %612 : vector<8xf32> to vector<8x1xf32>
    %cst_215 = arith.constant 3.200000e+01 : f32
    %614 = vector.broadcast %cst_215 : f32 to vector<8x1xf32>
    %615 = arith.divf %613, %614 : vector<8x1xf32>
    %616 = vector.broadcast %615 : vector<8x1xf32> to vector<8x32xf32>
    %617 = arith.subf %609, %616 : vector<8x32xf32>
    %618 = arith.mulf %617, %617 : vector<8x32xf32>
    %cst_216 = arith.constant dense<0.000000e+00> : vector<8xf32>
    %619 = vector.multi_reduction <add>, %618, %cst_216 [1] : vector<8x32xf32> to vector<8xf32>
    %620 = vector.shape_cast %619 : vector<8xf32> to vector<8x1xf32>
    %cst_217 = arith.constant 3.200000e+01 : f32
    %621 = vector.broadcast %cst_217 : f32 to vector<8x1xf32>
    %622 = arith.divf %620, %621 : vector<8x1xf32>
    %623 = vector.broadcast %615 : vector<8x1xf32> to vector<8x32xf32>
    %624 = arith.subf %609, %623 : vector<8x32xf32>
    %cst_218 = arith.constant 9.99999996E-13 : f32
    %625 = vector.broadcast %cst_218 : f32 to vector<8x1xf32>
    %626 = arith.addf %622, %625 : vector<8x1xf32>
    %627 = math.rsqrt %626 : vector<8x1xf32>
    %628 = vector.broadcast %627 : vector<8x1xf32> to vector<8x32xf32>
    %629 = arith.mulf %624, %628 : vector<8x32xf32>
    %630 = vector.broadcast %610 : vector<1x32xf32> to vector<8x32xf32>
    %631 = arith.mulf %629, %630 : vector<8x32xf32>
    %632 = vector.broadcast %611 : vector<1x32xf32> to vector<8x32xf32>
    %633 = arith.addf %631, %632 : vector<8x32xf32>
    %634 = arith.truncf %633 : vector<8x32xf32> to vector<8x32xbf16>
    %c0_219 = arith.constant 0 : index
    %c0_220 = arith.constant 0 : index
    %635 = vector.load %arg24[%c0_219, %c0_220] : memref<32x512xbf16, #tpu.memory_space<vmem>>, vector<32x512xbf16>
    %cst_221 = arith.constant dense<0.000000e+00> : vector<8x512xf32>
    %636 = tpu.matmul %634, %635, %cst_221 {dimension_numbers = #tpu.dot_dimension_numbers<[1], [0], [0], [1], [0, 0, 1, 1], [], []>} : vector<8x32xbf16>, vector<32x512xbf16>, vector<8x512xf32> -> vector<8x512xf32>
    %c0_222 = arith.constant 0 : index
    %c0_223 = arith.constant 0 : index
    %637 = vector.load %arg25[%c0_222, %c0_223] : memref<1x512xf32, #tpu.memory_space<vmem>>, vector<1x512xf32>
    %638 = vector.broadcast %637 : vector<1x512xf32> to vector<8x512xf32>
    %639 = arith.addf %636, %638 : vector<8x512xf32>
    %c0_224 = arith.constant 0 : index
    %c0_225 = arith.constant 0 : index
    %640 = vector.load %arg26[%c0_224, %c0_225] : memref<8x512xf32, #tpu.memory_space<vmem>>, vector<8x512xf32>
    tpu.vector_store %arg26[%c0_224, %c0_225], %639 {strides = array<i32>} : memref<8x512xf32, #tpu.memory_space<vmem>>, vector<8x512xf32>,
    return
  }
  func.func @transform_0(%arg0: i32, %arg1: memref<64xi32, #tpu.memory_space<smem>>, %arg2: memref<2xi32, #tpu.memory_space<smem>>) -> (i32, i32) {
    %c0_i32 = arith.constant 0 : i32
    %c0_i32_0 = arith.constant 0 : i32
    %c0_i32_1 = arith.constant 0 : i32
    return %c0_i32, %c0_i32_0 : i32, i32
  }
  func.func @transform_1(%arg0: i32, %arg1: memref<64xi32, #tpu.memory_space<smem>>, %arg2: memref<2xi32, #tpu.memory_space<smem>>) -> (i32, i32) {
    %c0_i32 = arith.constant 0 : i32
    %c0_i32_0 = arith.constant 0 : i32
    %c0_i32_1 = arith.constant 0 : i32
    return %c0_i32, %c0_i32_0 : i32, i32
  }
  func.func @transform_2(%arg0: i32, %arg1: memref<64xi32, #tpu.memory_space<smem>>, %arg2: memref<2xi32, #tpu.memory_space<smem>>) -> (i32, i32, i32) {
    %c0_i32 = arith.constant 0 : i32
    %c0_i32_0 = arith.constant 0 : i32
    %c0_i32_1 = arith.constant 0 : i32
    %c0_i32_2 = arith.constant 0 : i32
    return %c0_i32, %c0_i32_0, %c0_i32_1 : i32, i32, i32
  }
  func.func @transform_3(%arg0: i32, %arg1: memref<64xi32, #tpu.memory_space<smem>>, %arg2: memref<2xi32, #tpu.memory_space<smem>>) -> (i32, i32) {
    %c0_i32 = arith.constant 0 : i32
    %c0_i32_0 = arith.constant 0 : i32
    %c0_i32_1 = arith.constant 0 : i32
    return %c0_i32, %c0_i32_0 : i32, i32
  }
  func.func @transform_4(%arg0: i32, %arg1: memref<64xi32, #tpu.memory_space<smem>>, %arg2: memref<2xi32, #tpu.memory_space<smem>>) -> (i32, i32) {
    %c0_i32 = arith.constant 0 : i32
    %c0_i32_0 = arith.constant 0 : i32
    %c0_i32_1 = arith.constant 0 : i32
    return %c0_i32, %c0_i32_0 : i32, i32
  }
  func.func @transform_5(%arg0: i32, %arg1: memref<64xi32, #tpu.memory_space<smem>>, %arg2: memref<2xi32, #tpu.memory_space<smem>>) -> (i32, i32, i32) {
    %c0_i32 = arith.constant 0 : i32
    %c0_i32_0 = arith.constant 0 : i32
    %c0_i32_1 = arith.constant 0 : i32
    %c0_i32_2 = arith.constant 0 : i32
    return %c0_i32, %c0_i32_0, %c0_i32_1 : i32, i32, i32
  }
  func.func @transform_6(%arg0: i32, %arg1: memref<64xi32, #tpu.memory_space<smem>>, %arg2: memref<2xi32, #tpu.memory_space<smem>>) -> (i32, i32, i32) {
    %c0_i32 = arith.constant 0 : i32
    %c0_i32_0 = arith.constant 0 : i32
    %c0_i32_1 = arith.constant 0 : i32
    %c0_i32_2 = arith.constant 0 : i32
    return %c0_i32, %c0_i32_0, %c0_i32_1 : i32, i32, i32
  }
  func.func @transform_7(%arg0: i32, %arg1: memref<64xi32, #tpu.memory_space<smem>>, %arg2: memref<2xi32, #tpu.memory_space<smem>>) -> (i32, i32, i32) {
    %c0_i32 = arith.constant 0 : i32
    %c0_i32_0 = arith.constant 0 : i32
    %c0_i32_1 = arith.constant 0 : i32
    %c0_i32_2 = arith.constant 0 : i32
    return %c0_i32, %c0_i32_0, %c0_i32_1 : i32, i32, i32
  }
  func.func @transform_8(%arg0: i32, %arg1: memref<64xi32, #tpu.memory_space<smem>>, %arg2: memref<2xi32, #tpu.memory_space<smem>>) -> (i32, i32, i32) {
    %c0_i32 = arith.constant 0 : i32
    %c0_i32_0 = arith.constant 0 : i32
    %c0_i32_1 = arith.constant 0 : i32
    %c0_i32_2 = arith.constant 0 : i32
    return %c0_i32, %c0_i32_0, %c0_i32_1 : i32, i32, i32
  }
  func.func @transform_9(%arg0: i32, %arg1: memref<64xi32, #tpu.memory_space<smem>>, %arg2: memref<2xi32, #tpu.memory_space<smem>>) -> (i32, i32, i32) {
    %c0_i32 = arith.constant 0 : i32
    %c0_i32_0 = arith.constant 0 : i32
    %c0_i32_1 = arith.constant 0 : i32
    %c0_i32_2 = arith.constant 0 : i32
    return %c0_i32, %c0_i32_0, %c0_i32_1 : i32, i32, i32
  }
  func.func @transform_10(%arg0: i32, %arg1: memref<64xi32, #tpu.memory_space<smem>>, %arg2: memref<2xi32, #tpu.memory_space<smem>>) -> (i32, i32, i32) {
    %c0_i32 = arith.constant 0 : i32
    %c0_i32_0 = arith.constant 0 : i32
    %c0_i32_1 = arith.constant 0 : i32
    %c0_i32_2 = arith.constant 0 : i32
    return %c0_i32, %c0_i32_0, %c0_i32_1 : i32, i32, i32
  }
  func.func @transform_11(%arg0: i32, %arg1: memref<64xi32, #tpu.memory_space<smem>>, %arg2: memref<2xi32, #tpu.memory_space<smem>>) -> (i32, i32, i32) {
    %c0_i32 = arith.constant 0 : i32
    %c0_i32_0 = arith.constant 0 : i32
    %c0_i32_1 = arith.constant 0 : i32
    %c0_i32_2 = arith.constant 0 : i32
    return %c0_i32, %c0_i32_0, %c0_i32_1 : i32, i32, i32
  }
  func.func @transform_12(%arg0: i32, %arg1: memref<64xi32, #tpu.memory_space<smem>>, %arg2: memref<2xi32, #tpu.memory_space<smem>>) -> (i32, i32, i32) {
    %c0_i32 = arith.constant 0 : i32
    %c0_i32_0 = arith.constant 0 : i32
    %c0_i32_1 = arith.constant 0 : i32
    %c0_i32_2 = arith.constant 0 : i32
    return %c0_i32, %c0_i32_0, %c0_i32_1 : i32, i32, i32
  }
  func.func @transform_13(%arg0: i32, %arg1: memref<64xi32, #tpu.memory_space<smem>>, %arg2: memref<2xi32, #tpu.memory_space<smem>>) -> (i32, i32, i32) {
    %c0_i32 = arith.constant 0 : i32
    %c0_i32_0 = arith.constant 0 : i32
    %c0_i32_1 = arith.constant 0 : i32
    %c0_i32_2 = arith.constant 0 : i32
    return %c0_i32, %c0_i32_0, %c0_i32_1 : i32, i32, i32
  }
  func.func @transform_14(%arg0: i32, %arg1: memref<64xi32, #tpu.memory_space<smem>>, %arg2: memref<2xi32, #tpu.memory_space<smem>>) -> (i32, i32, i32) {
    %c0_i32 = arith.constant 0 : i32
    %c0_i32_0 = arith.constant 0 : i32
    %c0_i32_1 = arith.constant 0 : i32
    %c0_i32_2 = arith.constant 0 : i32
    return %c0_i32, %c0_i32_0, %c0_i32_1 : i32, i32, i32
  }
  func.func @transform_15(%arg0: i32, %arg1: memref<64xi32, #tpu.memory_space<smem>>, %arg2: memref<2xi32, #tpu.memory_space<smem>>) -> (i32, i32, i32) {
    %c0_i32 = arith.constant 0 : i32
    %c0_i32_0 = arith.constant 0 : i32
    %c0_i32_1 = arith.constant 0 : i32
    %c0_i32_2 = arith.constant 0 : i32
    return %c0_i32, %c0_i32_0, %c0_i32_1 : i32, i32, i32
  }
  func.func @transform_16(%arg0: i32, %arg1: memref<64xi32, #tpu.memory_space<smem>>, %arg2: memref<2xi32, #tpu.memory_space<smem>>) -> (i32, i32, i32) {
    %c0_i32 = arith.constant 0 : i32
    %c0_i32_0 = arith.constant 0 : i32
    %c0_i32_1 = arith.constant 0 : i32
    %c0_i32_2 = arith.constant 0 : i32
    return %c0_i32, %c0_i32_0, %c0_i32_1 : i32, i32, i32
  }
  func.func @transform_17(%arg0: i32, %arg1: memref<64xi32, #tpu.memory_space<smem>>, %arg2: memref<2xi32, #tpu.memory_space<smem>>) -> (i32, i32) {
    %c0_i32 = arith.constant 0 : i32
    %c0_i32_0 = arith.constant 0 : i32
    %c0_i32_1 = arith.constant 0 : i32
    return %c0_i32, %c0_i32_0 : i32, i32
  }
  func.func @transform_18(%arg0: i32, %arg1: memref<64xi32, #tpu.memory_space<smem>>, %arg2: memref<2xi32, #tpu.memory_space<smem>>) -> (i32, i32) {
    %c0_i32 = arith.constant 0 : i32
    %c0_i32_0 = arith.constant 0 : i32
    %c0_i32_1 = arith.constant 0 : i32
    return %c0_i32, %c0_i32_0 : i32, i32
  }
  func.func @transform_19(%arg0: i32, %arg1: memref<64xi32, #tpu.memory_space<smem>>, %arg2: memref<2xi32, #tpu.memory_space<smem>>) -> (i32, i32) {
    %c0_i32 = arith.constant 0 : i32
    %c0_i32_0 = arith.constant 0 : i32
    %c0_i32_1 = arith.constant 0 : i32
    return %c0_i32, %c0_i32_0 : i32, i32
  }
  func.func @transform_20(%arg0: i32, %arg1: memref<64xi32, #tpu.memory_space<smem>>, %arg2: memref<2xi32, #tpu.memory_space<smem>>) -> (i32, i32) {
    %c0_i32 = arith.constant 0 : i32
    %c0_i32_0 = arith.constant 0 : i32
    %c0_i32_1 = arith.constant 0 : i32
    return %c0_i32, %c0_i32_0 : i32, i32
  }
  func.func @transform_21(%arg0: i32, %arg1: memref<64xi32, #tpu.memory_space<smem>>, %arg2: memref<2xi32, #tpu.memory_space<smem>>) -> (i32, i32) {
    %c0_i32 = arith.constant 0 : i32
    %c0_i32_0 = arith.constant 0 : i32
    %c0_i32_1 = arith.constant 0 : i32
    return %c0_i32, %c0_i32_0 : i32, i32
  }
  func.func @transform_22(%arg0: i32, %arg1: memref<64xi32, #tpu.memory_space<smem>>, %arg2: memref<2xi32, #tpu.memory_space<smem>>) -> (i32, i32) {
    %c0_i32 = arith.constant 0 : i32
    %c0_i32_0 = arith.constant 0 : i32
    %c0_i32_1 = arith.constant 0 : i32
    return %c0_i32, %c0_i32_0 : i32, i32
  }
  func.func @transform_23(%arg0: i32, %arg1: memref<64xi32, #tpu.memory_space<smem>>, %arg2: memref<2xi32, #tpu.memory_space<smem>>) -> (i32, i32) {
    %c0_i32 = arith.constant 0 : i32
    %c0_i32_0 = arith.constant 0 : i32
    %c0_i32_1 = arith.constant 0 : i32
    return %c0_i32, %c0_i32_0 : i32, i32
  }
}

</mosaic_0001>

<bundles_post_ra>
// kernel: word_model_forward.1
= control target key start
LH: loop header
LB: loop body
LE: loop exit
PB: predicated region body
PF: predicated region fallthrough
CT: control target
= control target key end

     0   :  { %s8280_s0 = inlined_call_operand.vmem [shape: s32[64], index: 0, kind: input, shape index: {}]   ;;  %s8281_s2 = inlined_call_operand.vmem [shape: f32[512,32], index: 2, kind: input, shape index: {}]   ;;  %s8282_s3 = inlined_call_operand.vmem [shape: f32[64,32], index: 3, kind: input, shape index: {}]   ;;  %s8283_s4 = inlined_call_operand.vmem [shape: f32[2,1,32], index: 4, kind: input, shape index: {}]   ;;  %s8284_s5 = inlined_call_operand.vmem [shape: f32[1,32], index: 5, kind: input, shape index: {}]   ;;  %s8285_s6 = inlined_call_operand.vmem [shape: f32[1,32], index: 6, kind: input, shape index: {}]   ;;  %s8286_s7 = inlined_call_operand.vmem [shape: bf16[2,32,96], index: 7, kind: input, shape index: {}]   ;;  %s8287_s8 = inlined_call_operand.vmem [shape: f32[2,1,96], index: 8, kind: input, shape index: {}]   ;;  %s8288_s9 = inlined_call_operand.vmem [shape: bf16[2,32,32], index: 9, kind: input, shape index: {}]   ;;  %s8289_s10 = inlined_call_operand.vmem [shape: f32[2,1,32], index: 10, kind: input, shape index: {}]   ;;  %s8290_s11 = inlined_call_operand.vmem [shape: f32[2,1,32], index: 11, kind: input, shape index: {}]   ;;  %s8291_s12 = inlined_call_operand.vmem [shape: f32[2,1,32], index: 12, kind: input, shape index: {}]   ;;  %s8292_s13 = inlined_call_operand.vmem [shape: bf16[2,32,64], index: 13, kind: input, shape index: {}]   ;;  %s8293_s14 = inlined_call_operand.vmem [shape: f32[2,1,64], index: 14, kind: input, shape index: {}]   ;;  %s8294_s15 = inlined_call_operand.vmem [shape: bf16[2,64,32], index: 15, kind: input, shape index: {}]   ;;  %s8295_s16 = inlined_call_operand.vmem [shape: f32[2,1,32], index: 16, kind: input, shape index: {}]   ;;  %s8296_s17 = inlined_call_operand.vmem [shape: f32[2,1,32], index: 17, kind: input, shape index: {}]   ;;  %s8297_s18 = inlined_call_operand.vmem [shape: f32[2,1,32], index: 18, kind: input, shape index: {}]   ;;  %s8298_s19 = inlined_call_operand.vmem [shape: bf16[32,32], index: 19, kind: input, shape index: {}]   ;;  %s8299_s20 = inlined_call_operand.vmem [shape: f32[1,32], index: 20, kind: input, shape index: {}]   ;;  %s8300_s21 = inlined_call_operand.vmem [shape: f32[1,32], index: 21, kind: input, shape index: {}]   ;;  %s8301_s22 = inlined_call_operand.vmem [shape: f32[1,32], index: 22, kind: input, shape index: {}]   ;;  %s8302_s23 = inlined_call_operand.vmem [shape: bf16[32,512], index: 23, kind: input, shape index: {}]   ;;  %s8303_s24 = inlined_call_operand.vmem [shape: f32[1,512], index: 24, kind: input, shape index: {}]   ;;  %s8304_s25 = inlined_call_operand.vmem [shape: f32[8,512], index: 25, kind: output, shape index: {}]   ;;  %s8305_s1 = inlined_call_operand.vmem [shape: s32[2], index: 1, kind: input, shape index: {}]  }
   0x1   :  { %8328 = sst [smem:[#allocation7_spill]] %s8280_s0 }
   0x2   :  { %8329 = sst [smem:[#allocation8_spill]] %s8281_s2 }
   0x3   :  { %8330 = sst [smem:[#allocation9_spill]] %s8282_s3 }
   0x4   :  { %8331 = sst [smem:[#allocation10_spill]] %s8283_s4  ;;  %s34_s4 = sshll.u32 %s8305_s1, 4  ;;  %s35_s4 = int_to_ptr.vmem [resolvable:$true] %s34_s4 }
   0x5   :  { %8332 = sst [smem:[#allocation11_spill]] %s8284_s5 }
   0x6   :  { %8333 = sst [smem:[#allocation12_spill]] %s8285_s6 }
   0x7   :  { %8334 = sst [smem:[#allocation13_spill]] %s8286_s7  ;;  %s8339_s7 = sld [smem:[#allocation7_spill]] }
   0x8   :  { %8335 = sst [smem:[#allocation14_spill]] %s8287_s8 }
   0x9   :  { %8336 = sst [smem:[#allocation15_spill]] %s8288_s9 }
   0xa   :  { %8337 = sst [smem:[#allocation16_spill]] %s8289_s10 }
   0xb   :  { %8338 = sst [smem:[#allocation17_spill]] %s8299_s20 }
   0xd   :  { %s30_s20 = sshll.u32 %s8339_s7, 4  ;;  %s31_s20 = int_to_ptr.vmem [resolvable:$true] %s30_s20 }
   0xe   :  { %s6546_s26 = scalar_lea.vmem %s31_s20, 16  ;;  %p6551_p1 = scmp.lt.s32.totalorder %s31_s20, %s31_s20 }
   0xf   :  { %p6547_p0 = scmp.ne.s32.totalorder %s31_s20, %s6546_s26  ;;  %p6552_p2 = scmp.lt.s32.totalorder %s6546_s26, %s6546_s26 }
  0x11   :  { %p6553_p3 = por %p6552_p2, %p6551_p1 }
  0x13   :  { %p6554_p4 = pnand %p6553_p3, %p6547_p0 }
  0x15   :  { %6557 = shalt.err (!%p6554_p4)  }
  0x16   :  { %s6580_s2 = smov [#allocation4]   ;;  %s6558_s9 = scalar_lea.vmem %s35_s4, 16 }
  0x17   :  { %33 = dma.vmem_to_smem %s31_s20, 16, %s6580_s2, [#allocation3] }
  0x18   :  { %p6559_p5 = scmp.ne.s32.totalorder %s35_s4, %s6558_s9  ;;  %p6563_p6 = scmp.lt.s32.totalorder %s35_s4, %s35_s4 }
  0x19   :  { %p6564_p7 = scmp.lt.s32.totalorder %s6558_s9, %s6558_s9 }
  0x1b   :  { %p6565_p8 = por %p6564_p7, %p6563_p6 }
  0x1d   :  { %p6566_p9 = pnand %p6565_p8, %p6559_p5 }
  0x1f   :  { %6569 = shalt.err (!%p6566_p9)  }
  0x20   :  { %s6581_s27 = smov [#allocation5]  }
  0x21   :  { %37 = dma.vmem_to_smem %s35_s4, 16, %s6581_s27, [#allocation3] }
  0x22   :  { %6574 = dma.done.wait [#allocation3], 32 }
  0x23   :  { %6575 = vsyncadd [#allocation3], 4294967264 }
  0x24   :  { %39 = sfence }
  0x25   :  { %s6576_s1 = smov 0  }
  0x26 LB: > { %s93_s5 = sld [smem:[#allocation4 + %s6578_s1]]  ;;  %vm97_vm0 = vcmask 253952   ;;  %s96_s0 = scalar_lea.vmem [#allocation2], %s6578_s1  ;;  %s6578_s1 = sphi %s6576_s1, %s92_s1  }
  0x27   : > { %s8340_s10 = sld [smem:[#allocation8_spill]]  ;;  %s92_s1 = sadd.s32 1, %s6578_s1  }
  0x28   : > { %p89_p10 = scmp.ge.s32.totalorder %s92_s1, 64  }
  0x29   :  { %s8341_s7 = sld [smem:[#allocation9_spill]] (%p89_p10)  ;;  %vm125_vm1 = vcmask (%p89_p10), 261120   ;;  %s8343_s2 = sld [smem:[#allocation11_spill]] (%p89_p10)  ;;  %vm386_vm2 = vcmask (%p89_p10), 64512   ;;  %vm1843_vm3 = vcmask (%p89_p10), 130048   ;;  %vm1848_vm4 = vcmask (%p89_p10), 195584  }
  0x2a   :  { %91 = sbr.rel (!%p89_p10) target bundleno = 38 (0x26), region = 136  ;;  %s8344_s1 = sld [smem:[#allocation12_spill]] (%p89_p10)  ;;  %vm2378_vm5 = vcmask (%p89_p10), 523264   ;;  %vm6597_vm6 = vmmov (%p89_p10), 0   ;;  %vm4944_vm7 = vcmask (%p89_p10), 1040384   ;;  %vm4946_vm8 = vcmask (%p89_p10), 1041408  }
  0x2b   :  { %s8345_s20 = sld [smem:[#allocation14_spill]] (%p89_p10)  ;;  %s8346_s29 = sld [smem:[#allocation10_spill]] (%p89_p10) }
  0x2c   :  { %s6583_s8 = smov (%p89_p10), 64   ;;  %s6584_s4 = smov (%p89_p10), 88  }
  0x2d   : > { %s94_s6 = scalar_lea.vmem %s8340_s10, %s93_s5  ;;  %s6582_s10 = smov (%p89_p10), 96  }
  0x2e   : > { %v95_v0 = vld [vmem:[%s94_s6] sm:$0x1]  ;;  %s6585_s26 = smov (%p89_p10), 120   ;;  %s6587_s9 = smov (%p89_p10), 80  }
  0x2f   : > { %98 = vst.msk [vmem:[%s96_s0] sm:$0x1] %vm97_vm0, %v95_v0  ;;  %v107_v2 = vld [vmem:[%s8341_s7] sm:$0xff] (%p89_p10)  ;;  %v109_v5 = vld [vmem:[%s8341_s7 + $0x10] sm:$0xff] (%p89_p10)  ;;  %v108_v7 = vld [vmem:[%s8341_s7 + $0x8] sm:$0xff] (%p89_p10)  ;;  %s8326_s27 = smov (%p89_p10), 112  }
  0x30   :  { %v110_v11 = vld [vmem:[%s8341_s7 + $0x18] sm:$0xff] (%p89_p10)  ;;  %v111_v15 = vld [vmem:[%s8341_s7 + $0x20] sm:$0xff] (%p89_p10)  ;;  %v112_v17 = vld [vmem:[%s8341_s7 + $0x28] sm:$0xff] (%p89_p10)  ;;  %s8322_s5 = smov (%p89_p10), 72   ;;  %s8314_s28 = smov (%p89_p10), 104  }
  0x31   :  { %v113_v23 = vld [vmem:[%s8341_s7 + $0x30] sm:$0xff]  ;;  %v114_v27 = vld [vmem:[%s8341_s7 + $0x38] sm:$0xff]  ;;  %s8342_s7 = sld [smem:[#allocation13_spill]]  ;;  %s8312_s6 = smov 40  }
  0x32   :  { %s8320_s0 = smov 8   ;;  %s8318_s3 = smov 24  }
  0x36   :  { %v99_v1 = vld [vmem:[#allocation2] sm:$0xff]  ;;  %v101_v3 = vld [vmem:[#allocation2 + $0x10] sm:$0xff]  ;;  %v100_v6 = vld [vmem:[#allocation2 + $0x8] sm:$0xff] }
  0x37   :  { %v115_v4 = vadd.f32 %v107_v2, %v99_v1  ;;  %v117_v8 = vadd.f32 %v109_v5, %v101_v3  ;;  %v116_v9 = vadd.f32 %v108_v7, %v100_v6  ;;  %v102_v10 = vld [vmem:[#allocation2 + $0x18] sm:$0xff]  ;;  %v103_v12 = vld [vmem:[#allocation2 + $0x20] sm:$0xff]  ;;  %v104_v16 = vld [vmem:[#allocation2 + $0x28] sm:$0xff] }
  0x38   :  { %v118_v14 = vadd.f32 %v110_v11, %v102_v10  ;;  %v119_v20 = vadd.f32 %v111_v15, %v103_v12  ;;  %v120_v21 = vadd.f32 %v112_v17, %v104_v16  ;;  %v105_v22 = vld [vmem:[#allocation2 + $0x30] sm:$0xff]  ;;  %v106_v24 = vld [vmem:[#allocation2 + $0x38] sm:$0xff]  ;;  %v6141_v10 = vld [vmem:[%s8342_s7 + $0x8] sm:$0xff]  }
  0x39   :  { %v126_v13 = vsel %vm125_vm1, %v115_v4, 0.0  ;;  %v132_v18 = vsel %vm125_vm1, %v117_v8, 0.0  ;;  %v129_v19 = vsel %vm125_vm1, %v116_v9, 0.0  ;;  %v121_v26 = vadd.f32 %v113_v23, %v105_v22 }
  0x3a   :  { %127 = vadd.xlane.f32.xlu0 %v126_v13  ;;  %133 = vadd.xlane.f32.xlu1 %v132_v18  ;;  %v135_v25 = vsel %vm125_vm1, %v118_v14, 0.0  ;;  %v138_v28 = vsel %vm125_vm1, %v119_v20, 0.0  ;;  %v141_v29 = vsel %vm125_vm1, %v120_v21, 0.0  ;;  %v122_v30 = vadd.f32 %v114_v27, %v106_v24 }
  0x3b   :  { %v144_v31 = vsel %vm125_vm1, %v121_v26, 0.0 }
  0x3c   :  { %v147_v32 = vsel %vm125_vm1, %v122_v30, 0.0 }
  0x3e   :  { %130 = vadd.xlane.f32.xlu0 %v129_v19  ;;  %136 = vadd.xlane.f32.xlu1 %v135_v25 }
  0x42   :  { %139 = vadd.xlane.f32.xlu0 %v138_v28  ;;  %142 = vadd.xlane.f32.xlu1 %v141_v29 }
  0x46   :  { %145 = vadd.xlane.f32.xlu0 %v144_v31  ;;  %148 = vadd.xlane.f32.xlu1 %v147_v32 }
  0xc7   :  { %v128_v33 = vpop.xlane.xlu0 %127  ;;  %v134_v35 = vpop.xlane.xlu1 %133 }
  0xc8   :  { %v151_v34 = vmul.f32 0.03125, %v128_v33  ;;  %v153_v36 = vmul.f32 0.03125, %v134_v35 }
  0xca   :  { %v6770_v37 = vsub.f32 %v115_v4, %v151_v34  ;;  %v6772_v38 = vsub.f32 %v117_v8, %v153_v36  ;;  %v5227_v36 = vld [vmem:[%s8343_s2] ss:$0 sm:$0xff]  ;;  %s6586_s2 = smov 56  }
  0xcb   :  { %v131_v39 = vpop.xlane.xlu0 %130  ;;  %v137_v41 = vpop.xlane.xlu1 %136 }
  0xcc   :  { %v152_v40 = vmul.f32 0.03125, %v131_v39  ;;  %v167_v42 = vmul.f32 %v6770_v37, %v6770_v37  ;;  %v154_v43 = vmul.f32 0.03125, %v137_v41  ;;  %v169_v44 = vmul.f32 %v6772_v38, %v6772_v38 }
  0xce   :  { %v6778_v45 = vsub.f32 %v116_v9, %v152_v40  ;;  %v175_v46 = vsel %vm125_vm1, %v167_v42, 0.0  ;;  %v6781_v47 = vsub.f32 %v118_v14, %v154_v43  ;;  %v181_v51 = vsel %vm125_vm1, %v169_v44, 0.0  ;;  %v6140_v9 = vld [vmem:[%s8342_s7] sm:$0xff]  }
  0xcf   :  { %176 = vadd.xlane.f32.xlu0 %v175_v46  ;;  %v140_v48 = vpop.xlane.xlu0 %139  ;;  %v143_v50 = vpop.xlane.xlu1 %142  ;;  %5593 = vmatprep.subr.bf16.mxu0 %v6140_v9  ;;  %v5228_v44 = vld [vmem:[%s8344_s1] ss:$0 sm:$0xff]  ;;  %s8324_s1 = smov 48  }
  0xd0   :  { %v155_v49 = vmul.f32 0.03125, %v140_v48  ;;  %v168_v52 = vmul.f32 %v6778_v45, %v6778_v45  ;;  %v156_v53 = vmul.f32 0.03125, %v143_v50  ;;  %v170_v54 = vmul.f32 %v6781_v47, %v6781_v47  ;;  %5594 = vmatpush3.bf16.msra.mxu0 %v6140_v9 }
  0xd1   :  { %5595 = vmatprep.subr.bf16.mxu0 %v6141_v10 }
  0xd2   :  { %v6788_v55 = vsub.f32 %v119_v20, %v155_v49  ;;  %v178_v56 = vsel %vm125_vm1, %v168_v52, 0.0  ;;  %v6791_v57 = vsub.f32 %v120_v21, %v156_v53  ;;  %v184_v61 = vsel %vm125_vm1, %v170_v54, 0.0 }
  0xd3   :  { %182 = vadd.xlane.f32.xlu0 %v181_v51  ;;  %179 = vadd.xlane.f32.xlu1 %v178_v56  ;;  %v146_v58 = vpop.xlane.xlu0 %145  ;;  %v149_v60 = vpop.xlane.xlu1 %148 }
  0xd4   :  { %v157_v59 = vmul.f32 0.03125, %v146_v58  ;;  %v171_v62 = vmul.f32 %v6788_v55, %v6788_v55  ;;  %v158_v63 = vmul.f32 0.03125, %v149_v60  ;;  %v172_v0 = vmul.f32 %v6791_v57, %v6791_v57  ;;  %5596 = vmatpush3.bf16.msra.mxu0 %v6141_v10 }
  0xd6   :  { %v6798_v1 = vsub.f32 %v121_v26, %v157_v59  ;;  %v187_v2 = vsel %vm125_vm1, %v171_v62, 0.0  ;;  %v6801_v3 = vsub.f32 %v122_v30, %v158_v63  ;;  %v190_v4 = vsel %vm125_vm1, %v172_v0, 0.0 }
  0xd7   :  { %185 = vadd.xlane.f32.xlu1 %v184_v61  ;;  %188 = vadd.xlane.f32.xlu0 %v187_v2 }
  0xd8   :  { %v173_v5 = vmul.f32 %v6798_v1, %v6798_v1  ;;  %v174_v6 = vmul.f32 %v6801_v3, %v6801_v3 }
  0xda   :  { %v193_v7 = vsel %vm125_vm1, %v173_v5, 0.0  ;;  %v196_v8 = vsel %vm125_vm1, %v174_v6, 0.0 }
  0xdb   :  { %191 = vadd.xlane.f32.xlu1 %v190_v4  ;;  %194 = vadd.xlane.f32.xlu0 %v193_v7 }
  0xdf   :  { %197 = vadd.xlane.f32.xlu1 %v196_v8 }
 0x15c   :  { %v177_v11 = vpop.xlane.xlu0 %176 }
 0x15d   :  { %v199_v12 = vmul.f32 0.03125, %v177_v11 }
 0x15f   :  { %v207_v13 = vadd.f32 1e-12, %v199_v12 }
 0x160   :  { %v180_v14 = vpop.xlane.xlu1 %179  ;;  %v183_v15 = vpop.xlane.xlu0 %182 }
 0x161   :  { %6174 = vrsqrt.f32 %v207_v13  ;;  %v200_v16 = vmul.f32 0.03125, %v180_v14  ;;  %v201_v17 = vmul.f32 0.03125, %v183_v15 }
 0x163   :  { %v208_v18 = vadd.f32 1e-12, %v200_v16  ;;  %v209_v19 = vadd.f32 1e-12, %v201_v17 }
 0x164   :  { %v186_v20 = vpop.xlane.xlu1 %185  ;;  %v189_v21 = vpop.xlane.xlu0 %188 }
 0x165   :  { %6176 = vrsqrt.f32 %v208_v18  ;;  %v202_v22 = vmul.f32 0.03125, %v186_v20  ;;  %v203_v23 = vmul.f32 0.03125, %v189_v21 }
 0x166   :  { %6178 = vrsqrt.f32 %v209_v19 }
 0x167   :  { %v210_v24 = vadd.f32 1e-12, %v202_v22  ;;  %v211_v25 = vadd.f32 1e-12, %v203_v23 }
 0x168   :  { %v192_v26 = vpop.xlane.xlu1 %191  ;;  %v195_v27 = vpop.xlane.xlu0 %194 }
 0x169   :  { %6180 = vrsqrt.f32 %v210_v24  ;;  %v204_v28 = vmul.f32 0.03125, %v192_v26  ;;  %v205_v29 = vmul.f32 0.03125, %v195_v27 }
 0x16a   :  { %6182 = vrsqrt.f32 %v211_v25 }
 0x16b   :  { %v6175_v30 = vpop.eup %6174  ;;  %v212_v31 = vadd.f32 1e-12, %v204_v28  ;;  %v213_v32 = vadd.f32 1e-12, %v205_v29 }
 0x16c   :  { %v198_v33 = vpop.xlane.xlu1 %197  ;;  %v223_v34 = vmul.f32 %v6175_v30, %v6770_v37 }
 0x16d   :  { %6184 = vrsqrt.f32 %v212_v31  ;;  %v206_v35 = vmul.f32 0.03125, %v198_v33 }
 0x16e   :  { %6186 = vrsqrt.f32 %v213_v32  ;;  %v237_v43 = vmul.f32 %v5227_v36, %v223_v34 }
 0x16f   :  { %v6177_v39 = vpop.eup %6176  ;;  %v214_v40 = vadd.f32 1e-12, %v206_v35 }
 0x170   :  { %v6179_v41 = vpop.eup %6178  ;;  %v224_v42 = vmul.f32 %v6177_v39, %v6778_v45  ;;  %v6825_v50 = vadd.f32 %v5228_v44, %v237_v43 }
 0x171   :  { %6188 = vrsqrt.f32 %v214_v40  ;;  %v225_v37 = vmul.f32 %v6179_v41, %v6772_v38  ;;  %v375_v40 = vlaneseq  ;;  %v259_v41 = vld [vmem:[%s8346_s29] sm:$0x1] }
 0x172   :  { %v238_v46 = vmul.f32 %v5227_v36, %v224_v42  ;;  %v5229_v42 = vadd.f32 -1.0, %v259_v41 }
 0x173   :  { %v6181_v48 = vpop.eup %6180  ;;  %v239_v53 = vmul.f32 %v5227_v36, %v225_v37  ;;  %v6896_v43 = vshrl.u32 %v375_v40, 7 }
 0x174   :  { %v6183_v49 = vpop.eup %6182  ;;  %v6827_v51 = vadd.f32 %v5228_v44, %v238_v46  ;;  %v226_v52 = vmul.f32 %v6181_v48, %v6781_v47 }
 0x175   :  { %v227_v45 = vmul.f32 %v6183_v49, %v6788_v55  ;;  %v6834_v38 = vadd.f32 %v5228_v44, %v239_v53  ;;  %v6899_v37 = vsub.s32 0, %v6896_v43 }
 0x176   :  { %v266_v54 = vpack.c.bf16 %v6827_v51, %v6825_v50  ;;  %v240_v56 = vmul.f32 %v5227_v36, %v226_v52 }
 0x177   :  { %v6185_v58 = vpop.eup %6184  ;;  %v241_v62 = vmul.f32 %v5227_v36, %v227_v45 }
 0x178   :  { %v6187_v59 = vpop.eup %6186  ;;  %5597 = vmatprep.mubr.msk.bf16.mxu0 %vm125_vm1, %v266_v54  ;;  %v6836_v60 = vadd.f32 %v5228_v44, %v240_v56  ;;  %v228_v61 = vmul.f32 %v6185_v58, %v6791_v57  ;;  %v5230_v54 = vld [vmem:[%s8346_s29 + $0x1] sm:$0x1]  ;;  %s8316_s29 = smov 16  }
 0x179   :  { %v229_v47 = vmul.f32 %v6187_v59, %v6798_v1  ;;  %v6843_v2 = vadd.f32 %v5228_v44, %v241_v62  ;;  %v5231_v62 = vadd.f32 -1.0, %v5230_v54 }
 0x17a   :  { %v267_v55 = vpack.c.bf16 %v6836_v60, %v6834_v38  ;;  %v242_v63 = vmul.f32 %v5227_v36, %v228_v61 }
 0x17b   :  { %v6189_v0 = vpop.eup %6188  ;;  %v243_v6 = vmul.f32 %v5227_v36, %v229_v47 }
 0x17c   :  { %5598 = vmatmul.mubr.msk.bf16.vlgmr.msra.gmra.mrb[0].mxu0 %vm125_vm1, %v267_v55  ;;  %v6845_v4 = vadd.f32 %v5228_v44, %v242_v63  ;;  %v230_v5 = vmul.f32 %v6189_v0, %v6801_v3  ;;  %v5232_v3 = vld [vmem:[%s8345_s20] ss:$0 sm:$0xff]  ;;  %v265_v63 = vmul.f32 1e+09, %v5231_v62 }
 0x17d   :  { %v6851_v1 = vadd.f32 %v5228_v44, %v243_v6 }
 0x17e   :  { %v268_v57 = vpack.c.bf16 %v6845_v4, %v6843_v2  ;;  %v244_v7 = vmul.f32 %v5227_v36, %v230_v5  ;;  %v6916_v5 = vrot.slane %v265_v63, %v6899_v37 }
 0x180   :  { %5601 = vmatprep.mubr.msk.bf16.mxu0 %vm125_vm1, %v268_v57  ;;  %v6853_v8 = vadd.f32 %v5228_v44, %v244_v7  ;;  %v261_v44 = vmul.f32 1e+09, %v5229_v42 }
 0x182   :  { %v269_v9 = vpack.c.bf16 %v6853_v8, %v6851_v1  ;;  %v6902_v46 = vrot.slane %v261_v44, %v6899_v37 }
 0x184   :  { %5602 = vmatmul.mubr.msk.bf16.gmra.mrb[4].mxu0 %vm125_vm1, %v269_v9 }
 0x24f   :  { %v5599_v10 = vpop.f32.mrb[0].mxu0 }
 0x250   :  { %v339_v11 = vpop.f32.mrb[1].mxu0  ;;  %v348_v13 = vadd.f32 %v5599_v10, %v5232_v3 }
 0x251   :  { %v5600_v12 = vpop.f32.mrb[2].mxu0  ;;  %v340_v16 = vadd.f32 %v5232_v3, %v339_v11 }
 0x252   :  { %v351_v14 = vadd.f32 %v5600_v12, %v5232_v3  ;;  %v342_v15 = vpop.f32.mrb[3].mxu0 }
 0x253   :  { %v343_v17 = vadd.f32 %v5232_v3, %v342_v15 }
 0x254   :  { %v6861_v18 = vpack.c.bf16 %v351_v14, %v348_v13 }
 0x255   :  { %v6863_v19 = vpack.c.bf16 %v343_v17, %v340_v16 }
 0x256   :  { %384 = vrot.lane.b32.xlu1 %v6861_v18, %s6582_s10 }
 0x257   :  { %382 = vrot.lane.b32.xlu0 %v6863_v19, %s6582_s10  ;;  %v5603_v20 = vpop.f32.mrb[4].mxu0  ;;  %5609 = vmatprep.mubr.msk.bf16.mxu1 %vm386_vm2, %v6863_v19 }
 0x258   :  { %v355_v21 = vpop.f32.mrb[5].mxu0  ;;  %v364_v23 = vadd.f32 %v5603_v20, %v5232_v3 }
 0x259   :  { %v5604_v22 = vpop.f32.mrb[6].mxu0  ;;  %v356_v26 = vadd.f32 %v5232_v3, %v355_v21 }
 0x25a   :  { %v367_v24 = vadd.f32 %v5604_v22, %v5232_v3  ;;  %v358_v25 = vpop.f32.mrb[7].mxu0 }
 0x25b   :  { %v359_v27 = vadd.f32 %v5232_v3, %v358_v25 }
 0x25c   :  { %v6871_v28 = vpack.c.bf16 %v367_v24, %v364_v23 }
 0x25d   :  { %v6873_v29 = vpack.c.bf16 %v359_v27, %v356_v26 }
 0x25f   :  { %563 = vrot.lane.b32.xlu1 %v6873_v29, %s6582_s10 }
 0x263   :  { %565 = vrot.lane.b32.xlu1 %v6871_v28, %s6582_s10 }
 0x2c8   :  { %v385_v32 = vpop.permute.xlu1 %384 }
 0x2c9   :  { %v383_v30 = vpop.permute.xlu0 %382  ;;  %v397_v33 = vsel %vm386_vm2, %v385_v32, 0 }
 0x2ca   :  { %5961 = vmatprep.subr.msk.bf16.mxu1 %vm386_vm2, %v383_v30  ;;  %v394_v31 = vsel %vm386_vm2, %v383_v30, 0 }
 0x2cb   :  { %5606 = vmatpush3.bf16.xpose.msra.mxu1 %v394_v31 }
 0x2cc   :  { %5962 = vmatprep.subr.msk.bf16.mxu1 %vm386_vm2, %v385_v32 }
 0x2d1   :  { %v564_v34 = vpop.permute.xlu1 %563 }
 0x2d2   :  { %v574_v35 = vsel %vm386_vm2, %v564_v34, 0 }
 0x2d3   :  { %5608 = vmatpush3.bf16.xpose.msra.mxu1 %v397_v33 }
 0x2d4   :  { %5963 = vmatprep.subr.msk.bf16.mxu1 %vm386_vm2, %v564_v34 }
 0x2d5   :  { %v566_v36 = vpop.permute.xlu1 %565 }
 0x2d6   :  { %v577_v39 = vsel %vm386_vm2, %v566_v36, 0 }
 0x2da   :  { %5610 = vmatmul.mubr.msk.bf16.vlgmr.msra.gmra.mrb[0].mxu1 %vm386_vm2, %v6861_v18 }
 0x2db   :  { %5622 = vmatpush3.bf16.xpose.msra.mxu1 %v574_v35  ;;  %5625 = vmatprep.mubr.msk.bf16.mxu1 %vm386_vm2, %v6873_v29 }
 0x2dc   :  { %5964 = vmatprep.subr.msk.bf16.mxu1 %vm386_vm2, %v566_v36 }
 0x2e3   :  { %5624 = vmatpush3.bf16.xpose.msra.mxu1 %v577_v39 }
 0x2ea   :  { %5626 = vmatmul.mubr.msk.bf16.vlgmr.msra.gmra.mrb[4].mxu1 %vm386_vm2, %v6871_v28 }
 0x3ad   :  { %v5611_v48 = vpop.f32.mrb[0].mxu1 }
 0x3ae   :  { %v433_v49 = vpop.f32.mrb[1].mxu1  ;;  %v442_v56 = vadd.f32 %v5611_v48, %v6902_v46 }
 0x3af   :  { %v434_v52 = vadd.f32 %v433_v49, %v6902_v46  ;;  %v5612_v53 = vpop.f32.mrb[2].mxu1 }
 0x3b0   :  { %v436_v45 = vpop.f32.mrb[3].mxu1  ;;  %v445_v47 = vadd.f32 %v5612_v53, %v6902_v46  ;;  %v454_v55 = vsel %vm125_vm1, %v442_v56, -inf }
 0x3b1   :  { %v437_v58 = vadd.f32 %v436_v45, %v6902_v46  ;;  %v448_v59 = vsel %vm125_vm1, %v434_v52, -inf }
 0x3b2   :  { %449 = vmax.xlane.f32.xlu0 %v448_v59  ;;  %v457_v0 = vsel %vm125_vm1, %v445_v47, -inf }
 0x3b3   :  { %v451_v61 = vsel %vm125_vm1, %v437_v58, -inf }
 0x3b4   :  { %452 = vmax.xlane.f32.xlu1 %v451_v61 }
 0x3b6   :  { %455 = vmax.xlane.f32.xlu0 %v454_v55 }
 0x3ba   :  { %458 = vmax.xlane.f32.xlu0 %v457_v0 }
 0x3bd   :  { %v5627_v6 = vpop.f32.mrb[4].mxu1 }
 0x3be   :  { %v613_v57 = vpop.f32.mrb[5].mxu1  ;;  %v622_v3 = vadd.f32 %v5627_v6, %v6916_v5 }
 0x3bf   :  { %v6919_v7 = vadd.f32 %v613_v57, %v6916_v5  ;;  %v5628_v9 = vpop.f32.mrb[6].mxu1 }
 0x3c0   :  { %v616_v10 = vpop.f32.mrb[7].mxu1  ;;  %v625_v13 = vadd.f32 %v5628_v9, %v6916_v5  ;;  %v634_v15 = vsel %vm125_vm1, %v622_v3, -inf }
 0x3c1   :  { %v617_v11 = vadd.f32 %v616_v10, %v6916_v5  ;;  %v628_v12 = vsel %vm125_vm1, %v6919_v7, -inf }
 0x3c2   :  { %629 = vmax.xlane.f32.xlu0 %v628_v12  ;;  %v637_v16 = vsel %vm125_vm1, %v625_v13, -inf }
 0x3c3   :  { %v631_v14 = vsel %vm125_vm1, %v617_v11, -inf }
 0x3c4   :  { %632 = vmax.xlane.f32.xlu1 %v631_v14 }
 0x3c6   :  { %635 = vmax.xlane.f32.xlu0 %v634_v15 }
 0x3c8   :  { %638 = vmax.xlane.f32.xlu1 %v637_v16 }
 0x3d9   :  { %496 = vrot.lane.b32.xlu1 %v6861_v18, %s6583_s8 }
 0x3dd   :  { %674 = vrot.lane.b32.xlu1 %v6873_v29, %s6583_s8 }
 0x43f   :  { %v450_v17 = vpop.xlane.xlu0 %449 }
 0x440   :  { %v460_v20 = vsub.f32 %v434_v52, %v450_v17 }
 0x441   :  { %v453_v21 = vpop.xlane.xlu1 %452 }
 0x442   :  { %v464_v24 = vmul.f32 1.442695, %v460_v20  ;;  %v461_v25 = vsub.f32 %v437_v58, %v453_v21 }
 0x443   :  { %v456_v22 = vpop.xlane.xlu0 %455 }
 0x444   :  { %v462_v23 = vsub.f32 %v442_v56, %v456_v22  ;;  %v466_v31 = vmul.f32 1.442695, %v461_v25 }
 0x446   :  { %v468_v26 = vmul.f32 1.442695, %v462_v23 }
 0x447   :  { %v459_v27 = vpop.xlane.xlu0 %458 }
 0x448   :  { %6190 = vpow2.f32 %v468_v26  ;;  %v463_v30 = vsub.f32 %v445_v47, %v459_v27 }
 0x449   :  { %6192 = vpow2.f32 %v464_v24 }
 0x44a   :  { %v470_v32 = vmul.f32 1.442695, %v463_v30 }
 0x44c   :  { %6194 = vpow2.f32 %v470_v32 }
 0x44d   :  { %6196 = vpow2.f32 %v466_v31 }
 0x44f   :  { %v630_v61 = vpop.xlane.xlu0 %629 }
 0x450   :  { %v640_v55 = vsub.f32 %v6919_v7, %v630_v61 }
 0x451   :  { %v633_v33 = vpop.xlane.xlu1 %632 }
 0x452   :  { %v6933_v34 = vpop.eup %6190  ;;  %v641_v39 = vsub.f32 %v617_v11, %v633_v33  ;;  %v644_v0 = vmul.f32 1.442695, %v640_v55 }
 0x453   :  { %v478_v35 = vsel %vm125_vm1, %v6933_v34, 0.0  ;;  %v6937_v36 = vpop.eup %6192  ;;  %v636_v62 = vpop.xlane.xlu0 %635 }
 0x454   :  { %479 = vadd.xlane.f32.xlu0 %v478_v35  ;;  %v472_v44 = vsel %vm125_vm1, %v6937_v36, 0.0  ;;  %v646_v52 = vmul.f32 1.442695, %v641_v39  ;;  %v642_v47 = vsub.f32 %v622_v3, %v636_v62 }
 0x455   :  { %v639_v40 = vpop.xlane.xlu1 %638 }
 0x456   :  { %v6195_v41 = vpop.eup %6194  ;;  %v643_v42 = vsub.f32 %v625_v13, %v639_v40  ;;  %v648_v63 = vmul.f32 1.442695, %v642_v47 }
 0x457   :  { %v481_v48 = vsel %vm125_vm1, %v6195_v41, 0.0  ;;  %v6197_v49 = vpop.eup %6196 }
 0x458   :  { %v650_v53 = vmul.f32 1.442695, %v643_v42  ;;  %473 = vadd.xlane.f32.xlu0 %v472_v44  ;;  %482 = vadd.xlane.f32.xlu1 %v481_v48  ;;  %v475_v45 = vsel %vm125_vm1, %v6197_v49, 0.0 }
 0x459   :  { %v497_v10 = vpop.permute.xlu1 %496 }
 0x45a   :  { %6198 = vpow2.f32 %v650_v53 }
 0x45b   :  { %6200 = vpow2.f32 %v646_v52 }
 0x45c   :  { %476 = vadd.xlane.f32.xlu1 %v475_v45  ;;  %6202 = vpow2.f32 %v648_v63 }
 0x45d   :  { %6204 = vpow2.f32 %v644_v0  ;;  %v675_v3 = vpop.permute.xlu1 %674 }
 0x464   :  { %v6943_v54 = vpop.eup %6198 }
 0x465   :  { %v661_v56 = vsel %vm125_vm1, %v6943_v54, 0.0  ;;  %v6947_v58 = vpop.eup %6200 }
 0x466   :  { %662 = vadd.xlane.f32.xlu1 %v661_v56  ;;  %v655_v59 = vsel %vm125_vm1, %v6947_v58, 0.0  ;;  %v6203_v6 = vpop.eup %6202 }
 0x467   :  { %v658_v57 = vsel %vm125_vm1, %v6203_v6, 0.0  ;;  %v6205_v9 = vpop.eup %6204 }
 0x468   :  { %v652_v7 = vsel %vm125_vm1, %v6205_v9, 0.0 }
 0x46a   :  { %656 = vadd.xlane.f32.xlu1 %v655_v59 }
 0x46e   :  { %494 = vrot.lane.b32.xlu0 %v6863_v19, %s6583_s8 }
 0x47b   :  { %676 = vrot.lane.b32.xlu1 %v6871_v28, %s6583_s8 }
 0x47f   :  { %741 = vrot.lane.b32.xlu1 %v6861_v18, %s6584_s4 }
 0x483   :  { %737 = vrot.lane.b32.xlu1 %v6861_v18, %s6585_s26 }
 0x48d   :  { %659 = vadd.xlane.f32.xlu0 %v658_v57 }
 0x491   :  { %653 = vadd.xlane.f32.xlu0 %v652_v7 }
 0x4a7   :  { %739 = vrot.lane.b32.xlu0 %v6863_v19, %s6584_s4 }
 0x4ab   :  { %735 = vrot.lane.b32.xlu0 %v6863_v19, %s6585_s26 }
 0x4e1   :  { %v480_v11 = vpop.xlane.xlu0 %479 }
 0x4e5   :  { %v483_v12 = vpop.xlane.xlu1 %482  ;;  %v474_v13 = vpop.xlane.xlu0 %473 }
 0x4e6   :  { %6206 = vrcp.f32 %v483_v12 }
 0x4e7   :  { %6208 = vrcp.f32 %v474_v13 }
 0x4e8   :  { %6210 = vrcp.f32 %v480_v11 }
 0x4e9   :  { %v477_v14 = vpop.xlane.xlu1 %476  ;;  %v495_v15 = vpop.permute.xlu0 %494 }
 0x4ea   :  { %6212 = vrcp.f32 %v477_v14  ;;  %5613 = vmatprep.subr.bf16.mxu0 %v495_v15 }
 0x4eb   :  { %5614 = vmatpush3.bf16.msra.mxu0 %v495_v15 }
 0x4ec   :  { %5615 = vmatprep.subr.bf16.mxu0 %v497_v10 }
 0x4ef   :  { %5616 = vmatpush3.bf16.msra.mxu0 %v497_v10 }
 0x4f0   :  { %5629 = vmatprep.subr.bf16.mxu0 %v675_v3  ;;  %v6207_v16 = vpop.eup %6206 }
 0x4f1   :  { %v6209_v17 = vpop.eup %6208  ;;  %v491_v23 = vmul.f32 %v6207_v16, %v6195_v41 }
 0x4f2   :  { %v6211_v20 = vpop.eup %6210  ;;  %v488_v24 = vmul.f32 %v6209_v17, %v6937_v36 }
 0x4f3   :  { %v663_v21 = vpop.xlane.xlu1 %662  ;;  %v490_v26 = vmul.f32 %v6211_v20, %v6933_v34 }
 0x4f4   :  { %v6213_v22 = vpop.eup %6212 }
 0x4f5   :  { %v489_v25 = vmul.f32 %v6213_v22, %v6197_v49  ;;  %v493_v31 = vpack.c.bf16 %v491_v23, %v490_v26 }
 0x4f7   :  { %v657_v27 = vpop.xlane.xlu1 %656  ;;  %v492_v30 = vpack.c.bf16 %v489_v25, %v488_v24 }
 0x4f9   :  { %5617 = vmatprep.mubr.msk.bf16.mxu0 %vm125_vm1, %v492_v30 }
 0x4fa   :  { %5618 = vmatmul.mubr.msk.bf16.vlgmr.msra.gmra.mrb[8].mxu0 %vm125_vm1, %v493_v31 }
 0x4fb   :  { %5630 = vmatpush3.bf16.msra.mxu0 %v675_v3  ;;  %v677_v32 = vpop.permute.xlu1 %676 }
 0x4fc   :  { %5631 = vmatprep.subr.bf16.mxu0 %v677_v32 }
 0x4ff   :  { %5632 = vmatpush3.bf16.msra.mxu0 %v677_v32  ;;  %v742_v59 = vpop.permute.xlu1 %741 }
 0x500   :  { %v753_v61 = vsel %vm386_vm2, %v742_v59, 0 }
 0x51a   :  { %v660_v33 = vpop.xlane.xlu0 %659 }
 0x51b   :  { %6214 = vrcp.f32 %v660_v33 }
 0x51c   :  { %6216 = vrcp.f32 %v657_v27 }
 0x51d   :  { %6218 = vrcp.f32 %v663_v21 }
 0x51e   :  { %v654_v35 = vpop.xlane.xlu0 %653 }
 0x51f   :  { %6220 = vrcp.f32 %v654_v35 }
 0x522   :  { %v740_v36 = vpop.permute.xlu0 %739 }
 0x523   :  { %5965 = vmatprep.subr.msk.bf16.mxu0 %vm386_vm2, %v740_v36  ;;  %v750_v56 = vsel %vm386_vm2, %v740_v36, 0 }
 0x525   :  { %v6215_v34 = vpop.eup %6214 }
 0x526   :  { %v6217_v39 = vpop.eup %6216  ;;  %v670_v42 = vmul.f32 %v6215_v34, %v6203_v6  ;;  %v736_v45 = vpop.permute.xlu0 %735 }
 0x527   :  { %v6219_v40 = vpop.eup %6218  ;;  %v669_v48 = vmul.f32 %v6217_v39, %v6947_v58  ;;  %v738_v58 = vpop.permute.xlu1 %737 }
 0x528   :  { %v671_v49 = vmul.f32 %v6219_v40, %v6943_v54 }
 0x529   :  { %v6221_v41 = vpop.eup %6220 }
 0x52a   :  { %v668_v44 = vmul.f32 %v6221_v41, %v6205_v9  ;;  %v673_v53 = vpack.c.bf16 %v671_v49, %v670_v42 }
 0x52c   :  { %v672_v52 = vpack.c.bf16 %v669_v48, %v668_v44 }
 0x52e   :  { %5633 = vmatprep.mubr.msk.bf16.mxu0 %vm125_vm1, %v672_v52 }
 0x52f   :  { %5634 = vmatmul.mubr.msk.bf16.vlgmr.msra.gmra.mrb[12].mxu0 %vm125_vm1, %v673_v53 }
 0x530   :  { %5638 = vmatpush3.bf16.xpose.msra.mxu0 %v750_v56  ;;  %5641 = vmatprep.mubr.msk.bf16.mxu0 %vm386_vm2, %v736_v45 }
 0x531   :  { %5966 = vmatprep.subr.msk.bf16.mxu0 %vm386_vm2, %v742_v59 }
 0x538   :  { %5640 = vmatpush3.bf16.xpose.msra.mxu0 %v753_v61 }
 0x53f   :  { %5642 = vmatmul.mubr.msk.bf16.vlgmr.msra.gmra.mrb[16].mxu0 %vm386_vm2, %v738_v58 }
 0x5cd   :  { %v6980_v54 = vpop.f32.mrb[8].mxu0 }
 0x5ce   :  { %v6982_v62 = vpop.f32.mrb[9].mxu0 }
 0x5cf   :  { %v6984_v47 = vpop.f32.mrb[10].mxu0 }
 0x5d0   :  { %v6986_v55 = vpop.f32.mrb[11].mxu0 }
 0x602   :  { %v6988_v63 = vpop.f32.mrb[12].mxu0 }
 0x603   :  { %v6990_v0 = vpop.f32.mrb[13].mxu0 }
 0x604   :  { %v6992_v6 = vpop.f32.mrb[14].mxu0 }
 0x605   :  { %v6994_v57 = vpop.f32.mrb[15].mxu0 }
 0x612   :  { %v5643_v9 = vpop.f32.mrb[16].mxu0 }
 0x613   :  { %v789_v7 = vpop.f32.mrb[17].mxu0  ;;  %v798_v12 = vadd.f32 %v5643_v9, %v6902_v46 }
 0x614   :  { %v790_v10 = vadd.f32 %v789_v7, %v6902_v46  ;;  %v5644_v3 = vpop.f32.mrb[18].mxu0 }
 0x615   :  { %v792_v11 = vpop.f32.mrb[19].mxu0  ;;  %v801_v16 = vadd.f32 %v5644_v3, %v6902_v46  ;;  %v810_v17 = vsel %vm125_vm1, %v798_v12, -inf }
 0x616   :  { %v793_v13 = vadd.f32 %v792_v11, %v6902_v46  ;;  %v804_v14 = vsel %vm125_vm1, %v790_v10, -inf }
 0x617   :  { %805 = vmax.xlane.f32.xlu0 %v804_v14  ;;  %v813_v20 = vsel %vm125_vm1, %v801_v16, -inf }
 0x618   :  { %v807_v15 = vsel %vm125_vm1, %v793_v13, -inf }
 0x619   :  { %808 = vmax.xlane.f32.xlu1 %v807_v15 }
 0x61b   :  { %811 = vmax.xlane.f32.xlu0 %v810_v17 }
 0x61f   :  { %814 = vmax.xlane.f32.xlu0 %v813_v20 }
 0x62a   :  { %852 = vrot.lane.b32.xlu1 %v6861_v18, %s6586_s2 }
 0x6a4   :  { %v806_v21 = vpop.xlane.xlu0 %805 }
 0x6a5   :  { %v816_v22 = vsub.f32 %v790_v10, %v806_v21 }
 0x6a6   :  { %v809_v23 = vpop.xlane.xlu1 %808 }
 0x6a7   :  { %v820_v26 = vmul.f32 1.442695, %v816_v22  ;;  %v817_v27 = vsub.f32 %v793_v13, %v809_v23 }
 0x6a8   :  { %v812_v24 = vpop.xlane.xlu0 %811 }
 0x6a9   :  { %v818_v25 = vsub.f32 %v798_v12, %v812_v24  ;;  %v822_v33 = vmul.f32 1.442695, %v817_v27 }
 0x6aa   :  { %v853_v49 = vpop.permute.xlu1 %852 }
 0x6ab   :  { %v824_v30 = vmul.f32 1.442695, %v818_v25 }
 0x6ac   :  { %v815_v31 = vpop.xlane.xlu0 %814 }
 0x6ad   :  { %6222 = vpow2.f32 %v824_v30  ;;  %v819_v32 = vsub.f32 %v801_v16, %v815_v31 }
 0x6ae   :  { %6224 = vpow2.f32 %v820_v26 }
 0x6af   :  { %v826_v35 = vmul.f32 1.442695, %v819_v32 }
 0x6b1   :  { %6226 = vpow2.f32 %v826_v35 }
 0x6b2   :  { %6228 = vpow2.f32 %v822_v33 }
 0x6b7   :  { %v6223_v36 = vpop.eup %6222 }
 0x6b8   :  { %v834_v34 = vsel %vm125_vm1, %v6223_v36, 0.0  ;;  %v6225_v39 = vpop.eup %6224 }
 0x6b9   :  { %835 = vadd.xlane.f32.xlu0 %v834_v34  ;;  %v828_v41 = vsel %vm125_vm1, %v6225_v39, 0.0 }
 0x6bb   :  { %v6227_v40 = vpop.eup %6226 }
 0x6bc   :  { %v837_v42 = vsel %vm125_vm1, %v6227_v40, 0.0  ;;  %v6229_v44 = vpop.eup %6228 }
 0x6bd   :  { %829 = vadd.xlane.f32.xlu0 %v828_v41  ;;  %838 = vadd.xlane.f32.xlu1 %v837_v42  ;;  %v831_v48 = vsel %vm125_vm1, %v6229_v44, 0.0 }
 0x6c1   :  { %832 = vadd.xlane.f32.xlu1 %v831_v48 }
 0x6d2   :  { %915 = vrot.lane.b32.xlu1 %v6873_v29, %s6584_s4 }
 0x6d3   :  { %850 = vrot.lane.b32.xlu0 %v6863_v19, %s6586_s2 }
 0x6d6   :  { %917 = vrot.lane.b32.xlu1 %v6871_v28, %s6584_s4 }
 0x6d7   :  { %911 = vrot.lane.b32.xlu0 %v6873_v29, %s6585_s26 }
 0x6da   :  { %913 = vrot.lane.b32.xlu1 %v6871_v28, %s6585_s26 }
 0x746   :  { %v836_v52 = vpop.xlane.xlu0 %835 }
 0x74a   :  { %v839_v53 = vpop.xlane.xlu1 %838  ;;  %v830_v45 = vpop.xlane.xlu0 %829 }
 0x74b   :  { %6230 = vrcp.f32 %v839_v53 }
 0x74c   :  { %6232 = vrcp.f32 %v830_v45 }
 0x74d   :  { %6234 = vrcp.f32 %v836_v52 }
 0x74e   :  { %v833_v56 = vpop.xlane.xlu1 %832  ;;  %v851_v59 = vpop.permute.xlu0 %850 }
 0x74f   :  { %6236 = vrcp.f32 %v833_v56  ;;  %5645 = vmatprep.subr.bf16.mxu1 %v851_v59 }
 0x750   :  { %5646 = vmatpush3.bf16.msra.mxu1 %v851_v59 }
 0x751   :  { %5647 = vmatprep.subr.bf16.mxu1 %v853_v49 }
 0x752   :  { %v916_v61 = vpop.permute.xlu1 %915  ;;  %v912_v16 = vpop.permute.xlu0 %911 }
 0x753   :  { %v926_v17 = vsel %vm386_vm2, %v916_v61, 0 }
 0x754   :  { %5648 = vmatpush3.bf16.msra.mxu1 %v853_v49 }
 0x755   :  { %5967 = vmatprep.subr.msk.bf16.mxu1 %vm386_vm2, %v916_v61  ;;  %v6231_v58 = vpop.eup %6230 }
 0x756   :  { %v6233_v9 = vpop.eup %6232  ;;  %v847_v3 = vmul.f32 %v6231_v58, %v6227_v40  ;;  %v918_v20 = vpop.permute.xlu1 %917 }
 0x757   :  { %v6235_v7 = vpop.eup %6234  ;;  %v844_v11 = vmul.f32 %v6233_v9, %v6225_v39  ;;  %v929_v21 = vsel %vm386_vm2, %v918_v20, 0 }
 0x758   :  { %v846_v13 = vmul.f32 %v6235_v7, %v6223_v36 }
 0x759   :  { %v6237_v10 = vpop.eup %6236 }
 0x75a   :  { %v845_v12 = vmul.f32 %v6237_v10, %v6229_v44  ;;  %v849_v15 = vpack.c.bf16 %v847_v3, %v846_v13  ;;  %v914_v22 = vpop.permute.xlu1 %913 }
 0x75c   :  { %v848_v14 = vpack.c.bf16 %v845_v12, %v844_v11 }
 0x75e   :  { %5649 = vmatprep.mubr.msk.bf16.mxu1 %vm125_vm1, %v848_v14 }
 0x75f   :  { %5650 = vmatmul.mubr.msk.bf16.vlgmr.msra.gmra.mrb[8].mxu1 %vm125_vm1, %v849_v15 }
 0x760   :  { %5654 = vmatpush3.bf16.xpose.msra.mxu1 %v926_v17  ;;  %5657 = vmatprep.mubr.msk.bf16.mxu1 %vm386_vm2, %v912_v16 }
 0x761   :  { %5968 = vmatprep.subr.msk.bf16.mxu1 %vm386_vm2, %v918_v20 }
 0x768   :  { %5656 = vmatpush3.bf16.xpose.msra.mxu1 %v929_v21 }
 0x76f   :  { %5658 = vmatmul.mubr.msk.bf16.vlgmr.msra.gmra.mrb[12].mxu1 %vm386_vm2, %v914_v22 }
 0x832   :  { %v7028_v23 = vpop.f32.mrb[8].mxu1 }
 0x833   :  { %v7030_v24 = vpop.f32.mrb[9].mxu1 }
 0x834   :  { %v7032_v25 = vpop.f32.mrb[10].mxu1 }
 0x835   :  { %v6025_v26 = vpack.i.bf16 %v7032_v25, %v7028_v23  ;;  %v7036_v27 = vpop.f32.mrb[11].mxu1 }
 0x836   :  { %v6020_v30 = vpack.i.bf16 %v7036_v27, %v7030_v24 }
 0x842   :  { %v5659_v31 = vpop.f32.mrb[12].mxu1 }
 0x843   :  { %v965_v32 = vpop.f32.mrb[13].mxu1  ;;  %v974_v34 = vadd.f32 %v5659_v31, %v6916_v5 }
 0x844   :  { %v966_v33 = vadd.f32 %v965_v32, %v6916_v5  ;;  %v5660_v35 = vpop.f32.mrb[14].mxu1 }
 0x845   :  { %v968_v36 = vpop.f32.mrb[15].mxu1  ;;  %v977_v42 = vadd.f32 %v5660_v35, %v6916_v5  ;;  %v986_v44 = vsel %vm125_vm1, %v974_v34, -inf }
 0x846   :  { %v969_v39 = vadd.f32 %v968_v36, %v6916_v5  ;;  %v980_v40 = vsel %vm125_vm1, %v966_v33, -inf }
 0x847   :  { %981 = vmax.xlane.f32.xlu0 %v980_v40  ;;  %v989_v48 = vsel %vm125_vm1, %v977_v42, -inf }
 0x848   :  { %v983_v41 = vsel %vm125_vm1, %v969_v39, -inf }
 0x849   :  { %984 = vmax.xlane.f32.xlu1 %v983_v41 }
 0x84b   :  { %987 = vmax.xlane.f32.xlu0 %v986_v44 }
 0x84f   :  { %990 = vmax.xlane.f32.xlu0 %v989_v48 }
 0x85a   :  { %1028 = vrot.lane.b32.xlu1 %v6871_v28, %s6586_s2 }
 0x8d4   :  { %v982_v49 = vpop.xlane.xlu0 %981 }
 0x8d5   :  { %v992_v52 = vsub.f32 %v966_v33, %v982_v49 }
 0x8d6   :  { %v985_v53 = vpop.xlane.xlu1 %984 }
 0x8d7   :  { %v996_v59 = vmul.f32 1.442695, %v992_v52  ;;  %v993_v61 = vsub.f32 %v969_v39, %v985_v53 }
 0x8d8   :  { %v988_v45 = vpop.xlane.xlu0 %987 }
 0x8d9   :  { %v994_v56 = vsub.f32 %v974_v34, %v988_v45  ;;  %v998_v10 = vmul.f32 1.442695, %v993_v61 }
 0x8da   :  { %v1029_v21 = vpop.permute.xlu1 %1028 }
 0x8db   :  { %v1000_v58 = vmul.f32 1.442695, %v994_v56 }
 0x8dc   :  { %v991_v9 = vpop.xlane.xlu0 %990 }
 0x8dd   :  { %6238 = vpow2.f32 %v1000_v58  ;;  %v995_v7 = vsub.f32 %v977_v42, %v991_v9 }
 0x8de   :  { %6240 = vpow2.f32 %v996_v59 }
 0x8df   :  { %v1002_v3 = vmul.f32 1.442695, %v995_v7 }
 0x8e1   :  { %6242 = vpow2.f32 %v1002_v3 }
 0x8e2   :  { %6244 = vpow2.f32 %v998_v10 }
 0x8e7   :  { %v6239_v11 = vpop.eup %6238 }
 0x8e8   :  { %v1010_v12 = vsel %vm125_vm1, %v6239_v11, 0.0  ;;  %v6241_v13 = vpop.eup %6240 }
 0x8e9   :  { %1011 = vadd.xlane.f32.xlu0 %v1010_v12  ;;  %v1004_v15 = vsel %vm125_vm1, %v6241_v13, 0.0 }
 0x8eb   :  { %v6243_v14 = vpop.eup %6242 }
 0x8ec   :  { %v1013_v16 = vsel %vm125_vm1, %v6243_v14, 0.0  ;;  %v6245_v17 = vpop.eup %6244 }
 0x8ed   :  { %1005 = vadd.xlane.f32.xlu0 %v1004_v15  ;;  %1014 = vadd.xlane.f32.xlu1 %v1013_v16  ;;  %v1007_v20 = vsel %vm125_vm1, %v6245_v17, 0.0 }
 0x8f1   :  { %1008 = vadd.xlane.f32.xlu1 %v1007_v20 }
 0x902   :  { %1091 = vrot.lane.b32.xlu1 %v6863_v19, %s6587_s9 }
 0x903   :  { %1026 = vrot.lane.b32.xlu0 %v6873_v29, %s6586_s2 }
 0x906   :  { %1093 = vrot.lane.b32.xlu1 %v6861_v18, %s6587_s9 }
 0x907   :  { %1087 = vrot.lane.b32.xlu0 %v6863_v19, %s8326_s27 }
 0x90a   :  { %1089 = vrot.lane.b32.xlu1 %v6861_v18, %s8326_s27 }
 0x976   :  { %v1012_v22 = vpop.xlane.xlu0 %1011 }
 0x97a   :  { %v1015_v31 = vpop.xlane.xlu1 %1014  ;;  %v1006_v32 = vpop.xlane.xlu0 %1005 }
 0x97b   :  { %6246 = vrcp.f32 %v1015_v31 }
 0x97c   :  { %6248 = vrcp.f32 %v1006_v32 }
 0x97d   :  { %6250 = vrcp.f32 %v1012_v22 }
 0x97e   :  { %v1009_v33 = vpop.xlane.xlu1 %1008  ;;  %v1027_v35 = vpop.permute.xlu0 %1026 }
 0x97f   :  { %6252 = vrcp.f32 %v1009_v33  ;;  %5661 = vmatprep.subr.bf16.mxu0 %v1027_v35 }
 0x980   :  { %5662 = vmatpush3.bf16.msra.mxu0 %v1027_v35 }
 0x981   :  { %5663 = vmatprep.subr.bf16.mxu0 %v1029_v21 }
 0x982   :  { %v1092_v36 = vpop.permute.xlu1 %1091  ;;  %v1088_v45 = vpop.permute.xlu0 %1087 }
 0x983   :  { %v1102_v56 = vsel %vm386_vm2, %v1092_v36, 0 }
 0x984   :  { %5664 = vmatpush3.bf16.msra.mxu0 %v1029_v21 }
 0x985   :  { %5969 = vmatprep.subr.msk.bf16.mxu0 %vm386_vm2, %v1092_v36  ;;  %v6247_v34 = vpop.eup %6246 }
 0x986   :  { %v6249_v39 = vpop.eup %6248  ;;  %v1023_v42 = vmul.f32 %v6247_v34, %v6243_v14  ;;  %v1094_v59 = vpop.permute.xlu1 %1093 }
 0x987   :  { %v6251_v40 = vpop.eup %6250  ;;  %v1020_v44 = vmul.f32 %v6249_v39, %v6241_v13  ;;  %v1105_v61 = vsel %vm386_vm2, %v1094_v59, 0 }
 0x988   :  { %v1022_v49 = vmul.f32 %v6251_v40, %v6239_v11 }
 0x989   :  { %v6253_v41 = vpop.eup %6252 }
 0x98a   :  { %v1021_v48 = vmul.f32 %v6253_v41, %v6245_v17  ;;  %v1025_v53 = vpack.c.bf16 %v1023_v42, %v1022_v49  ;;  %v1090_v58 = vpop.permute.xlu1 %1089 }
 0x98c   :  { %v1024_v52 = vpack.c.bf16 %v1021_v48, %v1020_v44 }
 0x98e   :  { %5665 = vmatprep.mubr.msk.bf16.mxu0 %vm125_vm1, %v1024_v52 }
 0x98f   :  { %5666 = vmatmul.mubr.msk.bf16.vlgmr.msra.gmra.mrb[20].mxu0 %vm125_vm1, %v1025_v53 }
 0x990   :  { %5670 = vmatpush3.bf16.xpose.msra.mxu0 %v1102_v56  ;;  %5673 = vmatprep.mubr.msk.bf16.mxu0 %vm386_vm2, %v1088_v45 }
 0x991   :  { %5970 = vmatprep.subr.msk.bf16.mxu0 %vm386_vm2, %v1094_v59 }
 0x998   :  { %5672 = vmatpush3.bf16.xpose.msra.mxu0 %v1105_v61 }
 0x99f   :  { %5674 = vmatmul.mubr.msk.bf16.vlgmr.msra.gmra.mrb[24].mxu0 %vm386_vm2, %v1090_v58 }
 0xa62   :  { %v7072_v9 = vpop.f32.mrb[20].mxu0 }
 0xa63   :  { %v7074_v7 = vpop.f32.mrb[21].mxu0 }
 0xa64   :  { %v7076_v10 = vpop.f32.mrb[22].mxu0 }
 0xa65   :  { %v7080_v11 = vpop.f32.mrb[23].mxu0 }
 0xa66   :  { %v6050_v12 = vpack.i.bf16 %v7080_v11, %v7074_v7 }
 0xa72   :  { %v5675_v13 = vpop.f32.mrb[24].mxu0 }
 0xa73   :  { %v1141_v14 = vpop.f32.mrb[25].mxu0  ;;  %v1150_v20 = vadd.f32 %v5675_v13, %v6902_v46 }
 0xa74   :  { %v1142_v15 = vadd.f32 %v1141_v14, %v6902_v46  ;;  %v5676_v16 = vpop.f32.mrb[26].mxu0 }
 0xa75   :  { %v1144_v17 = vpop.f32.mrb[27].mxu0  ;;  %v1153_v32 = vadd.f32 %v5676_v16, %v6902_v46  ;;  %v1162_v33 = vsel %vm125_vm1, %v1150_v20, -inf }
 0xa76   :  { %v1145_v21 = vadd.f32 %v1144_v17, %v6902_v46  ;;  %v1156_v22 = vsel %vm125_vm1, %v1142_v15, -inf }
 0xa77   :  { %1157 = vmax.xlane.f32.xlu0 %v1156_v22  ;;  %v1165_v35 = vsel %vm125_vm1, %v1153_v32, -inf }
 0xa78   :  { %v1159_v31 = vsel %vm125_vm1, %v1145_v21, -inf }
 0xa79   :  { %1160 = vmax.xlane.f32.xlu1 %v1159_v31 }
 0xa7b   :  { %1163 = vmax.xlane.f32.xlu0 %v1162_v33 }
 0xa7f   :  { %1166 = vmax.xlane.f32.xlu0 %v1165_v35 }
 0xa8a   :  { %1204 = vrot.lane.b32.xlu1 %v6861_v18, %s8324_s1 }
 0xb04   :  { %v1158_v36 = vpop.xlane.xlu0 %1157 }
 0xb05   :  { %v1168_v34 = vsub.f32 %v1142_v15, %v1158_v36 }
 0xb06   :  { %v1161_v39 = vpop.xlane.xlu1 %1160 }
 0xb07   :  { %v1172_v42 = vmul.f32 1.442695, %v1168_v34  ;;  %v1169_v44 = vsub.f32 %v1145_v21, %v1161_v39 }
 0xb08   :  { %v1164_v40 = vpop.xlane.xlu0 %1163 }
 0xb09   :  { %v1170_v41 = vsub.f32 %v1150_v20, %v1164_v40  ;;  %v1174_v53 = vmul.f32 1.442695, %v1169_v44 }
 0xb0a   :  { %v1205_v17 = vpop.permute.xlu1 %1204 }
 0xb0b   :  { %v1176_v48 = vmul.f32 1.442695, %v1170_v41 }
 0xb0c   :  { %v1167_v49 = vpop.xlane.xlu0 %1166 }
 0xb0d   :  { %6254 = vpow2.f32 %v1176_v48  ;;  %v1171_v52 = vsub.f32 %v1153_v32, %v1167_v49 }
 0xb0e   :  { %6256 = vpow2.f32 %v1172_v42 }
 0xb0f   :  { %v1178_v45 = vmul.f32 1.442695, %v1171_v52 }
 0xb11   :  { %6258 = vpow2.f32 %v1178_v45 }
 0xb12   :  { %6260 = vpow2.f32 %v1174_v53 }
 0xb17   :  { %v6255_v56 = vpop.eup %6254 }
 0xb18   :  { %v1186_v59 = vsel %vm125_vm1, %v6255_v56, 0.0  ;;  %v6257_v61 = vpop.eup %6256 }
 0xb19   :  { %1187 = vadd.xlane.f32.xlu0 %v1186_v59  ;;  %v1180_v13 = vsel %vm125_vm1, %v6257_v61, 0.0 }
 0xb1b   :  { %v6259_v58 = vpop.eup %6258 }
 0xb1c   :  { %v1189_v14 = vsel %vm125_vm1, %v6259_v58, 0.0  ;;  %v6261_v15 = vpop.eup %6260 }
 0xb1d   :  { %1181 = vadd.xlane.f32.xlu0 %v1180_v13  ;;  %1190 = vadd.xlane.f32.xlu1 %v1189_v14  ;;  %v1183_v16 = vsel %vm125_vm1, %v6261_v15, 0.0 }
 0xb21   :  { %1184 = vadd.xlane.f32.xlu1 %v1183_v16 }
 0xb32   :  { %1267 = vrot.lane.b32.xlu1 %v6873_v29, %s6587_s9 }
 0xb33   :  { %1202 = vrot.lane.b32.xlu0 %v6863_v19, %s8324_s1 }
 0xb36   :  { %1269 = vrot.lane.b32.xlu1 %v6871_v28, %s6587_s9 }
 0xb37   :  { %1263 = vrot.lane.b32.xlu0 %v6873_v29, %s8326_s27 }
 0xb3a   :  { %1265 = vrot.lane.b32.xlu1 %v6871_v28, %s8326_s27 }
 0xba6   :  { %v1188_v20 = vpop.xlane.xlu0 %1187 }
 0xbaa   :  { %v1191_v21 = vpop.xlane.xlu1 %1190  ;;  %v1182_v22 = vpop.xlane.xlu0 %1181 }
 0xbab   :  { %6262 = vrcp.f32 %v1191_v21 }
 0xbac   :  { %6264 = vrcp.f32 %v1182_v22 }
 0xbad   :  { %6266 = vrcp.f32 %v1188_v20 }
 0xbae   :  { %v1185_v31 = vpop.xlane.xlu1 %1184  ;;  %v1203_v32 = vpop.permute.xlu0 %1202 }
 0xbaf   :  { %6268 = vrcp.f32 %v1185_v31  ;;  %5677 = vmatprep.subr.bf16.mxu1 %v1203_v32 }
 0xbb0   :  { %5678 = vmatpush3.bf16.msra.mxu1 %v1203_v32 }
 0xbb1   :  { %5679 = vmatprep.subr.bf16.mxu1 %v1205_v17 }
 0xbb2   :  { %v1268_v33 = vpop.permute.xlu1 %1267  ;;  %v1264_v52 = vpop.permute.xlu0 %1263 }
 0xbb3   :  { %v1278_v53 = vsel %vm386_vm2, %v1268_v33, 0 }
 0xbb4   :  { %5680 = vmatpush3.bf16.msra.mxu1 %v1205_v17 }
 0xbb5   :  { %5971 = vmatprep.subr.msk.bf16.mxu1 %vm386_vm2, %v1268_v33  ;;  %v6263_v35 = vpop.eup %6262 }
 0xbb6   :  { %v6265_v36 = vpop.eup %6264  ;;  %v1199_v40 = vmul.f32 %v6263_v35, %v6259_v58  ;;  %v1270_v45 = vpop.permute.xlu1 %1269 }
 0xbb7   :  { %v6267_v34 = vpop.eup %6266  ;;  %v1196_v41 = vmul.f32 %v6265_v36, %v6257_v61  ;;  %v1281_v59 = vsel %vm386_vm2, %v1270_v45, 0 }
 0xbb8   :  { %v1198_v44 = vmul.f32 %v6267_v34, %v6255_v56 }
 0xbb9   :  { %v6269_v39 = vpop.eup %6268 }
 0xbba   :  { %v1197_v42 = vmul.f32 %v6269_v39, %v6261_v15  ;;  %v1201_v49 = vpack.c.bf16 %v1199_v40, %v1198_v44  ;;  %v1266_v61 = vpop.permute.xlu1 %1265 }
 0xbbc   :  { %v1200_v48 = vpack.c.bf16 %v1197_v42, %v1196_v41 }
 0xbbe   :  { %5681 = vmatprep.mubr.msk.bf16.mxu1 %vm125_vm1, %v1200_v48 }
 0xbbf   :  { %5682 = vmatmul.mubr.msk.bf16.vlgmr.msra.gmra.mrb[16].mxu1 %vm125_vm1, %v1201_v49 }
 0xbc0   :  { %5686 = vmatpush3.bf16.xpose.msra.mxu1 %v1278_v53  ;;  %5689 = vmatprep.mubr.msk.bf16.mxu1 %vm386_vm2, %v1264_v52 }
 0xbc1   :  { %5972 = vmatprep.subr.msk.bf16.mxu1 %vm386_vm2, %v1270_v45 }
 0xbc8   :  { %5688 = vmatpush3.bf16.xpose.msra.mxu1 %v1281_v59 }
 0xbcf   :  { %5690 = vmatmul.mubr.msk.bf16.vlgmr.msra.gmra.mrb[20].mxu1 %vm386_vm2, %v1266_v61 }
 0xc92   :  { %v7116_v56 = vpop.f32.mrb[16].mxu1 }
 0xc93   :  { %v7118_v58 = vpop.f32.mrb[17].mxu1 }
 0xc94   :  { %v7120_v13 = vpop.f32.mrb[18].mxu1 }
 0xc95   :  { %v6035_v14 = vpack.i.bf16 %v7120_v13, %v7116_v56  ;;  %v7124_v15 = vpop.f32.mrb[19].mxu1 }
 0xc96   :  { %v6030_v16 = vpack.i.bf16 %v7124_v15, %v7118_v58 }
 0xca2   :  { %v5691_v17 = vpop.f32.mrb[20].mxu1 }
 0xca3   :  { %v1317_v20 = vpop.f32.mrb[21].mxu1  ;;  %v1326_v32 = vadd.f32 %v5691_v17, %v6916_v5 }
 0xca4   :  { %v1318_v21 = vadd.f32 %v1317_v20, %v6916_v5  ;;  %v5692_v22 = vpop.f32.mrb[22].mxu1 }
 0xca5   :  { %v1320_v31 = vpop.f32.mrb[23].mxu1  ;;  %v1329_v34 = vadd.f32 %v5692_v22, %v6916_v5  ;;  %v1338_v39 = vsel %vm125_vm1, %v1326_v32, -inf }
 0xca6   :  { %v1321_v33 = vadd.f32 %v1320_v31, %v6916_v5  ;;  %v1332_v35 = vsel %vm125_vm1, %v1318_v21, -inf }
 0xca7   :  { %1333 = vmax.xlane.f32.xlu0 %v1332_v35  ;;  %v1341_v40 = vsel %vm125_vm1, %v1329_v34, -inf }
 0xca8   :  { %v1335_v36 = vsel %vm125_vm1, %v1321_v33, -inf }
 0xca9   :  { %1336 = vmax.xlane.f32.xlu1 %v1335_v36 }
 0xcab   :  { %1339 = vmax.xlane.f32.xlu0 %v1338_v39 }
 0xcaf   :  { %1342 = vmax.xlane.f32.xlu0 %v1341_v40 }
 0xcba   :  { %1380 = vrot.lane.b32.xlu1 %v6871_v28, %s8324_s1 }
 0xd34   :  { %v1334_v41 = vpop.xlane.xlu0 %1333 }
 0xd35   :  { %v1344_v42 = vsub.f32 %v1318_v21, %v1334_v41 }
 0xd36   :  { %v1337_v44 = vpop.xlane.xlu1 %1336 }
 0xd37   :  { %v1348_v52 = vmul.f32 1.442695, %v1344_v42  ;;  %v1345_v53 = vsub.f32 %v1321_v33, %v1337_v44 }
 0xd38   :  { %v1340_v48 = vpop.xlane.xlu0 %1339 }
 0xd39   :  { %v1346_v49 = vsub.f32 %v1326_v32, %v1340_v48  ;;  %v1350_v17 = vmul.f32 1.442695, %v1345_v53 }
 0xd3a   :  { %v1381_v39 = vpop.permute.xlu1 %1380 }
 0xd3b   :  { %v1352_v45 = vmul.f32 1.442695, %v1346_v49 }
 0xd3c   :  { %v1343_v59 = vpop.xlane.xlu0 %1342 }
 0xd3d   :  { %6270 = vpow2.f32 %v1352_v45  ;;  %v1347_v61 = vsub.f32 %v1329_v34, %v1343_v59 }
 0xd3e   :  { %6272 = vpow2.f32 %v1348_v52 }
 0xd3f   :  { %v1354_v20 = vmul.f32 1.442695, %v1347_v61 }
 0xd41   :  { %6274 = vpow2.f32 %v1354_v20 }
 0xd42   :  { %6276 = vpow2.f32 %v1350_v17 }
 0xd47   :  { %v6271_v22 = vpop.eup %6270 }
 0xd48   :  { %v1362_v31 = vsel %vm125_vm1, %v6271_v22, 0.0  ;;  %v6273_v35 = vpop.eup %6272 }
 0xd49   :  { %1363 = vadd.xlane.f32.xlu0 %v1362_v31  ;;  %v1356_v36 = vsel %vm125_vm1, %v6273_v35, 0.0 }
 0xd4b   :  { %v6275_v21 = vpop.eup %6274 }
 0xd4c   :  { %v1365_v32 = vsel %vm125_vm1, %v6275_v21, 0.0  ;;  %v6277_v33 = vpop.eup %6276 }
 0xd4d   :  { %1357 = vadd.xlane.f32.xlu0 %v1356_v36  ;;  %1366 = vadd.xlane.f32.xlu1 %v1365_v32  ;;  %v1359_v34 = vsel %vm125_vm1, %v6277_v33, 0.0 }
 0xd51   :  { %1360 = vadd.xlane.f32.xlu1 %v1359_v34 }
 0xd62   :  { %1443 = vrot.lane.b32.xlu1 %v6863_v19, %s8322_s5 }
 0xd63   :  { %1378 = vrot.lane.b32.xlu0 %v6873_v29, %s8324_s1 }
 0xd66   :  { %1445 = vrot.lane.b32.xlu1 %v6861_v18, %s8322_s5 }
 0xd67   :  { %1439 = vrot.lane.b32.xlu0 %v6863_v19, %s8314_s28 }
 0xd6a   :  { %1441 = vrot.lane.b32.xlu1 %v6861_v18, %s8314_s28 }
 0xdd6   :  { %v1364_v40 = vpop.xlane.xlu0 %1363 }
 0xdda   :  { %v1367_v41 = vpop.xlane.xlu1 %1366  ;;  %v1358_v42 = vpop.xlane.xlu0 %1357 }
 0xddb   :  { %6278 = vrcp.f32 %v1367_v41 }
 0xddc   :  { %6280 = vrcp.f32 %v1358_v42 }
 0xddd   :  { %6282 = vrcp.f32 %v1364_v40 }
 0xdde   :  { %v1361_v44 = vpop.xlane.xlu1 %1360  ;;  %v1379_v48 = vpop.permute.xlu0 %1378 }
 0xddf   :  { %6284 = vrcp.f32 %v1361_v44  ;;  %5693 = vmatprep.subr.bf16.mxu0 %v1379_v48 }
 0xde0   :  { %5694 = vmatpush3.bf16.msra.mxu0 %v1379_v48 }
 0xde1   :  { %5695 = vmatprep.subr.bf16.mxu0 %v1381_v39 }
 0xde2   :  { %v1444_v49 = vpop.permute.xlu1 %1443  ;;  %v1440_v34 = vpop.permute.xlu0 %1439 }
 0xde3   :  { %v1454_v40 = vsel %vm386_vm2, %v1444_v49, 0 }
 0xde4   :  { %5696 = vmatpush3.bf16.msra.mxu0 %v1381_v39 }
 0xde5   :  { %5973 = vmatprep.subr.msk.bf16.mxu0 %vm386_vm2, %v1444_v49  ;;  %v6279_v52 = vpop.eup %6278 }
 0xde6   :  { %v6281_v53 = vpop.eup %6280  ;;  %v1375_v61 = vmul.f32 %v6279_v52, %v6275_v21  ;;  %v1446_v39 = vpop.permute.xlu1 %1445 }
 0xde7   :  { %v6283_v45 = vpop.eup %6282  ;;  %v1372_v17 = vmul.f32 %v6281_v53, %v6273_v35  ;;  %v1457_v21 = vsel %vm386_vm2, %v1446_v39, 0 }
 0xde8   :  { %v1374_v31 = vmul.f32 %v6283_v45, %v6271_v22 }
 0xde9   :  { %v6285_v59 = vpop.eup %6284 }
 0xdea   :  { %v1373_v20 = vmul.f32 %v6285_v59, %v6277_v33  ;;  %v1377_v32 = vpack.c.bf16 %v1375_v61, %v1374_v31  ;;  %v1442_v35 = vpop.permute.xlu1 %1441 }
 0xdec   :  { %v1376_v36 = vpack.c.bf16 %v1373_v20, %v1372_v17 }
 0xdee   :  { %5697 = vmatprep.mubr.msk.bf16.mxu0 %vm125_vm1, %v1376_v36 }
 0xdef   :  { %5698 = vmatmul.mubr.msk.bf16.vlgmr.msra.gmra.mrb[28].mxu0 %vm125_vm1, %v1377_v32 }
 0xdf0   :  { %5702 = vmatpush3.bf16.xpose.msra.mxu0 %v1454_v40  ;;  %5705 = vmatprep.mubr.msk.bf16.mxu0 %vm386_vm2, %v1440_v34 }
 0xdf1   :  { %5974 = vmatprep.subr.msk.bf16.mxu0 %vm386_vm2, %v1446_v39 }
 0xdf8   :  { %5704 = vmatpush3.bf16.xpose.msra.mxu0 %v1457_v21 }
 0xdff   :  { %5706 = vmatmul.mubr.msk.bf16.vlgmr.msra.gmra.mrb[32].mxu0 %vm386_vm2, %v1442_v35 }
 0xec2   :  { %v7160_v22 = vpop.f32.mrb[28].mxu0 }
 0xec3   :  { %v7162_v33 = vpop.f32.mrb[29].mxu0 }
 0xec4   :  { %v7164_v41 = vpop.f32.mrb[30].mxu0 }
 0xec5   :  { %v7168_v44 = vpop.f32.mrb[31].mxu0 }
 0xec6   :  { %v6060_v48 = vpack.i.bf16 %v7168_v44, %v7162_v33 }
 0xed2   :  { %v5707_v49 = vpop.f32.mrb[32].mxu0 }
 0xed3   :  { %v1493_v52 = vpop.f32.mrb[33].mxu0  ;;  %v1502_v61 = vadd.f32 %v5707_v49, %v6902_v46 }
 0xed4   :  { %v1494_v53 = vadd.f32 %v1493_v52, %v6902_v46  ;;  %v5708_v45 = vpop.f32.mrb[34].mxu0 }
 0xed5   :  { %v1496_v59 = vpop.f32.mrb[35].mxu0  ;;  %v1505_v36 = vadd.f32 %v5708_v45, %v6902_v46  ;;  %v1514_v32 = vsel %vm125_vm1, %v1502_v61, -inf }
 0xed6   :  { %v1497_v17 = vadd.f32 %v1496_v59, %v6902_v46  ;;  %v1508_v20 = vsel %vm125_vm1, %v1494_v53, -inf }
 0xed7   :  { %1509 = vmax.xlane.f32.xlu0 %v1508_v20  ;;  %v1517_v34 = vsel %vm125_vm1, %v1505_v36, -inf }
 0xed8   :  { %v1511_v31 = vsel %vm125_vm1, %v1497_v17, -inf }
 0xed9   :  { %1512 = vmax.xlane.f32.xlu1 %v1511_v31 }
 0xedb   :  { %1515 = vmax.xlane.f32.xlu0 %v1514_v32 }
 0xedf   :  { %1518 = vmax.xlane.f32.xlu0 %v1517_v34 }
 0xeea   :  { %1556 = vrot.lane.b32.xlu1 %v6861_v18, %s8312_s6 }
 0xf64   :  { %v1510_v40 = vpop.xlane.xlu0 %1509 }
 0xf65   :  { %v1520_v39 = vsub.f32 %v1494_v53, %v1510_v40 }
 0xf66   :  { %v1513_v21 = vpop.xlane.xlu1 %1512 }
 0xf67   :  { %v1524_v52 = vmul.f32 1.442695, %v1520_v39  ;;  %v1521_v59 = vsub.f32 %v1497_v17, %v1513_v21 }
 0xf68   :  { %v1516_v35 = vpop.xlane.xlu0 %1515 }
 0xf69   :  { %v1522_v49 = vsub.f32 %v1502_v61, %v1516_v35  ;;  %v1526_v32 = vmul.f32 1.442695, %v1521_v59 }
 0xf6b   :  { %v1528_v20 = vmul.f32 1.442695, %v1522_v49 }
 0xf6c   :  { %v1519_v31 = vpop.xlane.xlu0 %1518 }
 0xf6d   :  { %6286 = vpow2.f32 %v1528_v20  ;;  %v1523_v45 = vsub.f32 %v1505_v36, %v1519_v31 }
 0xf6e   :  { %6288 = vpow2.f32 %v1524_v52 }
 0xf6f   :  { %v1530_v42 = vmul.f32 1.442695, %v1523_v45 }
 0xf71   :  { %6290 = vpow2.f32 %v1530_v42 }
 0xf72   :  { %6292 = vpow2.f32 %v1526_v32 }
 0xf77   :  { %v6287_v34 = vpop.eup %6286 }
 0xf78   :  { %v1538_v3 = vsel %vm125_vm1, %v6287_v34, 0.0  ;;  %v6289_v18 = vpop.eup %6288 }
 0xf79   :  { %1539 = vadd.xlane.f32.xlu0 %v1538_v3  ;;  %v1532_v40 = vsel %vm125_vm1, %v6289_v18, 0.0  ;;  %v1557_v3 = vpop.permute.xlu1 %1556 }
 0xf7b   :  { %v6291_v53 = vpop.eup %6290 }
 0xf7c   :  { %v1541_v61 = vsel %vm125_vm1, %v6291_v53, 0.0  ;;  %v6293_v17 = vpop.eup %6292 }
 0xf7d   :  { %1533 = vadd.xlane.f32.xlu0 %v1532_v40  ;;  %1542 = vadd.xlane.f32.xlu1 %v1541_v61  ;;  %v1535_v36 = vsel %vm125_vm1, %v6293_v17, 0.0 }
 0xf81   :  { %1536 = vadd.xlane.f32.xlu1 %v1535_v36 }
 0xf92   :  { %1619 = vrot.lane.b32.xlu1 %v6873_v29, %s8322_s5 }
 0xf93   :  { %1554 = vrot.lane.b32.xlu0 %v6863_v19, %s8312_s6 }
 0xf96   :  { %1621 = vrot.lane.b32.xlu1 %v6871_v28, %s8322_s5 }
 0xf97   :  { %1615 = vrot.lane.b32.xlu0 %v6873_v29, %s8314_s28 }
 0xf9a   :  { %1617 = vrot.lane.b32.xlu1 %v6871_v28, %s8314_s28  ;;  %s8349_s28 = sld [smem:[#allocation15_spill]] }
0x1006   :  { %v1540_v42 = vpop.xlane.xlu0 %1539 }
0x100a   :  { %v1543_v39 = vpop.xlane.xlu1 %1542  ;;  %v1534_v21 = vpop.xlane.xlu0 %1533 }
0x100b   :  { %6294 = vrcp.f32 %v1543_v39 }
0x100c   :  { %6296 = vrcp.f32 %v1534_v21 }
0x100d   :  { %6298 = vrcp.f32 %v1540_v42 }
0x100e   :  { %v1537_v35 = vpop.xlane.xlu1 %1536  ;;  %v1555_v49 = vpop.permute.xlu0 %1554 }
0x100f   :  { %6300 = vrcp.f32 %v1537_v35  ;;  %5709 = vmatprep.subr.bf16.mxu1 %v1555_v49 }
0x1010   :  { %5710 = vmatpush3.bf16.msra.mxu1 %v1555_v49 }
0x1011   :  { %5711 = vmatprep.subr.bf16.mxu1 %v1557_v3 }
0x1012   :  { %v1620_v19 = vpop.permute.xlu1 %1619  ;;  %v1616_v39 = vpop.permute.xlu0 %1615 }
0x1013   :  { %v1630_v21 = vsel %vm386_vm2, %v1620_v19, 0 }
0x1014   :  { %5712 = vmatpush3.bf16.msra.mxu1 %v1557_v3 }
0x1015   :  { %5975 = vmatprep.subr.msk.bf16.mxu1 %vm386_vm2, %v1620_v19  ;;  %v6295_v52 = vpop.eup %6294 }
0x1016   :  { %v6297_v59 = vpop.eup %6296  ;;  %v1551_v45 = vmul.f32 %v6295_v52, %v6291_v53  ;;  %v1622_v3 = vpop.permute.xlu1 %1621 }
0x1017   :  { %v6299_v20 = vpop.eup %6298  ;;  %v1548_v32 = vmul.f32 %v6297_v59, %v6289_v18  ;;  %v1633_v53 = vsel %vm386_vm2, %v1622_v3, 0 }
0x1018   :  { %v1550_v61 = vmul.f32 %v6299_v20, %v6287_v34 }
0x1019   :  { %v6301_v31 = vpop.eup %6300 }
0x101a   :  { %v1549_v40 = vmul.f32 %v6301_v31, %v6293_v17  ;;  %v1553_v42 = vpack.c.bf16 %v1551_v45, %v1550_v61  ;;  %v1618_v18 = vpop.permute.xlu1 %1617 }
0x101c   :  { %v1552_v36 = vpack.c.bf16 %v1549_v40, %v1548_v32 }
0x101e   :  { %5713 = vmatprep.mubr.msk.bf16.mxu1 %vm125_vm1, %v1552_v36 }
0x101f   :  { %5714 = vmatmul.mubr.msk.bf16.vlgmr.msra.gmra.mrb[24].mxu1 %vm125_vm1, %v1553_v42 }
0x1020   :  { %5718 = vmatpush3.bf16.xpose.msra.mxu1 %v1630_v21  ;;  %5721 = vmatprep.mubr.msk.bf16.mxu1 %vm386_vm2, %v1616_v39 }
0x1021   :  { %5976 = vmatprep.subr.msk.bf16.mxu1 %vm386_vm2, %v1622_v3 }
0x1028   :  { %5720 = vmatpush3.bf16.xpose.msra.mxu1 %v1633_v53 }
0x102f   :  { %5722 = vmatmul.mubr.msk.bf16.vlgmr.msra.gmra.mrb[28].mxu1 %vm386_vm2, %v1618_v18 }
0x10f2   :  { %v5715_v34 = vpop.f32.mrb[24].mxu1 }
0x10f3   :  { %v1600_v17 = vpop.f32.mrb[25].mxu1 }
0x10f4   :  { %v5716_v35 = vpop.f32.mrb[26].mxu1 }
0x10f5   :  { %v6045_v49 = vpack.i.bf16 %v5716_v35, %v5715_v34  ;;  %v1603_v52 = vpop.f32.mrb[27].mxu1 }
0x10f6   :  { %v6040_v59 = vpack.i.bf16 %v1603_v52, %v1600_v17 }
0x1102   :  { %v5723_v20 = vpop.f32.mrb[28].mxu1 }
0x1103   :  { %v1669_v19 = vpop.f32.mrb[29].mxu1  ;;  %v1678_v40 = vadd.f32 %v5723_v20, %v6916_v5 }
0x1104   :  { %v1670_v31 = vadd.f32 %v1669_v19, %v6916_v5  ;;  %v5724_v45 = vpop.f32.mrb[30].mxu1 }
0x1105   :  { %v1672_v32 = vpop.f32.mrb[31].mxu1  ;;  %v1681_v39 = vadd.f32 %v5724_v45, %v6916_v5  ;;  %v1690_v21 = vsel %vm125_vm1, %v1678_v40, -inf }
0x1106   :  { %v1673_v61 = vadd.f32 %v1672_v32, %v6916_v5  ;;  %v1684_v36 = vsel %vm125_vm1, %v1670_v31, -inf }
0x1107   :  { %1685 = vmax.xlane.f32.xlu0 %v1684_v36  ;;  %v1693_v3 = vsel %vm125_vm1, %v1681_v39, -inf }
0x1108   :  { %v1687_v42 = vsel %vm125_vm1, %v1673_v61, -inf }
0x1109   :  { %1688 = vmax.xlane.f32.xlu1 %v1687_v42 }
0x110b   :  { %1691 = vmax.xlane.f32.xlu0 %v1690_v21 }
0x110f   :  { %1694 = vmax.xlane.f32.xlu0 %v1693_v3 }
0x1194   :  { %v1686_v53 = vpop.xlane.xlu0 %1685 }
0x1195   :  { %v1696_v18 = vsub.f32 %v1670_v31, %v1686_v53 }
0x1196   :  { %v1689_v34 = vpop.xlane.xlu1 %1688 }
0x1197   :  { %v1700_v52 = vmul.f32 1.442695, %v1696_v18  ;;  %v1697_v20 = vsub.f32 %v1673_v61, %v1689_v34 }
0x1198   :  { %v1692_v17 = vpop.xlane.xlu0 %1691 }
0x1199   :  { %v1698_v35 = vsub.f32 %v1678_v40, %v1692_v17  ;;  %v1702_v42 = vmul.f32 1.442695, %v1697_v20 }
0x119b   :  { %v1704_v19 = vmul.f32 1.442695, %v1698_v35 }
0x119c   :  { %v1695_v32 = vpop.xlane.xlu0 %1694 }
0x119d   :  { %6302 = vpow2.f32 %v1704_v19  ;;  %v1699_v36 = vsub.f32 %v1681_v39, %v1695_v32 }
0x119e   :  { %6304 = vpow2.f32 %v1700_v52 }
0x119f   :  { %v1706_v45 = vmul.f32 1.442695, %v1699_v36 }
0x11a1   :  { %6306 = vpow2.f32 %v1706_v45 }
0x11a2   :  { %6308 = vpow2.f32 %v1702_v42 }
0x11a7   :  { %v7212_v21 = vpop.eup %6302 }
0x11a8   :  { %v1714_v3 = vsel %vm125_vm1, %v7212_v21, 0.0  ;;  %v6305_v31 = vpop.eup %6304 }
0x11a9   :  { %1715 = vadd.xlane.f32.xlu0 %v1714_v3  ;;  %v1708_v40 = vsel %vm125_vm1, %v6305_v31, 0.0 }
0x11ab   :  { %v6307_v53 = vpop.eup %6306 }
0x11ac   :  { %v1717_v61 = vsel %vm125_vm1, %v6307_v53, 0.0  ;;  %v6309_v18 = vpop.eup %6308 }
0x11ad   :  { %1709 = vadd.xlane.f32.xlu0 %v1708_v40  ;;  %1718 = vadd.xlane.f32.xlu1 %v1717_v61  ;;  %v1711_v39 = vsel %vm125_vm1, %v6309_v18, 0.0 }
0x11b1   :  { %1712 = vadd.xlane.f32.xlu1 %v1711_v39 }
0x11c2   :  { %1732 = vrot.lane.b32.xlu1 %v6871_v28, %s8312_s6  ;;  %v8347_v28 = vpack.i.bf16 %v7076_v10, %v7072_v9 }
0x11c3   :  { %1730 = vrot.lane.b32.xlu0 %v6873_v29, %s8312_s6  ;;  %v8348_v29 = vpack.i.bf16 %v7164_v41, %v7160_v22 }
0x11c6   :  { %6021 = vrot.lane.b32.xlu1 %v6020_v30, %s8320_s0  ;;  %v6142_v30 = vld [vmem:[%s8349_s28] sm:$0xff]  }
0x11c7   :  { %6031 = vrot.lane.b32.xlu0 %v6030_v16, %s8316_s29 }
0x11ca   :  { %6026 = vrot.lane.b32.xlu1 %v6025_v26, %s8320_s0 }
0x11cb   :  { %6041 = vrot.lane.b32.xlu0 %v6040_v59, %s8318_s3 }
0x11ce   :  { %6036 = vrot.lane.b32.xlu1 %v6035_v14, %s8316_s29 }
0x11cf   :  { %6051 = vrot.lane.b32.xlu0 %v6050_v12, %s8320_s0 }
0x11d2   :  { %6046 = vrot.lane.b32.xlu1 %v6045_v49, %s8318_s3 }
0x11d3   :  { %6061 = vrot.lane.b32.xlu0 %v6060_v48, %s8316_s29 }
0x11d6   :  { %6056 = vrot.lane.b32.xlu1 %v8347_v28, %s8320_s0  ;;  %s8358_s0 = smov 24  }
0x11da   :  { %6066 = vrot.lane.b32.xlu1 %v8348_v29, %s8316_s29  ;;  %s8350_s29 = sld [smem:[#allocation16_spill]] }
0x1236   :  { %v1716_v23 = vpop.xlane.xlu0 %1715 }
0x123a   :  { %v1719_v24 = vpop.xlane.xlu1 %1718  ;;  %v1710_v25 = vpop.xlane.xlu0 %1709 }
0x123b   :  { %6310 = vrcp.f32 %v1719_v24 }
0x123c   :  { %6312 = vrcp.f32 %v1710_v25 }
0x123d   :  { %6314 = vrcp.f32 %v1716_v23 }
0x123e   :  { %v1713_v26 = vpop.xlane.xlu1 %1712  ;;  %v1731_v27 = vpop.permute.xlu0 %1730 }
0x123f   :  { %6316 = vrcp.f32 %v1713_v26  ;;  %5725 = vmatprep.subr.bf16.mxu0 %v1731_v27 }
0x1240   :  { %5726 = vmatpush3.bf16.msra.mxu0 %v1731_v27 }
0x1242   :  { %v1733_v9 = vpop.permute.xlu1 %1732  ;;  %v6032_v7 = vpop.permute.xlu0 %6031 }
0x1243   :  { %5727 = vmatprep.subr.bf16.mxu0 %v1733_v9  ;;  %v6034_v16 = vunpack.i.h.bf16 %v6032_v7  ;;  %v6033_v22 = vunpack.i.l.bf16 %v6032_v7 }
0x1244   :  { %5728 = vmatpush3.bf16.msra.mxu0 %v1733_v9 }
0x1245   :  { %v6311_v10 = vpop.eup %6310  ;;  %5733 = vmatprep.subr.bf16.mxu0 %v6142_v30 }
0x1246   :  { %v6022_v11 = vpop.permute.xlu1 %6021  ;;  %v6042_v12 = vpop.permute.xlu0 %6041  ;;  %v1727_v15 = vmul.f32 %v6311_v10, %v6307_v53 }
0x1247   :  { %v6313_v56 = vpop.eup %6312  ;;  %v6024_v58 = vunpack.i.h.bf16 %v6022_v11  ;;  %v6023_v13 = vunpack.i.l.bf16 %v6022_v11  ;;  %v6044_v48 = vunpack.i.h.bf16 %v6042_v12  ;;  %v6043_v49 = vunpack.i.l.bf16 %v6042_v12 }
0x1248   :  { %v6315_v14 = vpop.eup %6314  ;;  %v1724_v35 = vmul.f32 %v6313_v56, %v6305_v31 }
0x1249   :  { %v6317_v33 = vpop.eup %6316  ;;  %v1840_v41 = vsel %vm386_vm2, %v6986_v55, %v6024_v58  ;;  %v1839_v44 = vsel %vm386_vm2, %v6982_v62, %v6023_v13  ;;  %v1726_v20 = vmul.f32 %v6315_v14, %v7212_v21  ;;  %v6143_v62 = vld [vmem:[%s8349_s28 + $0x8] sm:$0xff]   ;;  %v7289_v58 = vld [vmem:[%s8350_s29] ss:$0 sm:$0xff] }
0x124a   :  { %v1844_v59 = vsel %vm1843_vm3, %v1839_v44, %v6033_v22  ;;  %v1845_v34 = vsel %vm1843_vm3, %v1840_v41, %v6034_v16  ;;  %v6027_v17 = vpop.permute.xlu1 %6026  ;;  %v1725_v52 = vmul.f32 %v6317_v33, %v6309_v18 }
0x124b   :  { %v1849_v19 = vsel %vm1848_vm4, %v1844_v59, %v6043_v49  ;;  %v1850_v32 = vsel %vm1848_vm4, %v1845_v34, %v6044_v48  ;;  %v1729_v42 = vpack.c.bf16 %v1727_v15, %v1726_v20  ;;  %v6029_v3 = vunpack.i.h.bf16 %v6027_v17  ;;  %v6052_v59 = vpop.permute.xlu0 %6051 }
0x124c   :  { %v1728_v36 = vpack.c.bf16 %v1725_v52, %v1724_v35  ;;  %v1913_v55 = vpack.c.bf16 %v1850_v32, %v1849_v19  ;;  %v6028_v53 = vunpack.i.l.bf16 %v6027_v17  ;;  %v6054_v17 = vunpack.i.h.bf16 %v6052_v59 }
0x124d   :  { %v1842_v61 = vsel %vm386_vm2, %v6984_v47, %v6029_v3  ;;  %v6053_v35 = vunpack.i.l.bf16 %v6052_v59 }
0x124e   :  { %v6037_v45 = vpop.permute.xlu1 %6036  ;;  %5729 = vmatprep.mubr.msk.bf16.mxu0 %vm125_vm1, %v1728_v36  ;;  %v1841_v18 = vsel %vm386_vm2, %v6980_v54, %v6028_v53 }
0x124f   :  { %5730 = vmatmul.mubr.msk.bf16.vlgmr.msra.gmra.mrb[36].mxu0 %vm125_vm1, %v1729_v42  ;;  %v6039_v31 = vunpack.i.h.bf16 %v6037_v45  ;;  %v6038_v21 = vunpack.i.l.bf16 %v6037_v45  ;;  %v6062_v52 = vpop.permute.xlu0 %6061  ;;  %v1902_v42 = vsel %vm386_vm2, %v6994_v57, %v6054_v17 }
0x1250   :  { %5737 = vmatprep.mubr.msk.bf16.mxu0 %vm125_vm1, %v1913_v55  ;;  %5734 = vmatpush3.bf16.msra.mxu0 %v6142_v30  ;;  %v6064_v36 = vunpack.i.h.bf16 %v6062_v52  ;;  %v6063_v55 = vunpack.i.l.bf16 %v6062_v52 }
0x1251   :  { %5735 = vmatprep.subr.bf16.mxu0 %v6143_v62  ;;  %v1846_v29 = vsel %vm1843_vm3, %v1841_v18, %v6038_v21  ;;  %v1847_v23 = vsel %vm1843_vm3, %v1842_v61, %v6039_v31 }
0x1252   :  { %v6047_v40 = vpop.permute.xlu1 %6046 }
0x1253   :  { %v6049_v39 = vunpack.i.h.bf16 %v6047_v40  ;;  %v6048_v28 = vunpack.i.l.bf16 %v6047_v40 }
0x1254   :  { %5736 = vmatpush3.bf16.msra.mxu0 %v6143_v62  ;;  %v1901_v62 = vsel %vm386_vm2, %v6990_v0, %v6053_v35  ;;  %v1906_v0 = vsel %vm1843_vm3, %v1902_v42, %v6064_v36 }
0x1255   :  { %v1851_v24 = vsel %vm1848_vm4, %v1846_v29, %v6048_v28  ;;  %v1852_v25 = vsel %vm1848_vm4, %v1847_v23, %v6049_v39  ;;  %v1905_v57 = vsel %vm1843_vm3, %v1901_v62, %v6063_v55 }
0x1256   :  { %v1914_v26 = vpack.c.bf16 %v1852_v25, %v1851_v24 }
0x1258   :  { %5738 = vmatmul.mubr.msk.bf16.vlgmr.msra.gmra.mrb[40].mxu0 %vm125_vm1, %v1914_v26 }
0x1322   :  { %v5731_v27 = vpop.f32.mrb[36].mxu0 }
0x1323   :  { %v1776_v30 = vpop.f32.mrb[37].mxu0 }
0x1324   :  { %v5732_v47 = vpop.f32.mrb[38].mxu0 }
0x1325   :  { %v6075_v9 = vpack.i.bf16 %v5732_v47, %v5731_v27  ;;  %v1779_v7 = vpop.f32.mrb[39].mxu0 }
0x1326   :  { %v6070_v54 = vpack.i.bf16 %v1779_v7, %v1776_v30 }
0x1327   :  { %6076 = vrot.lane.b32.xlu1 %v6075_v9, %s8318_s3 }
0x1328   :  { %6071 = vrot.lane.b32.xlu0 %v6070_v54, %s8318_s3 }
0x132b   :  { %v5739_v10 = vpop.f32.mrb[40].mxu0 }
0x132c   :  { %v1986_v11 = vpop.f32.mrb[41].mxu0  ;;  %v1995_v14 = vadd.f32 %v5739_v10, %v7289_v58 }
0x132d   :  { %v5740_v12 = vpop.f32.mrb[42].mxu0  ;;  %v1987_v13 = vadd.f32 %v7289_v58, %v1986_v11 }
0x132e   :  { %v1989_v56 = vpop.f32.mrb[43].mxu0  ;;  %v7296_v22 = vadd.f32 %v1995_v14, %v6834_v38  ;;  %v1998_v33 = vadd.f32 %v5740_v12, %v7289_v58 }
0x132f   :  { %v2017_v15 = vadd.f32 %v1987_v13, %v6825_v50  ;;  %v1990_v16 = vadd.f32 %v7289_v58, %v1989_v56 }
0x1330   :  { %v7304_v48 = vadd.f32 %v1998_v33, %v6836_v60  ;;  %v2033_v50 = vsel %vm125_vm1, %v7296_v22, 0.0 }
0x1331   :  { %v7300_v41 = vadd.f32 %v1990_v16, %v6827_v51  ;;  %v2027_v44 = vsel %vm125_vm1, %v2017_v15, 0.0  ;;  %v6057_v51 = vpop.permute.xlu1 %6056 }
0x1332   :  { %v2036_v38 = vsel %vm125_vm1, %v7304_v48, 0.0  ;;  %v6059_v60 = vunpack.i.h.bf16 %v6057_v51  ;;  %v6058_v20 = vunpack.i.l.bf16 %v6057_v51 }
0x1333   :  { %v2030_v49 = vsel %vm125_vm1, %v7300_v41, 0.0 }
0x1334   :  { %v1904_v3 = vsel %vm386_vm2, %v6992_v6, %v6059_v60  ;;  %v1903_v53 = vsel %vm386_vm2, %v6988_v63, %v6058_v20 }
0x1335   :  { %v6067_v34 = vpop.permute.xlu1 %6066 }
0x1336   :  { %v6069_v19 = vunpack.i.h.bf16 %v6067_v34  ;;  %v6068_v32 = vunpack.i.l.bf16 %v6067_v34 }
0x1338   :  { %v1907_v61 = vsel %vm1843_vm3, %v1903_v53, %v6068_v32  ;;  %v1908_v18 = vsel %vm1843_vm3, %v1904_v3, %v6069_v19  ;;  %v6144_v19 = vld [vmem:[%s8292_s13] sm:$0xff]   ;;  %v6145_v32 = vld [vmem:[%s8292_s13 + $0x8] sm:$0xff]  }
0x1339   :  { %5745 = vmatprep.subr.bf16.mxu1 %v6144_v19 }
0x133a   :  { %5746 = vmatpush3.bf16.msra.mxu1 %v6144_v19  ;;  %v6149_v19 = vld [vmem:[%s8294_s15 + $0x18] sm:$0xff]  }
0x133b   :  { %5747 = vmatprep.subr.bf16.mxu1 %v6145_v32 }
0x133e   :  { %5748 = vmatpush3.bf16.msra.mxu1 %v6145_v32 }
0x1347   :  { %2028 = vadd.xlane.f32.xlu0 %v2027_v44 }
0x134b   :  { %2031 = vadd.xlane.f32.xlu1 %v2030_v49  ;;  %2034 = vadd.xlane.f32.xlu0 %v2033_v50 }
0x134f   :  { %2037 = vadd.xlane.f32.xlu0 %v2036_v38 }
0x1399   :  { %v6077_v45 = vpop.permute.xlu1 %6076 }
0x139a   :  { %v6079_v31 = vunpack.i.h.bf16 %v6077_v45  ;;  %v6078_v21 = vunpack.i.l.bf16 %v6077_v45  ;;  %v6072_v40 = vpop.permute.xlu0 %6071 }
0x139b   :  { %v6074_v39 = vunpack.i.h.bf16 %v6072_v40  ;;  %v6073_v28 = vunpack.i.l.bf16 %v6072_v40 }
0x139c   :  { %v1912_v29 = vsel %vm1848_vm4, %v1908_v18, %v6079_v31  ;;  %v1911_v6 = vsel %vm1848_vm4, %v1907_v61, %v6078_v21 }
0x139d   :  { %v1909_v23 = vsel %vm1848_vm4, %v1905_v57, %v6073_v28  ;;  %v1910_v63 = vsel %vm1848_vm4, %v1906_v0, %v6074_v39  ;;  %v1916_v24 = vpack.c.bf16 %v1912_v29, %v1911_v6 }
0x139e   :  { %v1915_v25 = vpack.c.bf16 %v1910_v63, %v1909_v23 }
0x13a0   :  { %5741 = vmatprep.mubr.msk.bf16.mxu0 %vm125_vm1, %v1915_v25 }
0x13a1   :  { %5742 = vmatmul.mubr.msk.bf16.gmra.mrb[44].mxu0 %vm125_vm1, %v1916_v24 }
0x13d4   :  { %v2029_v26 = vpop.xlane.xlu0 %2028 }
0x13d5   :  { %v2051_v47 = vmul.f32 0.03125, %v2029_v26 }
0x13d7   :  { %v7335_v33 = vsub.f32 %v2017_v15, %v2051_v47 }
0x13d8   :  { %v2035_v27 = vpop.xlane.xlu0 %2034  ;;  %v2032_v9 = vpop.xlane.xlu1 %2031 }
0x13d9   :  { %v2052_v56 = vmul.f32 0.03125, %v2032_v9  ;;  %v2053_v49 = vmul.f32 0.03125, %v2035_v27 }
0x13db   :  { %v7341_v59 = vsub.f32 %v7300_v41, %v2052_v56 }
0x13dc   :  { %v2038_v44 = vpop.xlane.xlu0 %2037 }
0x13dd   :  { %v2054_v34 = vmul.f32 0.03125, %v2038_v44 }
0x1474   :  { %v5743_v30 = vpop.f32.mrb[44].mxu0 }
0x1475   :  { %v2002_v7 = vpop.f32.mrb[45].mxu0  ;;  %v2011_v54 = vadd.f32 %v5743_v30, %v7289_v58 }
0x1476   :  { %v2003_v10 = vadd.f32 %v7289_v58, %v2002_v7  ;;  %v5744_v11 = vpop.f32.mrb[46].mxu0 }
0x1477   :  { %v2005_v12 = vpop.f32.mrb[47].mxu0  ;;  %v2014_v14 = vadd.f32 %v5744_v11, %v7289_v58  ;;  %v2023_v50 = vadd.f32 %v2011_v54, %v6851_v1  ;;  %v7352_v1 = vsub.f32 %v7304_v48, %v2054_v34 }
0x1478   :  { %v2021_v13 = vadd.f32 %v2003_v10, %v6843_v2  ;;  %v2006_v16 = vadd.f32 %v7289_v58, %v2005_v12  ;;  %v7346_v58 = vsub.f32 %v7296_v22, %v2053_v49 }
0x1479   :  { %v2024_v2 = vadd.f32 %v2014_v14, %v6853_v8  ;;  %v2045_v15 = vsel %vm125_vm1, %v2023_v50, 0.0  ;;  %v2068_v8 = vmul.f32 %v7341_v59, %v7341_v59  ;;  %v2070_v60 = vmul.f32 %v7352_v1, %v7352_v1 }
0x147a   :  { %v2022_v38 = vadd.f32 %v2006_v16, %v6845_v4  ;;  %v2039_v51 = vsel %vm125_vm1, %v2021_v13, 0.0  ;;  %v2067_v4 = vmul.f32 %v7335_v33, %v7335_v33  ;;  %v2069_v22 = vmul.f32 %v7346_v58, %v7346_v58 }
0x147b   :  { %2040 = vadd.xlane.f32.xlu0 %v2039_v51  ;;  %v2048_v41 = vsel %vm125_vm1, %v2024_v2, 0.0  ;;  %v2078_v52 = vsel %vm125_vm1, %v2068_v8, 0.0  ;;  %v2084_v20 = vsel %vm125_vm1, %v2070_v60, 0.0 }
0x147c   :  { %v2042_v17 = vsel %vm125_vm1, %v2022_v38, 0.0  ;;  %v2075_v35 = vsel %vm125_vm1, %v2067_v4, 0.0  ;;  %v2081_v48 = vsel %vm125_vm1, %v2069_v22, 0.0  ;;  %v6147_v22 = vld [vmem:[%s8294_s15 + $0x8] sm:$0xff]  }
0x147d   :  { %2043 = vadd.xlane.f32.xlu1 %v2042_v17 }
0x147f   :  { %2046 = vadd.xlane.f32.xlu0 %v2045_v15 }
0x1481   :  { %2049 = vadd.xlane.f32.xlu1 %v2048_v41 }
0x1483   :  { %2076 = vadd.xlane.f32.xlu0 %v2075_v35 }
0x1485   :  { %2079 = vadd.xlane.f32.xlu1 %v2078_v52  ;;  %v6148_v52 = vld [vmem:[%s8294_s15 + $0x10] sm:$0xff]  }
0x1487   :  { %2082 = vadd.xlane.f32.xlu0 %v2081_v48 }
0x1489   :  { %2085 = vadd.xlane.f32.xlu1 %v2084_v20 }
0x1508   :  { %v2041_v36 = vpop.xlane.xlu0 %2040 }
0x1509   :  { %v2055_v55 = vmul.f32 0.03125, %v2041_v36 }
0x150a   :  { %v2044_v42 = vpop.xlane.xlu1 %2043 }
0x150b   :  { %v7371_v62 = vsub.f32 %v2021_v13, %v2055_v55  ;;  %v2056_v45 = vmul.f32 0.03125, %v2044_v42  ;;  %v7394_v13 = vld [vmem:[%s8290_s11] ss:$0 sm:$0xff] }
0x150c   :  { %v2047_v3 = vpop.xlane.xlu0 %2046 }
0x150d   :  { %v7373_v53 = vsub.f32 %v2022_v38, %v2056_v45  ;;  %v2057_v31 = vmul.f32 0.03125, %v2047_v3  ;;  %v2071_v21 = vmul.f32 %v7371_v62, %v7371_v62  ;;  %v5279_v38 = vld [vmem:[%s8291_s12] ss:$0 sm:$0xff] }
0x150e   :  { %v2050_v40 = vpop.xlane.xlu1 %2049 }
0x150f   :  { %v7377_v61 = vsub.f32 %v2023_v50, %v2057_v31  ;;  %v2058_v18 = vmul.f32 0.03125, %v2050_v40  ;;  %v2087_v39 = vsel %vm125_vm1, %v2071_v21, 0.0  ;;  %v2072_v28 = vmul.f32 %v7373_v53, %v7373_v53 }
0x1510   :  { %2088 = vadd.xlane.f32.xlu0 %v2087_v39  ;;  %v2077_v57 = vpop.xlane.xlu0 %2076 }
0x1511   :  { %v7382_v0 = vsub.f32 %v2024_v2, %v2058_v18  ;;  %v2099_v29 = vmul.f32 0.03125, %v2077_v57  ;;  %v2090_v6 = vsel %vm125_vm1, %v2072_v28, 0.0  ;;  %v2073_v23 = vmul.f32 %v7377_v61, %v7377_v61 }
0x1512   :  { %v2080_v63 = vpop.xlane.xlu1 %2079  ;;  %2091 = vadd.xlane.f32.xlu1 %v2090_v6 }
0x1513   :  { %v2107_v24 = vadd.f32 1e-12, %v2099_v29  ;;  %v2100_v25 = vmul.f32 0.03125, %v2080_v63  ;;  %v2093_v26 = vsel %vm125_vm1, %v2073_v23, 0.0  ;;  %v2074_v27 = vmul.f32 %v7382_v0, %v7382_v0 }
0x1514   :  { %2094 = vadd.xlane.f32.xlu0 %v2093_v26  ;;  %v2083_v30 = vpop.xlane.xlu0 %2082 }
0x1515   :  { %6318 = vrsqrt.f32 %v2107_v24  ;;  %v2108_v47 = vadd.f32 1e-12, %v2100_v25  ;;  %v2101_v9 = vmul.f32 0.03125, %v2083_v30  ;;  %v2096_v7 = vsel %vm125_vm1, %v2074_v27, 0.0 }
0x1516   :  { %2097 = vadd.xlane.f32.xlu1 %v2096_v7  ;;  %v2086_v54 = vpop.xlane.xlu1 %2085 }
0x1517   :  { %6320 = vrsqrt.f32 %v2108_v47  ;;  %v2109_v10 = vadd.f32 1e-12, %v2101_v9  ;;  %v2102_v11 = vmul.f32 0.03125, %v2086_v54 }
0x1519   :  { %6322 = vrsqrt.f32 %v2109_v10  ;;  %v2110_v12 = vadd.f32 1e-12, %v2102_v11 }
0x151b   :  { %6324 = vrsqrt.f32 %v2110_v12 }
0x151f   :  { %v6319_v56 = vpop.eup %6318 }
0x1520   :  { %v2123_v14 = vmul.f32 %v6319_v56, %v7335_v33 }
0x1521   :  { %v6321_v16 = vpop.eup %6320 }
0x1522   :  { %v2124_v44 = vmul.f32 %v6321_v16, %v7341_v59  ;;  %v2137_v49 = vmul.f32 %v7394_v13, %v2123_v14 }
0x1523   :  { %v6323_v50 = vpop.eup %6322 }
0x1524   :  { %v2125_v51 = vmul.f32 %v6323_v50, %v7346_v58  ;;  %v2138_v34 = vmul.f32 %v7394_v13, %v2124_v44  ;;  %v7406_v33 = vadd.f32 %v5279_v38, %v2137_v49 }
0x1525   :  { %v6325_v2 = vpop.eup %6324 }
0x1526   :  { %v2139_v17 = vmul.f32 %v7394_v13, %v2125_v51  ;;  %v2126_v15 = vmul.f32 %v6325_v2, %v7352_v1  ;;  %v7408_v4 = vadd.f32 %v5279_v38, %v2138_v34  ;;  %v6146_v1 = vld [vmem:[%s8294_s15] sm:$0xff]  }
0x1527   :  { %5757 = vmatprep.subr.bf16.mxu0 %v6146_v1 }
0x1528   :  { %v2140_v59 = vmul.f32 %v7394_v13, %v2126_v15  ;;  %v2159_v41 = vpack.c.bf16 %v7408_v4, %v7406_v33  ;;  %v7414_v8 = vadd.f32 %v5279_v38, %v2139_v17  ;;  %5758 = vmatpush3.bf16.msra.mxu0 %v6146_v1 }
0x1529   :  { %5759 = vmatprep.subr.bf16.mxu0 %v6147_v22 }
0x152a   :  { %5749 = vmatprep.mubr.msk.bf16.mxu1 %vm125_vm1, %v2159_v41  ;;  %v7416_v58 = vadd.f32 %v5279_v38, %v2140_v59 }
0x152c   :  { %v2160_v35 = vpack.c.bf16 %v7416_v58, %v7414_v8  ;;  %5760 = vmatpush3.bf16.msra.mxu0 %v6147_v22 }
0x152d   :  { %5761 = vmatprep.subr.bf16.mxu0 %v6148_v52 }
0x152e   :  { %5750 = vmatmul.mubr.msk.bf16.vlgmr.msra.gmra.mrb[32].mxu1 %vm125_vm1, %v2160_v35 }
0x1530   :  { %5762 = vmatpush3.bf16.msra.mxu0 %v6148_v52 }
0x1531   :  { %5763 = vmatprep.subr.bf16.mxu0 %v6149_v19 }
0x1534   :  { %5764 = vmatpush3.bf16.msra.mxu0 %v6149_v19 }
0x159d   :  { %v2089_v60 = vpop.xlane.xlu0 %2088 }
0x159e   :  { %v2103_v48 = vmul.f32 0.03125, %v2089_v60 }
0x159f   :  { %v2092_v20 = vpop.xlane.xlu1 %2091 }
0x15a0   :  { %v2111_v32 = vadd.f32 1e-12, %v2103_v48  ;;  %v2104_v36 = vmul.f32 0.03125, %v2092_v20 }
0x15a1   :  { %v2095_v55 = vpop.xlane.xlu0 %2094 }
0x15a2   :  { %6326 = vrsqrt.f32 %v2111_v32  ;;  %v2112_v42 = vadd.f32 1e-12, %v2104_v36  ;;  %v2105_v45 = vmul.f32 0.03125, %v2095_v55 }
0x15a3   :  { %v2098_v3 = vpop.xlane.xlu1 %2097 }
0x15a4   :  { %6328 = vrsqrt.f32 %v2112_v42  ;;  %v2113_v31 = vadd.f32 1e-12, %v2105_v45  ;;  %v2106_v21 = vmul.f32 0.03125, %v2098_v3 }
0x15a6   :  { %6330 = vrsqrt.f32 %v2113_v31  ;;  %v2114_v40 = vadd.f32 1e-12, %v2106_v21 }
0x15a8   :  { %6332 = vrsqrt.f32 %v2114_v40 }
0x15ac   :  { %v6327_v18 = vpop.eup %6326 }
0x15ad   :  { %v2127_v39 = vmul.f32 %v6327_v18, %v7371_v62 }
0x15ae   :  { %v6329_v28 = vpop.eup %6328 }
0x15af   :  { %v2128_v57 = vmul.f32 %v6329_v28, %v7373_v53  ;;  %v2141_v29 = vmul.f32 %v7394_v13, %v2127_v39 }
0x15b0   :  { %v6331_v6 = vpop.eup %6330 }
0x15b1   :  { %v2142_v23 = vmul.f32 %v7394_v13, %v2128_v57  ;;  %v2129_v63 = vmul.f32 %v6331_v6, %v7377_v61  ;;  %v7438_v25 = vadd.f32 %v5279_v38, %v2141_v29 }
0x15b2   :  { %v6333_v24 = vpop.eup %6332 }
0x15b3   :  { %v7440_v26 = vadd.f32 %v5279_v38, %v2142_v23  ;;  %v2130_v27 = vmul.f32 %v6333_v24, %v7382_v0  ;;  %v2143_v30 = vmul.f32 %v7394_v13, %v2129_v63  ;;  %v7458_v0 = vld [vmem:[%s8293_s14] ss:$0 sm:$0xff] }
0x15b5   :  { %v2161_v62 = vpack.c.bf16 %v7440_v26, %v7438_v25  ;;  %v2144_v53 = vmul.f32 %v7394_v13, %v2130_v27  ;;  %v7448_v47 = vadd.f32 %v5279_v38, %v2143_v30 }
0x15b7   :  { %5753 = vmatprep.mubr.msk.bf16.mxu1 %vm125_vm1, %v2161_v62  ;;  %v7450_v9 = vadd.f32 %v5279_v38, %v2144_v53 }
0x15b9   :  { %v2162_v61 = vpack.c.bf16 %v7450_v9, %v7448_v47 }
0x15bb   :  { %5754 = vmatmul.mubr.msk.bf16.gmra.mrb[36].mxu1 %vm125_vm1, %v2162_v61 }
0x1601   :  { %v5751_v7 = vpop.f32.mrb[32].mxu1 }
0x1602   :  { %v2241_v54 = vadd.f32 %v5751_v7, %v7458_v0  ;;  %v2232_v10 = vpop.f32.mrb[33].mxu1 }
0x1603   :  { %v2233_v11 = vadd.f32 %v7458_v0, %v2232_v10  ;;  %v5752_v12 = vpop.f32.mrb[34].mxu1 }
0x1604   :  { %v2273_v56 = vmul.f32 0.044715, %v2241_v54  ;;  %v2244_v13 = vadd.f32 %v5752_v12, %v7458_v0  ;;  %v2235_v14 = vpop.f32.mrb[35].mxu1  ;;  %v2265_v31 = vmul.f32 0.5, %v2241_v54 }
0x1605   :  { %v2271_v16 = vmul.f32 0.044715, %v2233_v11  ;;  %v2236_v44 = vadd.f32 %v7458_v0, %v2235_v14  ;;  %v2263_v18 = vmul.f32 0.5, %v2233_v11 }
0x1606   :  { %v2281_v49 = vmul.f32 %v2273_v56, %v2241_v54  ;;  %v2274_v50 = vmul.f32 0.044715, %v2244_v13  ;;  %v2266_v21 = vmul.f32 0.5, %v2244_v13 }
0x1607   :  { %v2279_v38 = vmul.f32 %v2271_v16, %v2233_v11  ;;  %v2272_v51 = vmul.f32 0.044715, %v2236_v44  ;;  %v2264_v39 = vmul.f32 0.5, %v2236_v44 }
0x1608   :  { %v2289_v34 = vmul.f32 %v2281_v49, %v2241_v54  ;;  %v2282_v2 = vmul.f32 %v2274_v50, %v2244_v13 }
0x1609   :  { %v2287_v17 = vmul.f32 %v2279_v38, %v2233_v11  ;;  %v2280_v15 = vmul.f32 %v2272_v51, %v2236_v44 }
0x160a   :  { %v2297_v59 = vadd.f32 %v2289_v34, %v2241_v54  ;;  %v2290_v41 = vmul.f32 %v2282_v2, %v2244_v13 }
0x160b   :  { %v2295_v35 = vadd.f32 %v2287_v17, %v2233_v11  ;;  %v2288_v1 = vmul.f32 %v2280_v15, %v2236_v44 }
0x160c   :  { %v2305_v22 = vmul.f32 0.7978846, %v2297_v59  ;;  %v2298_v52 = vadd.f32 %v2290_v41, %v2244_v13 }
0x160d   :  { %v2303_v60 = vmul.f32 0.7978846, %v2295_v35  ;;  %v2296_v48 = vadd.f32 %v2288_v1, %v2236_v44 }
0x160e   :  { %6334 = vtanh.f32 %v2305_v22  ;;  %v2306_v20 = vmul.f32 0.7978846, %v2298_v52 }
0x160f   :  { %6336 = vtanh.f32 %v2303_v60  ;;  %v2304_v19 = vmul.f32 0.7978846, %v2296_v48 }
0x1610   :  { %6338 = vtanh.f32 %v2306_v20 }
0x1611   :  { %6340 = vtanh.f32 %v2304_v19 }
0x1618   :  { %v6335_v32 = vpop.eup %6334 }
0x1619   :  { %v6337_v36 = vpop.eup %6336  ;;  %v2321_v55 = vadd.f32 1.0, %v6335_v32 }
0x161a   :  { %v6339_v42 = vpop.eup %6338  ;;  %v2319_v45 = vadd.f32 1.0, %v6337_v36 }
0x161b   :  { %v6341_v3 = vpop.eup %6340  ;;  %v2322_v40 = vadd.f32 1.0, %v6339_v42  ;;  %v2329_v57 = vmul.f32 %v2321_v55, %v2265_v31 }
0x161c   :  { %v2320_v28 = vadd.f32 1.0, %v6341_v3  ;;  %v2327_v6 = vmul.f32 %v2319_v45, %v2263_v18 }
0x161d   :  { %v2330_v29 = vmul.f32 %v2322_v40, %v2266_v21 }
0x161e   :  { %v2328_v23 = vmul.f32 %v2320_v28, %v2264_v39 }
0x161f   :  { %v2336_v63 = vpack.c.bf16 %v2330_v29, %v2329_v57  ;;  %v5287_v57 = vld [vmem:[%s8295_s16] ss:$0 sm:$0xff] }
0x1620   :  { %v2335_v24 = vpack.c.bf16 %v2328_v23, %v2327_v6 }
0x1622   :  { %5765 = vmatprep.mubr.msk.bf16.mxu0 %vm2378_vm5, %v2335_v24 }
0x1623   :  { %5766 = vmatmul.mubr.msk.bf16.vlgmr.msra.gmra.mrb[48].mxu0 %vm2378_vm5, %v2336_v63 }
0x168e   :  { %v5755_v27 = vpop.f32.mrb[36].mxu1 }
0x168f   :  { %v2257_v30 = vadd.f32 %v5755_v27, %v7458_v0  ;;  %v2248_v62 = vpop.f32.mrb[37].mxu1 }
0x1690   :  { %v2249_v53 = vadd.f32 %v7458_v0, %v2248_v62  ;;  %v5756_v61 = vpop.f32.mrb[38].mxu1 }
0x1691   :  { %v2277_v7 = vmul.f32 0.044715, %v2257_v30  ;;  %v2260_v54 = vadd.f32 %v5756_v61, %v7458_v0  ;;  %v2251_v10 = vpop.f32.mrb[39].mxu1  ;;  %v2269_v32 = vmul.f32 0.5, %v2257_v30 }
0x1692   :  { %v2275_v11 = vmul.f32 0.044715, %v2249_v53  ;;  %v2252_v12 = vadd.f32 %v7458_v0, %v2251_v10  ;;  %v2267_v42 = vmul.f32 0.5, %v2249_v53 }
0x1693   :  { %v2285_v56 = vmul.f32 %v2277_v7, %v2257_v30  ;;  %v2278_v13 = vmul.f32 0.044715, %v2260_v54  ;;  %v2270_v36 = vmul.f32 0.5, %v2260_v54 }
0x1694   :  { %v2283_v14 = vmul.f32 %v2275_v11, %v2249_v53  ;;  %v2276_v16 = vmul.f32 0.044715, %v2252_v12  ;;  %v2268_v45 = vmul.f32 0.5, %v2252_v12 }
0x1695   :  { %v2293_v44 = vmul.f32 %v2285_v56, %v2257_v30  ;;  %v2286_v49 = vmul.f32 %v2278_v13, %v2260_v54 }
0x1696   :  { %v2291_v50 = vmul.f32 %v2283_v14, %v2249_v53  ;;  %v2284_v38 = vmul.f32 %v2276_v16, %v2252_v12 }
0x1697   :  { %v2301_v51 = vadd.f32 %v2293_v44, %v2257_v30  ;;  %v2294_v34 = vmul.f32 %v2286_v49, %v2260_v54 }
0x1698   :  { %v2299_v2 = vadd.f32 %v2291_v50, %v2249_v53  ;;  %v2292_v17 = vmul.f32 %v2284_v38, %v2252_v12 }
0x1699   :  { %v2309_v15 = vmul.f32 0.7978846, %v2301_v51  ;;  %v2302_v59 = vadd.f32 %v2294_v34, %v2260_v54 }
0x169a   :  { %v2307_v41 = vmul.f32 0.7978846, %v2299_v2  ;;  %v2300_v35 = vadd.f32 %v2292_v17, %v2252_v12 }
0x169b   :  { %6342 = vtanh.f32 %v2309_v15  ;;  %v2310_v1 = vmul.f32 0.7978846, %v2302_v59 }
0x169c   :  { %6344 = vtanh.f32 %v2307_v41  ;;  %v2308_v0 = vmul.f32 0.7978846, %v2300_v35 }
0x169d   :  { %6346 = vtanh.f32 %v2310_v1 }
0x169e   :  { %6348 = vtanh.f32 %v2308_v0 }
0x16a5   :  { %v6343_v22 = vpop.eup %6342 }
0x16a6   :  { %v6345_v52 = vpop.eup %6344  ;;  %v2325_v60 = vadd.f32 1.0, %v6343_v22 }
0x16a7   :  { %v6347_v48 = vpop.eup %6346  ;;  %v2323_v20 = vadd.f32 1.0, %v6345_v52 }
0x16a8   :  { %v6349_v19 = vpop.eup %6348  ;;  %v2326_v55 = vadd.f32 1.0, %v6347_v48  ;;  %v2333_v31 = vmul.f32 %v2325_v60, %v2269_v32 }
0x16a9   :  { %v2324_v3 = vadd.f32 1.0, %v6349_v19  ;;  %v2331_v40 = vmul.f32 %v2323_v20, %v2267_v42 }
0x16aa   :  { %v2334_v21 = vmul.f32 %v2326_v55, %v2270_v36 }
0x16ab   :  { %v2332_v18 = vmul.f32 %v2324_v3, %v2268_v45  ;;  %v6150_v3 = vld [vmem:[%s8342_s7 + $0x10] sm:$0xff]  }
0x16ac   :  { %v2338_v39 = vpack.c.bf16 %v2334_v21, %v2333_v31  ;;  %5773 = vmatprep.subr.bf16.mxu1 %v6150_v3  ;;  %v6151_v31 = vld [vmem:[%s8342_s7 + $0x18] sm:$0xff]  }
0x16ad   :  { %v2337_v28 = vpack.c.bf16 %v2332_v18, %v2331_v40  ;;  %5774 = vmatpush3.bf16.msra.mxu1 %v6150_v3 }
0x16ae   :  { %5775 = vmatprep.subr.bf16.mxu1 %v6151_v31 }
0x16af   :  { %5769 = vmatprep.mubr.msk.bf16.mxu0 %vm2378_vm5, %v2337_v28 }
0x16b0   :  { %5770 = vmatmul.mubr.msk.bf16.gmra.mrb[52].mxu0 %vm2378_vm5, %v2338_v39 }
0x16b1   :  { %5776 = vmatpush3.bf16.msra.mxu1 %v6151_v31 }
0x16f6   :  { %v5767_v29 = vpop.f32.mrb[48].mxu0 }
0x16f7   :  { %v2425_v6 = vpop.f32.mrb[49].mxu0  ;;  %v2434_v23 = vadd.f32 %v5767_v29, %v5287_v57 }
0x16f8   :  { %v2426_v63 = vadd.f32 %v5287_v57, %v2425_v6  ;;  %v5768_v24 = vpop.f32.mrb[50].mxu0 }
0x16f9   :  { %v2428_v27 = vpop.f32.mrb[51].mxu0  ;;  %v2437_v62 = vadd.f32 %v5768_v24, %v5287_v57  ;;  %v2458_v61 = vadd.f32 %v2434_v23, %v7414_v8 }
0x16fa   :  { %v2456_v30 = vadd.f32 %v2426_v63, %v7406_v33  ;;  %v2429_v53 = vadd.f32 %v5287_v57, %v2428_v27 }
0x16fb   :  { %v2459_v10 = vadd.f32 %v2437_v62, %v7416_v58  ;;  %v2472_v12 = vsel %vm125_vm1, %v2458_v61, 0.0 }
0x16fc   :  { %v2457_v7 = vadd.f32 %v2429_v53, %v7408_v4  ;;  %v2466_v54 = vsel %vm125_vm1, %v2456_v30, 0.0 }
0x16fd   :  { %2467 = vadd.xlane.f32.xlu0 %v2466_v54  ;;  %v2475_v56 = vsel %vm125_vm1, %v2459_v10, 0.0 }
0x16fe   :  { %v2469_v11 = vsel %vm125_vm1, %v2457_v7, 0.0 }
0x16ff   :  { %2470 = vadd.xlane.f32.xlu1 %v2469_v11 }
0x1701   :  { %2473 = vadd.xlane.f32.xlu0 %v2472_v12 }
0x1703   :  { %2476 = vadd.xlane.f32.xlu1 %v2475_v56 }
0x1783   :  { %v5771_v33 = vpop.f32.mrb[52].mxu0 }
0x1784   :  { %v2441_v13 = vpop.f32.mrb[53].mxu0  ;;  %v2450_v14 = vadd.f32 %v5771_v33, %v5287_v57 }
0x1785   :  { %v2442_v8 = vadd.f32 %v5287_v57, %v2441_v13  ;;  %v5772_v16 = vpop.f32.mrb[54].mxu0 }
0x1786   :  { %v2444_v4 = vpop.f32.mrb[55].mxu0  ;;  %v2453_v49 = vadd.f32 %v5772_v16, %v5287_v57  ;;  %v2462_v58 = vadd.f32 %v2450_v14, %v7448_v47 }
0x1787   :  { %v2460_v44 = vadd.f32 %v2442_v8, %v7438_v25  ;;  %v2445_v50 = vadd.f32 %v5287_v57, %v2444_v4 }
0x1788   :  { %v2463_v2 = vadd.f32 %v2453_v49, %v7450_v9  ;;  %v2484_v35 = vsel %vm125_vm1, %v2462_v58, 0.0 }
0x1789   :  { %v2461_v38 = vadd.f32 %v2445_v50, %v7440_v26  ;;  %v2478_v51 = vsel %vm125_vm1, %v2460_v44, 0.0 }
0x178a   :  { %2479 = vadd.xlane.f32.xlu0 %v2478_v51  ;;  %v2468_v34 = vpop.xlane.xlu0 %2467  ;;  %v2487_v0 = vsel %vm125_vm1, %v2463_v2, 0.0  ;;  %v5296_v51 = vld [vmem:[%s8296_s17] ss:$0 sm:$0xff] }
0x178b   :  { %v2490_v17 = vmul.f32 0.03125, %v2468_v34  ;;  %v2481_v15 = vsel %vm125_vm1, %v2461_v38, 0.0 }
0x178c   :  { %v2471_v59 = vpop.xlane.xlu1 %2470  ;;  %2482 = vadd.xlane.f32.xlu1 %v2481_v15 }
0x178d   :  { %v7489_v41 = vsub.f32 %v2456_v30, %v2490_v17  ;;  %v2491_v25 = vmul.f32 0.03125, %v2471_v59 }
0x178e   :  { %2485 = vadd.xlane.f32.xlu0 %v2484_v35  ;;  %v2474_v47 = vpop.xlane.xlu0 %2473 }
0x178f   :  { %v7492_v1 = vsub.f32 %v2457_v7, %v2491_v25  ;;  %v2492_v26 = vmul.f32 0.03125, %v2474_v47  ;;  %v2506_v9 = vmul.f32 %v7489_v41, %v7489_v41  ;;  %v5297_v25 = vld [vmem:[%s8297_s18] ss:$0 sm:$0xff] }
0x1790   :  { %v2477_v22 = vpop.xlane.xlu1 %2476  ;;  %2488 = vadd.xlane.f32.xlu1 %v2487_v0 }
0x1791   :  { %v7497_v52 = vsub.f32 %v2458_v61, %v2492_v26  ;;  %v2493_v60 = vmul.f32 0.03125, %v2477_v22  ;;  %v2514_v48 = vsel %vm125_vm1, %v2506_v9, 0.0  ;;  %v2507_v20 = vmul.f32 %v7492_v1, %v7492_v1 }
0x1792   :  { %2515 = vadd.xlane.f32.xlu0 %v2514_v48 }
0x1793   :  { %v7502_v19 = vsub.f32 %v2459_v10, %v2493_v60  ;;  %v2517_v32 = vsel %vm125_vm1, %v2507_v20, 0.0  ;;  %v2508_v36 = vmul.f32 %v7497_v52, %v7497_v52 }
0x1794   :  { %2518 = vadd.xlane.f32.xlu1 %v2517_v32 }
0x1795   :  { %v2520_v55 = vsel %vm125_vm1, %v2508_v36, 0.0  ;;  %v2509_v42 = vmul.f32 %v7502_v19, %v7502_v19 }
0x1796   :  { %2521 = vadd.xlane.f32.xlu0 %v2520_v55 }
0x1797   :  { %v2523_v45 = vsel %vm125_vm1, %v2509_v42, 0.0 }
0x1798   :  { %2524 = vadd.xlane.f32.xlu1 %v2523_v45 }
0x1817   :  { %v2480_v21 = vpop.xlane.xlu0 %2479 }
0x1818   :  { %v2494_v40 = vmul.f32 0.03125, %v2480_v21 }
0x1819   :  { %v2483_v18 = vpop.xlane.xlu1 %2482 }
0x181a   :  { %v7517_v39 = vsub.f32 %v2460_v44, %v2494_v40  ;;  %v2495_v28 = vmul.f32 0.03125, %v2483_v18 }
0x181b   :  { %v2486_v57 = vpop.xlane.xlu0 %2485 }
0x181c   :  { %v7519_v29 = vsub.f32 %v2461_v38, %v2495_v28  ;;  %v2496_v6 = vmul.f32 0.03125, %v2486_v57  ;;  %v2510_v23 = vmul.f32 %v7517_v39, %v7517_v39 }
0x181d   :  { %v2489_v63 = vpop.xlane.xlu1 %2488 }
0x181e   :  { %v7523_v24 = vsub.f32 %v2462_v58, %v2496_v6  ;;  %v2497_v27 = vmul.f32 0.03125, %v2489_v63  ;;  %v2526_v30 = vsel %vm125_vm1, %v2510_v23, 0.0  ;;  %v2511_v62 = vmul.f32 %v7519_v29, %v7519_v29 }
0x181f   :  { %2527 = vadd.xlane.f32.xlu0 %v2526_v30  ;;  %v2516_v53 = vpop.xlane.xlu0 %2515 }
0x1820   :  { %v7528_v61 = vsub.f32 %v2463_v2, %v2497_v27  ;;  %v2538_v7 = vmul.f32 0.03125, %v2516_v53  ;;  %v2529_v54 = vsel %vm125_vm1, %v2511_v62, 0.0  ;;  %v2512_v10 = vmul.f32 %v7523_v24, %v7523_v24 }
0x1821   :  { %2530 = vadd.xlane.f32.xlu1 %v2529_v54  ;;  %v2519_v11 = vpop.xlane.xlu1 %2518 }
0x1822   :  { %v2546_v12 = vadd.f32 1e-12, %v2538_v7  ;;  %v2539_v56 = vmul.f32 0.03125, %v2519_v11  ;;  %v2532_v33 = vsel %vm125_vm1, %v2512_v10, 0.0  ;;  %v2513_v13 = vmul.f32 %v7528_v61, %v7528_v61 }
0x1823   :  { %2533 = vadd.xlane.f32.xlu0 %v2532_v33  ;;  %v2522_v14 = vpop.xlane.xlu0 %2521 }
0x1824   :  { %6350 = vrsqrt.f32 %v2546_v12  ;;  %v2547_v8 = vadd.f32 1e-12, %v2539_v56  ;;  %v2540_v16 = vmul.f32 0.03125, %v2522_v14  ;;  %v2535_v4 = vsel %vm125_vm1, %v2513_v13, 0.0 }
0x1825   :  { %2536 = vadd.xlane.f32.xlu1 %v2535_v4  ;;  %v2525_v44 = vpop.xlane.xlu1 %2524 }
0x1826   :  { %6352 = vrsqrt.f32 %v2547_v8  ;;  %v2548_v49 = vadd.f32 1e-12, %v2540_v16  ;;  %v2541_v50 = vmul.f32 0.03125, %v2525_v44 }
0x1828   :  { %6354 = vrsqrt.f32 %v2548_v49  ;;  %v2549_v58 = vadd.f32 1e-12, %v2541_v50 }
0x182a   :  { %6356 = vrsqrt.f32 %v2549_v58 }
0x182e   :  { %v6351_v38 = vpop.eup %6350 }
0x182f   :  { %v2562_v34 = vmul.f32 %v6351_v38, %v7489_v41 }
0x1830   :  { %v6353_v2 = vpop.eup %6352 }
0x1831   :  { %v2563_v17 = vmul.f32 %v6353_v2, %v7492_v1  ;;  %v2576_v15 = vmul.f32 %v5296_v51, %v2562_v34 }
0x1832   :  { %v6355_v59 = vpop.eup %6354 }
0x1833   :  { %v2564_v35 = vmul.f32 %v6355_v59, %v7497_v52  ;;  %v2577_v47 = vmul.f32 %v5296_v51, %v2563_v17  ;;  %v7547_v22 = vadd.f32 %v5297_v25, %v2576_v15 }
0x1834   :  { %v6357_v26 = vpop.eup %6356 }
0x1835   :  { %v2578_v0 = vmul.f32 %v5296_v51, %v2564_v35  ;;  %v2565_v9 = vmul.f32 %v6357_v26, %v7502_v19  ;;  %v7549_v60 = vadd.f32 %v5297_v25, %v2577_v47 }
0x1837   :  { %v2579_v41 = vmul.f32 %v5296_v51, %v2565_v9  ;;  %v2598_v1 = vpack.c.bf16 %v7549_v60, %v7547_v22  ;;  %v7553_v48 = vadd.f32 %v5297_v25, %v2578_v0 }
0x1839   :  { %v7555_v20 = vadd.f32 %v5297_v25, %v2579_v41  ;;  %5777 = vmatprep.mubr.msk.bf16.mxu1 %vm125_vm1, %v2598_v1 }
0x183b   :  { %v2599_v52 = vpack.c.bf16 %v7555_v20, %v7553_v48 }
0x183d   :  { %5778 = vmatmul.mubr.msk.bf16.vlgmr.msra.gmra.mrb[40].mxu1 %vm125_vm1, %v2599_v52 }
0x18ac   :  { %v2528_v19 = vpop.xlane.xlu0 %2527 }
0x18ad   :  { %v2542_v32 = vmul.f32 0.03125, %v2528_v19 }
0x18ae   :  { %v2531_v36 = vpop.xlane.xlu1 %2530 }
0x18af   :  { %v2550_v55 = vadd.f32 1e-12, %v2542_v32  ;;  %v2543_v42 = vmul.f32 0.03125, %v2531_v36 }
0x18b0   :  { %v2534_v45 = vpop.xlane.xlu0 %2533 }
0x18b1   :  { %6358 = vrsqrt.f32 %v2550_v55  ;;  %v2551_v3 = vadd.f32 1e-12, %v2543_v42  ;;  %v2544_v31 = vmul.f32 0.03125, %v2534_v45 }
0x18b2   :  { %v2537_v21 = vpop.xlane.xlu1 %2536 }
0x18b3   :  { %6360 = vrsqrt.f32 %v2551_v3  ;;  %v2552_v40 = vadd.f32 1e-12, %v2544_v31  ;;  %v2545_v18 = vmul.f32 0.03125, %v2537_v21 }
0x18b5   :  { %6362 = vrsqrt.f32 %v2552_v40  ;;  %v2553_v28 = vadd.f32 1e-12, %v2545_v18 }
0x18b7   :  { %6364 = vrsqrt.f32 %v2553_v28 }
0x18bb   :  { %v6359_v57 = vpop.eup %6358 }
0x18bc   :  { %v2566_v6 = vmul.f32 %v6359_v57, %v7517_v39 }
0x18bd   :  { %v6361_v23 = vpop.eup %6360 }
0x18be   :  { %v2567_v63 = vmul.f32 %v6361_v23, %v7519_v29  ;;  %v2580_v27 = vmul.f32 %v5296_v51, %v2566_v6 }
0x18bf   :  { %v6363_v30 = vpop.eup %6362 }
0x18c0   :  { %v2581_v62 = vmul.f32 %v5296_v51, %v2567_v63  ;;  %v2568_v53 = vmul.f32 %v6363_v30, %v7523_v24  ;;  %v7564_v54 = vadd.f32 %v5297_v25, %v2580_v27 }
0x18c1   :  { %v6365_v7 = vpop.eup %6364 }
0x18c2   :  { %v7566_v10 = vadd.f32 %v5297_v25, %v2581_v62  ;;  %v2569_v11 = vmul.f32 %v6365_v7, %v7528_v61  ;;  %v2582_v12 = vmul.f32 %v5296_v51, %v2568_v53  ;;  %v5303_v61 = vld [vmem:[%s8345_s20 + $0x1] ss:$0 sm:$0xff]  ;;  %s8351_s20 = smov 112  }
0x18c4   :  { %v2600_v56 = vpack.c.bf16 %v7566_v10, %v7564_v54  ;;  %v2583_v39 = vmul.f32 %v5296_v51, %v2569_v11  ;;  %v7572_v29 = vadd.f32 %v5297_v25, %v2582_v12 }
0x18c6   :  { %5781 = vmatprep.mubr.msk.bf16.mxu1 %vm125_vm1, %v2600_v56  ;;  %v7574_v33 = vadd.f32 %v5297_v25, %v2583_v39 }
0x18c8   :  { %v2601_v24 = vpack.c.bf16 %v7574_v33, %v7572_v29 }
0x18ca   :  { %5782 = vmatmul.mubr.msk.bf16.gmra.mrb[44].mxu1 %vm125_vm1, %v2601_v24 }
0x1910   :  { %v5779_v13 = vpop.f32.mrb[40].mxu1 }
0x1911   :  { %v2673_v14 = vpop.f32.mrb[41].mxu1  ;;  %v2682_v16 = vadd.f32 %v5779_v13, %v5303_v61 }
0x1912   :  { %v5780_v8 = vpop.f32.mrb[42].mxu1  ;;  %v2674_v49 = vadd.f32 %v5303_v61, %v2673_v14 }
0x1913   :  { %v2685_v4 = vadd.f32 %v5780_v8, %v5303_v61  ;;  %v2676_v44 = vpop.f32.mrb[43].mxu1 }
0x1914   :  { %v2677_v50 = vadd.f32 %v5303_v61, %v2676_v44 }
0x1915   :  { %v7582_v58 = vpack.c.bf16 %v2685_v4, %v2682_v16 }
0x1916   :  { %v7584_v38 = vpack.c.bf16 %v2677_v50, %v2674_v49 }
0x1917   :  { %2712 = vrot.lane.b32.xlu1 %v7582_v58, %s6582_s10 }
0x1918   :  { %2710 = vrot.lane.b32.xlu0 %v7584_v38, %s6582_s10  ;;  %5789 = vmatprep.mubr.msk.bf16.mxu0 %vm386_vm2, %v7584_v38 }
0x1989   :  { %v2713_v2 = vpop.permute.xlu1 %2712 }
0x198a   :  { %v2711_v51 = vpop.permute.xlu0 %2710  ;;  %v2724_v17 = vsel %vm386_vm2, %v2713_v2, 0 }
0x198b   :  { %5977 = vmatprep.subr.msk.bf16.mxu0 %vm386_vm2, %v2711_v51  ;;  %v2721_v34 = vsel %vm386_vm2, %v2711_v51, 0 }
0x198c   :  { %5786 = vmatpush3.bf16.xpose.msra.mxu0 %v2721_v34 }
0x198d   :  { %5978 = vmatprep.subr.msk.bf16.mxu0 %vm386_vm2, %v2713_v2 }
0x1994   :  { %5788 = vmatpush3.bf16.xpose.msra.mxu0 %v2724_v17 }
0x199b   :  { %5790 = vmatmul.mubr.msk.bf16.vlgmr.msra.gmra.mrb[56].mxu0 %vm386_vm2, %v7582_v58 }
0x199d   :  { %v5783_v15 = vpop.f32.mrb[44].mxu1 }
0x199e   :  { %v2689_v59 = vpop.f32.mrb[45].mxu1  ;;  %v2698_v35 = vadd.f32 %v5783_v15, %v5303_v61 }
0x199f   :  { %v5784_v25 = vpop.f32.mrb[46].mxu1  ;;  %v2690_v0 = vadd.f32 %v5303_v61, %v2689_v59 }
0x19a0   :  { %v2701_v47 = vadd.f32 %v5784_v25, %v5303_v61  ;;  %v2692_v26 = vpop.f32.mrb[47].mxu1 }
0x19a1   :  { %v2693_v9 = vadd.f32 %v5303_v61, %v2692_v26 }
0x19a2   :  { %v7598_v41 = vpack.c.bf16 %v2701_v47, %v2698_v35 }
0x19a3   :  { %v7600_v1 = vpack.c.bf16 %v2693_v9, %v2690_v0 }
0x19a5   :  { %2884 = vrot.lane.b32.xlu1 %v7600_v1, %s6582_s10  ;;  %5805 = vmatprep.mubr.msk.bf16.mxu0 %vm386_vm2, %v7600_v1 }
0x19a9   :  { %2886 = vrot.lane.b32.xlu1 %v7598_v41, %s6582_s10  ;;  %s8352_s10 = smov 48  }
0x1a17   :  { %v2885_v52 = vpop.permute.xlu1 %2884 }
0x1a18   :  { %5979 = vmatprep.subr.msk.bf16.mxu0 %vm386_vm2, %v2885_v52  ;;  %v2895_v19 = vsel %vm386_vm2, %v2885_v52, 0 }
0x1a19   :  { %5802 = vmatpush3.bf16.xpose.msra.mxu0 %v2895_v19 }
0x1a1b   :  { %v2887_v32 = vpop.permute.xlu1 %2886 }
0x1a1c   :  { %5980 = vmatprep.subr.msk.bf16.mxu0 %vm386_vm2, %v2887_v32  ;;  %v2898_v36 = vsel %vm386_vm2, %v2887_v32, 0 }
0x1a21   :  { %5804 = vmatpush3.bf16.xpose.msra.mxu0 %v2898_v36 }
0x1a28   :  { %5806 = vmatmul.mubr.msk.bf16.vlgmr.msra.gmra.mrb[60].mxu0 %vm386_vm2, %v7598_v41 }
0x1a6e   :  { %v5791_v55 = vpop.f32.mrb[56].mxu0 }
0x1a6f   :  { %v2760_v42 = vpop.f32.mrb[57].mxu0  ;;  %v2769_v21 = vadd.f32 %v5791_v55, %v6902_v46 }
0x1a70   :  { %v2761_v45 = vadd.f32 %v2760_v42, %v6902_v46  ;;  %v5792_v3 = vpop.f32.mrb[58].mxu0 }
0x1a71   :  { %v2763_v31 = vpop.f32.mrb[59].mxu0  ;;  %v2772_v57 = vadd.f32 %v5792_v3, %v6902_v46  ;;  %v2781_v6 = vsel %vm125_vm1, %v2769_v21, -inf }
0x1a72   :  { %v2764_v40 = vadd.f32 %v2763_v31, %v6902_v46  ;;  %v2775_v18 = vsel %vm125_vm1, %v2761_v45, -inf }
0x1a73   :  { %2776 = vmax.xlane.f32.xlu0 %v2775_v18  ;;  %v2784_v23 = vsel %vm125_vm1, %v2772_v57, -inf }
0x1a74   :  { %v2778_v28 = vsel %vm125_vm1, %v2764_v40, -inf }
0x1a75   :  { %2779 = vmax.xlane.f32.xlu1 %v2778_v28 }
0x1a77   :  { %2782 = vmax.xlane.f32.xlu0 %v2781_v6 }
0x1a7b   :  { %2785 = vmax.xlane.f32.xlu0 %v2784_v23 }
0x1afb   :  { %v5807_v63 = vpop.f32.mrb[60].mxu0 }
0x1afc   :  { %v2934_v27 = vpop.f32.mrb[61].mxu0  ;;  %v2943_v7 = vadd.f32 %v5807_v63, %v6916_v5 }
0x1afd   :  { %v2935_v30 = vadd.f32 %v2934_v27, %v6916_v5  ;;  %v5808_v62 = vpop.f32.mrb[62].mxu0 }
0x1afe   :  { %v2937_v53 = vpop.f32.mrb[63].mxu0  ;;  %v2946_v39 = vadd.f32 %v5808_v62, %v6916_v5  ;;  %v2955_v16 = vsel %vm125_vm1, %v2943_v7, -inf }
0x1aff   :  { %v2938_v11 = vadd.f32 %v2937_v53, %v6916_v5  ;;  %v2949_v12 = vsel %vm125_vm1, %v2935_v30, -inf }
0x1b00   :  { %2950 = vmax.xlane.f32.xlu0 %v2949_v12  ;;  %v2777_v56 = vpop.xlane.xlu0 %2776  ;;  %v2958_v50 = vsel %vm125_vm1, %v2946_v39, -inf }
0x1b01   :  { %v2787_v24 = vsub.f32 %v2761_v45, %v2777_v56  ;;  %v2952_v13 = vsel %vm125_vm1, %v2938_v11, -inf }
0x1b02   :  { %2953 = vmax.xlane.f32.xlu1 %v2952_v13  ;;  %v2780_v61 = vpop.xlane.xlu1 %2779 }
0x1b03   :  { %v2791_v14 = vmul.f32 1.442695, %v2787_v24  ;;  %v2788_v8 = vsub.f32 %v2764_v40, %v2780_v61 }
0x1b04   :  { %2956 = vmax.xlane.f32.xlu0 %v2955_v16  ;;  %v2783_v4 = vpop.xlane.xlu0 %2782 }
0x1b05   :  { %6366 = vpow2.f32 %v2791_v14  ;;  %v2793_v44 = vmul.f32 1.442695, %v2788_v8  ;;  %v2789_v49 = vsub.f32 %v2769_v21, %v2783_v4 }
0x1b06   :  { %2959 = vmax.xlane.f32.xlu1 %v2958_v50 }
0x1b07   :  { %6368 = vpow2.f32 %v2793_v44  ;;  %v2795_v51 = vmul.f32 1.442695, %v2789_v49 }
0x1b08   :  { %v2786_v34 = vpop.xlane.xlu0 %2785 }
0x1b09   :  { %6370 = vpow2.f32 %v2795_v51  ;;  %v2790_v2 = vsub.f32 %v2772_v57, %v2786_v34 }
0x1b0b   :  { %v2797_v17 = vmul.f32 1.442695, %v2790_v2 }
0x1b0d   :  { %6372 = vpow2.f32 %v2797_v17 }
0x1b0f   :  { %v6367_v15 = vpop.eup %6366 }
0x1b10   :  { %v2799_v59 = vsel %vm125_vm1, %v6367_v15, 0.0 }
0x1b11   :  { %v6369_v25 = vpop.eup %6368  ;;  %2800 = vadd.xlane.f32.xlu0 %v2799_v59 }
0x1b12   :  { %v2802_v35 = vsel %vm125_vm1, %v6369_v25, 0.0 }
0x1b13   :  { %v6371_v47 = vpop.eup %6370  ;;  %2803 = vadd.xlane.f32.xlu1 %v2802_v35 }
0x1b14   :  { %v2805_v26 = vsel %vm125_vm1, %v6371_v47, 0.0 }
0x1b15   :  { %2806 = vadd.xlane.f32.xlu0 %v2805_v26 }
0x1b17   :  { %v6373_v0 = vpop.eup %6372 }
0x1b18   :  { %v2808_v9 = vsel %vm125_vm1, %v6373_v0, 0.0 }
0x1b19   :  { %2809 = vadd.xlane.f32.xlu1 %v2808_v9 }
0x1b2a   :  { %2823 = vrot.lane.b32.xlu1 %v7582_v58, %s6583_s8 }
0x1b2b   :  { %2821 = vrot.lane.b32.xlu0 %v7584_v38, %s6583_s8 }
0x1b2e   :  { %2995 = vrot.lane.b32.xlu1 %v7600_v1, %s6583_s8 }
0x1b8d   :  { %v2951_v52 = vpop.xlane.xlu0 %2950 }
0x1b8e   :  { %v2961_v19 = vsub.f32 %v2935_v30, %v2951_v52 }
0x1b8f   :  { %v2954_v32 = vpop.xlane.xlu1 %2953 }
0x1b90   :  { %v2962_v55 = vsub.f32 %v2938_v11, %v2954_v32  ;;  %v2965_v45 = vmul.f32 1.442695, %v2961_v19 }
0x1b91   :  { %v2957_v36 = vpop.xlane.xlu0 %2956 }
0x1b92   :  { %v2963_v42 = vsub.f32 %v2943_v7, %v2957_v36  ;;  %v2967_v40 = vmul.f32 1.442695, %v2962_v55 }
0x1b93   :  { %v2960_v3 = vpop.xlane.xlu1 %2959 }
0x1b94   :  { %v2969_v31 = vmul.f32 1.442695, %v2963_v42  ;;  %v2964_v21 = vsub.f32 %v2946_v39, %v2960_v3 }
0x1b96   :  { %6374 = vpow2.f32 %v2969_v31  ;;  %v2971_v18 = vmul.f32 1.442695, %v2964_v21 }
0x1b97   :  { %6376 = vpow2.f32 %v2965_v45 }
0x1b98   :  { %6378 = vpow2.f32 %v2971_v18 }
0x1b99   :  { %6380 = vpow2.f32 %v2967_v40 }
0x1b9e   :  { %v2801_v28 = vpop.xlane.xlu0 %2800 }
0x1b9f   :  { %6382 = vrcp.f32 %v2801_v28 }
0x1ba0   :  { %v7640_v57 = vpop.eup %6374  ;;  %v2804_v6 = vpop.xlane.xlu1 %2803 }
0x1ba1   :  { %v6377_v23 = vpop.eup %6376  ;;  %6384 = vrcp.f32 %v2804_v6  ;;  %v2979_v63 = vsel %vm125_vm1, %v7640_v57, 0.0 }
0x1ba2   :  { %v6379_v27 = vpop.eup %6378  ;;  %2980 = vadd.xlane.f32.xlu0 %v2979_v63  ;;  %v2807_v30 = vpop.xlane.xlu0 %2806  ;;  %v2973_v7 = vsel %vm125_vm1, %v6377_v23, 0.0 }
0x1ba3   :  { %v2982_v62 = vsel %vm125_vm1, %v6379_v27, 0.0  ;;  %v6381_v53 = vpop.eup %6380  ;;  %6386 = vrcp.f32 %v2807_v30 }
0x1ba4   :  { %2983 = vadd.xlane.f32.xlu1 %v2982_v62  ;;  %v2976_v56 = vsel %vm125_vm1, %v6381_v53, 0.0 }
0x1ba6   :  { %v2810_v11 = vpop.xlane.xlu1 %2809  ;;  %2974 = vadd.xlane.f32.xlu0 %v2973_v7  ;;  %v2822_v12 = vpop.permute.xlu0 %2821 }
0x1ba7   :  { %6388 = vrcp.f32 %v2810_v11  ;;  %5793 = vmatprep.subr.bf16.mxu1 %v2822_v12 }
0x1ba8   :  { %2977 = vadd.xlane.f32.xlu1 %v2976_v56  ;;  %5794 = vmatpush3.bf16.msra.mxu1 %v2822_v12 }
0x1ba9   :  { %v6383_v39 = vpop.eup %6382 }
0x1baa   :  { %v2824_v24 = vpop.permute.xlu1 %2823  ;;  %v2815_v61 = vmul.f32 %v6383_v39, %v6367_v15 }
0x1bab   :  { %v6385_v13 = vpop.eup %6384  ;;  %5795 = vmatprep.subr.bf16.mxu1 %v2824_v24 }
0x1bac   :  { %5796 = vmatpush3.bf16.msra.mxu1 %v2824_v24  ;;  %v2816_v14 = vmul.f32 %v6385_v13, %v6369_v25 }
0x1bad   :  { %v6387_v4 = vpop.eup %6386 }
0x1bae   :  { %v2996_v8 = vpop.permute.xlu1 %2995  ;;  %v2819_v16 = vpack.c.bf16 %v2816_v14, %v2815_v61  ;;  %v2817_v49 = vmul.f32 %v6387_v4, %v6371_v47 }
0x1baf   :  { %5809 = vmatprep.subr.bf16.mxu1 %v2996_v8 }
0x1bb0   :  { %5797 = vmatprep.mubr.msk.bf16.mxu1 %vm125_vm1, %v2819_v16 }
0x1bb1   :  { %v6389_v44 = vpop.eup %6388 }
0x1bb2   :  { %v2818_v50 = vmul.f32 %v6389_v44, %v6373_v0 }
0x1bb4   :  { %v2820_v51 = vpack.c.bf16 %v2818_v50, %v2817_v49 }
0x1bb6   :  { %5798 = vmatmul.mubr.msk.bf16.vlgmr.msra.gmra.mrb[48].mxu1 %vm125_vm1, %v2820_v51 }
0x1bb7   :  { %5810 = vmatpush3.bf16.msra.mxu1 %v2996_v8 }
0x1bb9   :  { %2997 = vrot.lane.b32.xlu1 %v7598_v41, %s6583_s8  ;;  %s8353_s8 = smov 72  }
0x1bbc   :  { %3060 = vrot.lane.b32.xlu0 %v7584_v38, %s6584_s4 }
0x1bbd   :  { %3062 = vrot.lane.b32.xlu1 %v7582_v58, %s6584_s4 }
0x1bc0   :  { %3056 = vrot.lane.b32.xlu0 %v7584_v38, %s6585_s26 }
0x1bc1   :  { %3058 = vrot.lane.b32.xlu1 %v7582_v58, %s6585_s26 }
0x1c2f   :  { %v2981_v34 = vpop.xlane.xlu0 %2980 }
0x1c31   :  { %v2984_v2 = vpop.xlane.xlu1 %2983 }
0x1c32   :  { %6390 = vrcp.f32 %v2984_v2 }
0x1c33   :  { %v2975_v17 = vpop.xlane.xlu0 %2974 }
0x1c34   :  { %6392 = vrcp.f32 %v2975_v17 }
0x1c35   :  { %6394 = vrcp.f32 %v2981_v34  ;;  %v2978_v15 = vpop.xlane.xlu1 %2977 }
0x1c36   :  { %6396 = vrcp.f32 %v2978_v15 }
0x1c37   :  { %v3061_v25 = vpop.permute.xlu0 %3060 }
0x1c38   :  { %v3071_v45 = vsel %vm386_vm2, %v3061_v25, 0 }
0x1c39   :  { %v2998_v59 = vpop.permute.xlu1 %2997 }
0x1c3a   :  { %5811 = vmatprep.subr.bf16.mxu1 %v2998_v59 }
0x1c3b   :  { %5812 = vmatpush3.bf16.msra.mxu1 %v2998_v59  ;;  %v3057_v42 = vpop.permute.xlu0 %3056 }
0x1c3c   :  { %5981 = vmatprep.subr.msk.bf16.mxu1 %vm386_vm2, %v3061_v25  ;;  %v6391_v35 = vpop.eup %6390 }
0x1c3d   :  { %v2992_v9 = vmul.f32 %v6391_v35, %v6379_v27  ;;  %v3063_v3 = vpop.permute.xlu1 %3062 }
0x1c3e   :  { %v6393_v47 = vpop.eup %6392  ;;  %v3074_v31 = vsel %vm386_vm2, %v3063_v3, 0 }
0x1c3f   :  { %v6395_v26 = vpop.eup %6394  ;;  %v2989_v52 = vmul.f32 %v6393_v47, %v6377_v23 }
0x1c40   :  { %v6397_v0 = vpop.eup %6396  ;;  %v2991_v32 = vmul.f32 %v6395_v26, %v7640_v57 }
0x1c41   :  { %v2990_v19 = vmul.f32 %v6397_v0, %v6381_v53  ;;  %v3059_v21 = vpop.permute.xlu1 %3058 }
0x1c42   :  { %v2994_v55 = vpack.c.bf16 %v2992_v9, %v2991_v32 }
0x1c43   :  { %v2993_v36 = vpack.c.bf16 %v2990_v19, %v2989_v52 }
0x1c45   :  { %5813 = vmatprep.mubr.msk.bf16.mxu1 %vm125_vm1, %v2993_v36 }
0x1c46   :  { %5814 = vmatmul.mubr.msk.bf16.vlgmr.msra.gmra.mrb[52].mxu1 %vm125_vm1, %v2994_v55 }
0x1c47   :  { %5818 = vmatpush3.bf16.xpose.msra.mxu1 %v3071_v45  ;;  %5821 = vmatprep.mubr.msk.bf16.mxu1 %vm386_vm2, %v3057_v42 }
0x1c48   :  { %5982 = vmatprep.subr.msk.bf16.mxu1 %vm386_vm2, %v3063_v3 }
0x1c4f   :  { %5820 = vmatpush3.bf16.xpose.msra.mxu1 %v3074_v31 }
0x1c56   :  { %5822 = vmatmul.mubr.msk.bf16.vlgmr.msra.gmra.mrb[56].mxu1 %vm386_vm2, %v3059_v21 }
0x1c89   :  { %v7668_v40 = vpop.f32.mrb[48].mxu1 }
0x1c8a   :  { %v7670_v18 = vpop.f32.mrb[49].mxu1 }
0x1c8b   :  { %v7672_v28 = vpop.f32.mrb[50].mxu1 }
0x1c8c   :  { %v7674_v57 = vpop.f32.mrb[51].mxu1 }
0x1d19   :  { %v7676_v6 = vpop.f32.mrb[52].mxu1 }
0x1d1a   :  { %v7678_v23 = vpop.f32.mrb[53].mxu1 }
0x1d1b   :  { %v7680_v63 = vpop.f32.mrb[54].mxu1 }
0x1d1c   :  { %v7682_v27 = vpop.f32.mrb[55].mxu1 }
0x1d29   :  { %v5823_v30 = vpop.f32.mrb[56].mxu1 }
0x1d2a   :  { %v3110_v62 = vpop.f32.mrb[57].mxu1  ;;  %v3119_v12 = vadd.f32 %v5823_v30, %v6902_v46 }
0x1d2b   :  { %v3111_v53 = vadd.f32 %v3110_v62, %v6902_v46  ;;  %v5824_v7 = vpop.f32.mrb[58].mxu1 }
0x1d2c   :  { %v3113_v11 = vpop.f32.mrb[59].mxu1  ;;  %v3122_v13 = vadd.f32 %v5824_v7, %v6902_v46  ;;  %v3131_v61 = vsel %vm125_vm1, %v3119_v12, -inf }
0x1d2d   :  { %v3114_v56 = vadd.f32 %v3113_v11, %v6902_v46  ;;  %v3125_v39 = vsel %vm125_vm1, %v3111_v53, -inf }
0x1d2e   :  { %3126 = vmax.xlane.f32.xlu0 %v3125_v39  ;;  %v3134_v14 = vsel %vm125_vm1, %v3122_v13, -inf }
0x1d2f   :  { %v3128_v24 = vsel %vm125_vm1, %v3114_v56, -inf }
0x1d30   :  { %3129 = vmax.xlane.f32.xlu1 %v3128_v24 }
0x1d32   :  { %3132 = vmax.xlane.f32.xlu0 %v3131_v61 }
0x1d36   :  { %3135 = vmax.xlane.f32.xlu0 %v3134_v14 }
0x1d41   :  { %3173 = vrot.lane.b32.xlu1 %v7582_v58, %s6586_s2 }
0x1dbb   :  { %v3127_v8 = vpop.xlane.xlu0 %3126 }
0x1dbc   :  { %v3137_v16 = vsub.f32 %v3111_v53, %v3127_v8 }
0x1dbd   :  { %v3130_v4 = vpop.xlane.xlu1 %3129 }
0x1dbe   :  { %v3141_v50 = vmul.f32 1.442695, %v3137_v16  ;;  %v3138_v51 = vsub.f32 %v3114_v56, %v3130_v4 }
0x1dbf   :  { %v3133_v44 = vpop.xlane.xlu0 %3132 }
0x1dc0   :  { %v3139_v49 = vsub.f32 %v3119_v12, %v3133_v44  ;;  %v3143_v15 = vmul.f32 1.442695, %v3138_v51 }
0x1dc1   :  { %v3174_v32 = vpop.permute.xlu1 %3173 }
0x1dc2   :  { %v3145_v34 = vmul.f32 1.442695, %v3139_v49 }
0x1dc3   :  { %v3136_v2 = vpop.xlane.xlu0 %3135 }
0x1dc4   :  { %6398 = vpow2.f32 %v3145_v34  ;;  %v3140_v17 = vsub.f32 %v3122_v13, %v3136_v2 }
0x1dc5   :  { %6400 = vpow2.f32 %v3141_v50 }
0x1dc6   :  { %v3147_v59 = vmul.f32 1.442695, %v3140_v17 }
0x1dc8   :  { %6402 = vpow2.f32 %v3147_v59 }
0x1dc9   :  { %6404 = vpow2.f32 %v3143_v15 }
0x1dce   :  { %v6399_v25 = vpop.eup %6398 }
0x1dcf   :  { %v3155_v35 = vsel %vm125_vm1, %v6399_v25, 0.0  ;;  %v6401_v47 = vpop.eup %6400 }
0x1dd0   :  { %3156 = vadd.xlane.f32.xlu0 %v3155_v35  ;;  %v3149_v0 = vsel %vm125_vm1, %v6401_v47, 0.0 }
0x1dd2   :  { %v6403_v26 = vpop.eup %6402 }
0x1dd3   :  { %v3158_v9 = vsel %vm125_vm1, %v6403_v26, 0.0  ;;  %v6405_v52 = vpop.eup %6404 }
0x1dd4   :  { %3150 = vadd.xlane.f32.xlu0 %v3149_v0  ;;  %3159 = vadd.xlane.f32.xlu1 %v3158_v9  ;;  %v3152_v19 = vsel %vm125_vm1, %v6405_v52, 0.0 }
0x1dd8   :  { %3153 = vadd.xlane.f32.xlu1 %v3152_v19 }
0x1de9   :  { %3236 = vrot.lane.b32.xlu1 %v7600_v1, %s6584_s4 }
0x1dea   :  { %3171 = vrot.lane.b32.xlu0 %v7584_v38, %s6586_s2 }
0x1ded   :  { %3238 = vrot.lane.b32.xlu1 %v7598_v41, %s6584_s4  ;;  %s8354_s4 = smov 104  }
0x1dee   :  { %3232 = vrot.lane.b32.xlu0 %v7600_v1, %s6585_s26 }
0x1df1   :  { %3234 = vrot.lane.b32.xlu1 %v7598_v41, %s6585_s26  ;;  %s8355_s26 = smov 40  }
0x1e5d   :  { %v3157_v36 = vpop.xlane.xlu0 %3156 }
0x1e61   :  { %v3160_v55 = vpop.xlane.xlu1 %3159  ;;  %v3151_v42 = vpop.xlane.xlu0 %3150 }
0x1e62   :  { %6406 = vrcp.f32 %v3160_v55 }
0x1e63   :  { %6408 = vrcp.f32 %v3151_v42 }
0x1e64   :  { %6410 = vrcp.f32 %v3157_v36 }
0x1e65   :  { %v3154_v45 = vpop.xlane.xlu1 %3153  ;;  %v3172_v3 = vpop.permute.xlu0 %3171 }
0x1e66   :  { %6412 = vrcp.f32 %v3154_v45  ;;  %5825 = vmatprep.subr.bf16.mxu0 %v3172_v3 }
0x1e67   :  { %5826 = vmatpush3.bf16.msra.mxu0 %v3172_v3 }
0x1e68   :  { %5827 = vmatprep.subr.bf16.mxu0 %v3174_v32 }
0x1e69   :  { %v3237_v31 = vpop.permute.xlu1 %3236  ;;  %v3233_v13 = vpop.permute.xlu0 %3232 }
0x1e6a   :  { %v3247_v61 = vsel %vm386_vm2, %v3237_v31, 0 }
0x1e6b   :  { %5828 = vmatpush3.bf16.msra.mxu0 %v3174_v32 }
0x1e6c   :  { %5983 = vmatprep.subr.msk.bf16.mxu0 %vm386_vm2, %v3237_v31  ;;  %v6407_v21 = vpop.eup %6406 }
0x1e6d   :  { %v6409_v30 = vpop.eup %6408  ;;  %v3168_v7 = vmul.f32 %v6407_v21, %v6403_v26  ;;  %v3239_v14 = vpop.permute.xlu1 %3238 }
0x1e6e   :  { %v6411_v62 = vpop.eup %6410  ;;  %v3165_v11 = vmul.f32 %v6409_v30, %v6401_v47  ;;  %v3250_v8 = vsel %vm386_vm2, %v3239_v14, 0 }
0x1e6f   :  { %v3167_v56 = vmul.f32 %v6411_v62, %v6399_v25 }
0x1e70   :  { %v6413_v53 = vpop.eup %6412 }
0x1e71   :  { %v3166_v12 = vmul.f32 %v6413_v53, %v6405_v52  ;;  %v3170_v24 = vpack.c.bf16 %v3168_v7, %v3167_v56  ;;  %v3235_v16 = vpop.permute.xlu1 %3234 }
0x1e73   :  { %v3169_v39 = vpack.c.bf16 %v3166_v12, %v3165_v11 }
0x1e75   :  { %5829 = vmatprep.mubr.msk.bf16.mxu0 %vm125_vm1, %v3169_v39 }
0x1e76   :  { %5830 = vmatmul.mubr.msk.bf16.vlgmr.msra.gmra.mrb[64].mxu0 %vm125_vm1, %v3170_v24 }
0x1e77   :  { %5834 = vmatpush3.bf16.xpose.msra.mxu0 %v3247_v61  ;;  %5837 = vmatprep.mubr.msk.bf16.mxu0 %vm386_vm2, %v3233_v13 }
0x1e78   :  { %5984 = vmatprep.subr.msk.bf16.mxu0 %vm386_vm2, %v3239_v14 }
0x1e7f   :  { %5836 = vmatpush3.bf16.xpose.msra.mxu0 %v3250_v8 }
0x1e86   :  { %5838 = vmatmul.mubr.msk.bf16.vlgmr.msra.gmra.mrb[68].mxu0 %vm386_vm2, %v3235_v16 }
0x1f49   :  { %v7716_v4 = vpop.f32.mrb[64].mxu0 }
0x1f4a   :  { %v7718_v44 = vpop.f32.mrb[65].mxu0 }
0x1f4b   :  { %v7720_v49 = vpop.f32.mrb[66].mxu0 }
0x1f4c   :  { %v6085_v50 = vpack.i.bf16 %v7720_v49, %v7716_v4  ;;  %v7724_v51 = vpop.f32.mrb[67].mxu0 }
0x1f4d   :  { %v6080_v34 = vpack.i.bf16 %v7724_v51, %v7718_v44  ;;  %v6152_v51 = vld [vmem:[%s8349_s28 + $0x10] sm:$0xff]  }
0x1f59   :  { %v5839_v2 = vpop.f32.mrb[68].mxu0 }
0x1f5a   :  { %v3286_v17 = vpop.f32.mrb[69].mxu0  ;;  %v3295_v35 = vadd.f32 %v5839_v2, %v6916_v5 }
0x1f5b   :  { %v3287_v15 = vadd.f32 %v3286_v17, %v6916_v5  ;;  %v5840_v59 = vpop.f32.mrb[70].mxu0 }
0x1f5c   :  { %v3289_v25 = vpop.f32.mrb[71].mxu0  ;;  %v3298_v9 = vadd.f32 %v5840_v59, %v6916_v5  ;;  %v3307_v52 = vsel %vm125_vm1, %v3295_v35, -inf }
0x1f5d   :  { %v3290_v47 = vadd.f32 %v3289_v25, %v6916_v5  ;;  %v3301_v26 = vsel %vm125_vm1, %v3287_v15, -inf }
0x1f5e   :  { %3302 = vmax.xlane.f32.xlu0 %v3301_v26  ;;  %v3310_v19 = vsel %vm125_vm1, %v3298_v9, -inf }
0x1f5f   :  { %v3304_v0 = vsel %vm125_vm1, %v3290_v47, -inf }
0x1f60   :  { %3305 = vmax.xlane.f32.xlu1 %v3304_v0 }
0x1f62   :  { %3308 = vmax.xlane.f32.xlu0 %v3307_v52 }
0x1f66   :  { %3311 = vmax.xlane.f32.xlu0 %v3310_v19 }
0x1f71   :  { %3349 = vrot.lane.b32.xlu1 %v7598_v41, %s6586_s2 }
0x1feb   :  { %v3303_v32 = vpop.xlane.xlu0 %3302 }
0x1fec   :  { %v3313_v36 = vsub.f32 %v3287_v15, %v3303_v32 }
0x1fed   :  { %v3306_v55 = vpop.xlane.xlu1 %3305 }
0x1fee   :  { %v3317_v3 = vmul.f32 1.442695, %v3313_v36  ;;  %v3314_v31 = vsub.f32 %v3290_v47, %v3306_v55 }
0x1fef   :  { %v3309_v42 = vpop.xlane.xlu0 %3308 }
0x1ff0   :  { %v3315_v45 = vsub.f32 %v3295_v35, %v3309_v42  ;;  %v3319_v53 = vmul.f32 1.442695, %v3314_v31 }
0x1ff1   :  { %v3350_v8 = vpop.permute.xlu1 %3349 }
0x1ff2   :  { %v3321_v21 = vmul.f32 1.442695, %v3315_v45 }
0x1ff3   :  { %v3312_v30 = vpop.xlane.xlu0 %3311 }
0x1ff4   :  { %6414 = vpow2.f32 %v3321_v21  ;;  %v3316_v62 = vsub.f32 %v3298_v9, %v3312_v30 }
0x1ff5   :  { %6416 = vpow2.f32 %v3317_v3 }
0x1ff6   :  { %v3323_v7 = vmul.f32 1.442695, %v3316_v62 }
0x1ff8   :  { %6418 = vpow2.f32 %v3323_v7 }
0x1ff9   :  { %6420 = vpow2.f32 %v3319_v53 }
0x1ffe   :  { %v6415_v11 = vpop.eup %6414 }
0x1fff   :  { %v3331_v12 = vsel %vm125_vm1, %v6415_v11, 0.0  ;;  %v6417_v56 = vpop.eup %6416 }
0x2000   :  { %3332 = vadd.xlane.f32.xlu0 %v3331_v12  ;;  %v3325_v24 = vsel %vm125_vm1, %v6417_v56, 0.0 }
0x2002   :  { %v6419_v39 = vpop.eup %6418 }
0x2003   :  { %v3334_v13 = vsel %vm125_vm1, %v6419_v39, 0.0  ;;  %v6421_v61 = vpop.eup %6420 }
0x2004   :  { %3326 = vadd.xlane.f32.xlu0 %v3325_v24  ;;  %3335 = vadd.xlane.f32.xlu1 %v3334_v13  ;;  %v3328_v14 = vsel %vm125_vm1, %v6421_v61, 0.0 }
0x2008   :  { %3329 = vadd.xlane.f32.xlu1 %v3328_v14 }
0x2019   :  { %3412 = vrot.lane.b32.xlu1 %v7584_v38, %s6587_s9 }
0x201a   :  { %3347 = vrot.lane.b32.xlu0 %v7600_v1, %s6586_s2  ;;  %s8356_s2 = smov 8  }
0x201d   :  { %3414 = vrot.lane.b32.xlu1 %v7582_v58, %s6587_s9 }
0x201e   :  { %3408 = vrot.lane.b32.xlu0 %v7584_v38, %s8351_s20 }
0x2021   :  { %3410 = vrot.lane.b32.xlu1 %v7582_v58, %s8351_s20 }
0x208d   :  { %v3333_v16 = vpop.xlane.xlu0 %3332 }
0x2091   :  { %v3336_v2 = vpop.xlane.xlu1 %3335  ;;  %v3327_v17 = vpop.xlane.xlu0 %3326 }
0x2092   :  { %6422 = vrcp.f32 %v3336_v2 }
0x2093   :  { %6424 = vrcp.f32 %v3327_v17 }
0x2094   :  { %6426 = vrcp.f32 %v3333_v16 }
0x2095   :  { %v3330_v15 = vpop.xlane.xlu1 %3329  ;;  %v3348_v59 = vpop.permute.xlu0 %3347 }
0x2096   :  { %6428 = vrcp.f32 %v3330_v15  ;;  %5841 = vmatprep.subr.bf16.mxu1 %v3348_v59 }
0x2097   :  { %5842 = vmatpush3.bf16.msra.mxu1 %v3348_v59 }
0x2098   :  { %5843 = vmatprep.subr.bf16.mxu1 %v3350_v8 }
0x2099   :  { %v3413_v25 = vpop.permute.xlu1 %3412  ;;  %v3409_v42 = vpop.permute.xlu0 %3408 }
0x209a   :  { %v3423_v45 = vsel %vm386_vm2, %v3413_v25, 0 }
0x209b   :  { %5844 = vmatpush3.bf16.msra.mxu1 %v3350_v8 }
0x209c   :  { %5985 = vmatprep.subr.msk.bf16.mxu1 %vm386_vm2, %v3413_v25  ;;  %v6423_v35 = vpop.eup %6422 }
0x209d   :  { %v6425_v47 = vpop.eup %6424  ;;  %v3344_v9 = vmul.f32 %v6423_v35, %v6419_v39  ;;  %v3415_v3 = vpop.permute.xlu1 %3414 }
0x209e   :  { %v6427_v26 = vpop.eup %6426  ;;  %v3341_v52 = vmul.f32 %v6425_v47, %v6417_v56  ;;  %v3426_v31 = vsel %vm386_vm2, %v3415_v3, 0 }
0x209f   :  { %v3343_v32 = vmul.f32 %v6427_v26, %v6415_v11 }
0x20a0   :  { %v6429_v0 = vpop.eup %6428 }
0x20a1   :  { %v3342_v19 = vmul.f32 %v6429_v0, %v6421_v61  ;;  %v3346_v55 = vpack.c.bf16 %v3344_v9, %v3343_v32  ;;  %v3411_v21 = vpop.permute.xlu1 %3410 }
0x20a3   :  { %v3345_v36 = vpack.c.bf16 %v3342_v19, %v3341_v52 }
0x20a5   :  { %5845 = vmatprep.mubr.msk.bf16.mxu1 %vm125_vm1, %v3345_v36 }
0x20a6   :  { %5846 = vmatmul.mubr.msk.bf16.vlgmr.msra.gmra.mrb[60].mxu1 %vm125_vm1, %v3346_v55 }
0x20a7   :  { %5850 = vmatpush3.bf16.xpose.msra.mxu1 %v3423_v45  ;;  %5853 = vmatprep.mubr.msk.bf16.mxu1 %vm386_vm2, %v3409_v42 }
0x20a8   :  { %5986 = vmatprep.subr.msk.bf16.mxu1 %vm386_vm2, %v3415_v3 }
0x20af   :  { %5852 = vmatpush3.bf16.xpose.msra.mxu1 %v3426_v31 }
0x20b6   :  { %5854 = vmatmul.mubr.msk.bf16.vlgmr.msra.gmra.mrb[64].mxu1 %vm386_vm2, %v3411_v21 }
0x2179   :  { %v7760_v30 = vpop.f32.mrb[60].mxu1 }
0x217a   :  { %v7762_v62 = vpop.f32.mrb[61].mxu1 }
0x217b   :  { %v7764_v53 = vpop.f32.mrb[62].mxu1 }
0x217c   :  { %v6115_v7 = vpack.i.bf16 %v7764_v53, %v7760_v30  ;;  %v7768_v11 = vpop.f32.mrb[63].mxu1 }
0x217d   :  { %v6110_v12 = vpack.i.bf16 %v7768_v11, %v7762_v62 }
0x2189   :  { %v5855_v56 = vpop.f32.mrb[64].mxu1 }
0x218a   :  { %v3462_v39 = vpop.f32.mrb[65].mxu1  ;;  %v3471_v14 = vadd.f32 %v5855_v56, %v6902_v46 }
0x218b   :  { %v3463_v24 = vadd.f32 %v3462_v39, %v6902_v46  ;;  %v5856_v13 = vpop.f32.mrb[66].mxu1 }
0x218c   :  { %v3465_v61 = vpop.f32.mrb[67].mxu1  ;;  %v3474_v17 = vadd.f32 %v5856_v13, %v6902_v46  ;;  %v3483_v15 = vsel %vm125_vm1, %v3471_v14, -inf }
0x218d   :  { %v3466_v8 = vadd.f32 %v3465_v61, %v6902_v46  ;;  %v3477_v16 = vsel %vm125_vm1, %v3463_v24, -inf }
0x218e   :  { %3478 = vmax.xlane.f32.xlu0 %v3477_v16  ;;  %v3486_v59 = vsel %vm125_vm1, %v3474_v17, -inf }
0x218f   :  { %v3480_v2 = vsel %vm125_vm1, %v3466_v8, -inf }
0x2190   :  { %3481 = vmax.xlane.f32.xlu1 %v3480_v2 }
0x2192   :  { %3484 = vmax.xlane.f32.xlu0 %v3483_v15 }
0x2196   :  { %3487 = vmax.xlane.f32.xlu0 %v3486_v59 }
0x21a1   :  { %3525 = vrot.lane.b32.xlu1 %v7582_v58, %s8352_s10 }
0x221b   :  { %v3479_v25 = vpop.xlane.xlu0 %3478 }
0x221c   :  { %v3489_v35 = vsub.f32 %v3463_v24, %v3479_v25 }
0x221d   :  { %v3482_v47 = vpop.xlane.xlu1 %3481 }
0x221e   :  { %v3493_v9 = vmul.f32 1.442695, %v3489_v35  ;;  %v3490_v52 = vsub.f32 %v3466_v8, %v3482_v47 }
0x221f   :  { %v3485_v26 = vpop.xlane.xlu0 %3484 }
0x2220   :  { %v3491_v0 = vsub.f32 %v3471_v14, %v3485_v26  ;;  %v3495_v55 = vmul.f32 1.442695, %v3490_v52 }
0x2221   :  { %v3526_v61 = vpop.permute.xlu1 %3525 }
0x2222   :  { %v3497_v19 = vmul.f32 1.442695, %v3491_v0 }
0x2223   :  { %v3488_v32 = vpop.xlane.xlu0 %3487 }
0x2224   :  { %6430 = vpow2.f32 %v3497_v19  ;;  %v3492_v36 = vsub.f32 %v3474_v17, %v3488_v32 }
0x2225   :  { %6432 = vpow2.f32 %v3493_v9 }
0x2226   :  { %v3499_v42 = vmul.f32 1.442695, %v3492_v36 }
0x2228   :  { %6434 = vpow2.f32 %v3499_v42 }
0x2229   :  { %6436 = vpow2.f32 %v3495_v55 }
0x222e   :  { %v6431_v45 = vpop.eup %6430 }
0x222f   :  { %v3507_v3 = vsel %vm125_vm1, %v6431_v45, 0.0  ;;  %v6433_v31 = vpop.eup %6432 }
0x2230   :  { %3508 = vadd.xlane.f32.xlu0 %v3507_v3  ;;  %v3501_v56 = vsel %vm125_vm1, %v6433_v31, 0.0 }
0x2232   :  { %v6435_v21 = vpop.eup %6434 }
0x2233   :  { %v3510_v39 = vsel %vm125_vm1, %v6435_v21, 0.0  ;;  %v6437_v24 = vpop.eup %6436 }
0x2234   :  { %3502 = vadd.xlane.f32.xlu0 %v3501_v56  ;;  %3511 = vadd.xlane.f32.xlu1 %v3510_v39  ;;  %v3504_v13 = vsel %vm125_vm1, %v6437_v24, 0.0 }
0x2238   :  { %3505 = vadd.xlane.f32.xlu1 %v3504_v13 }
0x2249   :  { %3588 = vrot.lane.b32.xlu1 %v7600_v1, %s6587_s9 }
0x224a   :  { %3523 = vrot.lane.b32.xlu0 %v7584_v38, %s8352_s10 }
0x224d   :  { %3590 = vrot.lane.b32.xlu1 %v7598_v41, %s6587_s9  ;;  %s8357_s9 = smov 16  }
0x224e   :  { %3584 = vrot.lane.b32.xlu0 %v7600_v1, %s8351_s20 }
0x2251   :  { %3586 = vrot.lane.b32.xlu1 %v7598_v41, %s8351_s20  ;;  %s4934_s20 = sld [smem:[#allocation5]] }
0x22bd   :  { %v3509_v14 = vpop.xlane.xlu0 %3508 }
0x22c1   :  { %v3512_v8 = vpop.xlane.xlu1 %3511  ;;  %v3503_v16 = vpop.xlane.xlu0 %3502 }
0x22c2   :  { %6438 = vrcp.f32 %v3512_v8 }
0x22c3   :  { %6440 = vrcp.f32 %v3503_v16 }
0x22c4   :  { %6442 = vrcp.f32 %v3509_v14 }
0x22c5   :  { %v3506_v2 = vpop.xlane.xlu1 %3505  ;;  %v3524_v17 = vpop.permute.xlu0 %3523 }
0x22c6   :  { %6444 = vrcp.f32 %v3506_v2  ;;  %5857 = vmatprep.subr.bf16.mxu0 %v3524_v17 }
0x22c7   :  { %5858 = vmatpush3.bf16.msra.mxu0 %v3524_v17 }
0x22c8   :  { %5859 = vmatprep.subr.bf16.mxu0 %v3526_v61 }
0x22c9   :  { %v3589_v15 = vpop.permute.xlu1 %3588  ;;  %v3585_v55 = vpop.permute.xlu0 %3584 }
0x22ca   :  { %v3599_v36 = vsel %vm386_vm2, %v3589_v15, 0 }
0x22cb   :  { %5860 = vmatpush3.bf16.msra.mxu0 %v3526_v61 }
0x22cc   :  { %5987 = vmatprep.subr.msk.bf16.mxu0 %vm386_vm2, %v3589_v15  ;;  %v6439_v59 = vpop.eup %6438 }
0x22cd   :  { %v6441_v25 = vpop.eup %6440  ;;  %v3520_v26 = vmul.f32 %v6439_v59, %v6435_v21  ;;  %v3591_v42 = vpop.permute.xlu1 %3590 }
0x22ce   :  { %v6443_v35 = vpop.eup %6442  ;;  %v3517_v0 = vmul.f32 %v6441_v25, %v6433_v31  ;;  %v3602_v3 = vsel %vm386_vm2, %v3591_v42, 0 }
0x22cf   :  { %v3519_v52 = vmul.f32 %v6443_v35, %v6431_v45 }
0x22d0   :  { %v6445_v47 = vpop.eup %6444 }
0x22d1   :  { %v3518_v9 = vmul.f32 %v6445_v47, %v6437_v24  ;;  %v3522_v32 = vpack.c.bf16 %v3520_v26, %v3519_v52  ;;  %v3587_v31 = vpop.permute.xlu1 %3586 }
0x22d3   :  { %v3521_v19 = vpack.c.bf16 %v3518_v9, %v3517_v0 }
0x22d5   :  { %5861 = vmatprep.mubr.msk.bf16.mxu0 %vm125_vm1, %v3521_v19 }
0x22d6   :  { %5862 = vmatmul.mubr.msk.bf16.vlgmr.msra.gmra.mrb[72].mxu0 %vm125_vm1, %v3522_v32 }
0x22d7   :  { %5866 = vmatpush3.bf16.xpose.msra.mxu0 %v3599_v36  ;;  %5869 = vmatprep.mubr.msk.bf16.mxu0 %vm386_vm2, %v3585_v55 }
0x22d8   :  { %5988 = vmatprep.subr.msk.bf16.mxu0 %vm386_vm2, %v3591_v42 }
0x22df   :  { %5868 = vmatpush3.bf16.xpose.msra.mxu0 %v3602_v3 }
0x22e6   :  { %5870 = vmatmul.mubr.msk.bf16.vlgmr.msra.gmra.mrb[76].mxu0 %vm386_vm2, %v3587_v31 }
0x23a9   :  { %v7804_v45 = vpop.f32.mrb[72].mxu0 }
0x23aa   :  { %v7806_v21 = vpop.f32.mrb[73].mxu0 }
0x23ab   :  { %v7808_v56 = vpop.f32.mrb[74].mxu0 }
0x23ac   :  { %v6095_v39 = vpack.i.bf16 %v7808_v56, %v7804_v45  ;;  %v7812_v24 = vpop.f32.mrb[75].mxu0 }
0x23ad   :  { %v6090_v13 = vpack.i.bf16 %v7812_v24, %v7806_v21 }
0x23b9   :  { %v5871_v61 = vpop.f32.mrb[76].mxu0 }
0x23ba   :  { %v3638_v14 = vpop.f32.mrb[77].mxu0  ;;  %v3647_v17 = vadd.f32 %v5871_v61, %v6916_v5 }
0x23bb   :  { %v3639_v8 = vadd.f32 %v3638_v14, %v6916_v5  ;;  %v5872_v16 = vpop.f32.mrb[78].mxu0 }
0x23bc   :  { %v3641_v2 = vpop.f32.mrb[79].mxu0  ;;  %v3650_v35 = vadd.f32 %v5872_v16, %v6916_v5  ;;  %v3659_v47 = vsel %vm125_vm1, %v3647_v17, -inf }
0x23bd   :  { %v3642_v15 = vadd.f32 %v3641_v2, %v6916_v5  ;;  %v3653_v59 = vsel %vm125_vm1, %v3639_v8, -inf }
0x23be   :  { %3654 = vmax.xlane.f32.xlu0 %v3653_v59  ;;  %v3662_v26 = vsel %vm125_vm1, %v3650_v35, -inf }
0x23bf   :  { %v3656_v25 = vsel %vm125_vm1, %v3642_v15, -inf }
0x23c0   :  { %3657 = vmax.xlane.f32.xlu1 %v3656_v25 }
0x23c2   :  { %3660 = vmax.xlane.f32.xlu0 %v3659_v47 }
0x23c6   :  { %3663 = vmax.xlane.f32.xlu0 %v3662_v26 }
0x23d1   :  { %3701 = vrot.lane.b32.xlu1 %v7598_v41, %s8352_s10 }
0x244b   :  { %v3655_v0 = vpop.xlane.xlu0 %3654 }
0x244c   :  { %v3665_v9 = vsub.f32 %v3639_v8, %v3655_v0 }
0x244d   :  { %v3658_v52 = vpop.xlane.xlu1 %3657 }
0x244e   :  { %v3669_v36 = vmul.f32 1.442695, %v3665_v9  ;;  %v3666_v55 = vsub.f32 %v3642_v15, %v3658_v52 }
0x244f   :  { %v3661_v19 = vpop.xlane.xlu0 %3660 }
0x2450   :  { %v3667_v32 = vsub.f32 %v3647_v17, %v3661_v19  ;;  %v3671_v61 = vmul.f32 1.442695, %v3666_v55 }
0x2451   :  { %v3702_v47 = vpop.permute.xlu1 %3701 }
0x2452   :  { %v3673_v42 = vmul.f32 1.442695, %v3667_v32 }
0x2453   :  { %v3664_v3 = vpop.xlane.xlu0 %3663 }
0x2454   :  { %6446 = vpow2.f32 %v3673_v42  ;;  %v3668_v31 = vsub.f32 %v3650_v35, %v3664_v3 }
0x2455   :  { %6448 = vpow2.f32 %v3669_v36 }
0x2456   :  { %v3675_v14 = vmul.f32 1.442695, %v3668_v31 }
0x2458   :  { %6450 = vpow2.f32 %v3675_v14 }
0x2459   :  { %6452 = vpow2.f32 %v3671_v61 }
0x245e   :  { %v6447_v16 = vpop.eup %6446 }
0x245f   :  { %v3683_v2 = vsel %vm125_vm1, %v6447_v16, 0.0  ;;  %v6449_v59 = vpop.eup %6448 }
0x2460   :  { %3684 = vadd.xlane.f32.xlu0 %v3683_v2  ;;  %v3677_v25 = vsel %vm125_vm1, %v6449_v59, 0.0 }
0x2462   :  { %v6451_v8 = vpop.eup %6450 }
0x2463   :  { %v3686_v17 = vsel %vm125_vm1, %v6451_v8, 0.0  ;;  %v6453_v15 = vpop.eup %6452 }
0x2464   :  { %3678 = vadd.xlane.f32.xlu0 %v3677_v25  ;;  %3687 = vadd.xlane.f32.xlu1 %v3686_v17  ;;  %v3680_v35 = vsel %vm125_vm1, %v6453_v15, 0.0 }
0x2468   :  { %3681 = vadd.xlane.f32.xlu1 %v3680_v35 }
0x2479   :  { %3764 = vrot.lane.b32.xlu1 %v7584_v38, %s8353_s8 }
0x247a   :  { %3699 = vrot.lane.b32.xlu0 %v7600_v1, %s8352_s10  ;;  %s4935_s10 = scalar_lea.vmem [#allocation2], %s4934_s20 }
0x247d   :  { %3766 = vrot.lane.b32.xlu1 %v7582_v58, %s8353_s8 }
0x247e   :  { %3760 = vrot.lane.b32.xlu0 %v7584_v38, %s8354_s4 }
0x2481   :  { %3762 = vrot.lane.b32.xlu1 %v7582_v58, %s8354_s4 }
0x24ed   :  { %v3685_v26 = vpop.xlane.xlu0 %3684 }
0x24f1   :  { %v3688_v0 = vpop.xlane.xlu1 %3687  ;;  %v3679_v9 = vpop.xlane.xlu0 %3678 }
0x24f2   :  { %6454 = vrcp.f32 %v3688_v0 }
0x24f3   :  { %6456 = vrcp.f32 %v3679_v9 }
0x24f4   :  { %6458 = vrcp.f32 %v3685_v26 }
0x24f5   :  { %v3682_v52 = vpop.xlane.xlu1 %3681  ;;  %v3700_v19 = vpop.permute.xlu0 %3699 }
0x24f6   :  { %6460 = vrcp.f32 %v3682_v52  ;;  %5873 = vmatprep.subr.bf16.mxu1 %v3700_v19 }
0x24f7   :  { %5874 = vmatpush3.bf16.msra.mxu1 %v3700_v19 }
0x24f8   :  { %5875 = vmatprep.subr.bf16.mxu1 %v3702_v47 }
0x24f9   :  { %v3765_v32 = vpop.permute.xlu1 %3764  ;;  %v3761_v26 = vpop.permute.xlu0 %3760 }
0x24fa   :  { %v3775_v35 = vsel %vm386_vm2, %v3765_v32, 0 }
0x24fb   :  { %5876 = vmatpush3.bf16.msra.mxu1 %v3702_v47 }
0x24fc   :  { %5989 = vmatprep.subr.msk.bf16.mxu1 %vm386_vm2, %v3765_v32  ;;  %v6455_v36 = vpop.eup %6454 }
0x24fd   :  { %v6457_v55 = vpop.eup %6456  ;;  %v3696_v31 = vmul.f32 %v6455_v36, %v6451_v8  ;;  %v3767_v47 = vpop.permute.xlu1 %3766 }
0x24fe   :  { %v6459_v42 = vpop.eup %6458  ;;  %v3693_v61 = vmul.f32 %v6457_v55, %v6449_v59  ;;  %v3778_v8 = vsel %vm386_vm2, %v3767_v47, 0 }
0x24ff   :  { %v3695_v2 = vmul.f32 %v6459_v42, %v6447_v16 }
0x2500   :  { %v6461_v3 = vpop.eup %6460 }
0x2501   :  { %v3694_v14 = vmul.f32 %v6461_v3, %v6453_v15  ;;  %v3698_v17 = vpack.c.bf16 %v3696_v31, %v3695_v2  ;;  %v3763_v59 = vpop.permute.xlu1 %3762 }
0x2503   :  { %v3697_v25 = vpack.c.bf16 %v3694_v14, %v3693_v61 }
0x2505   :  { %5877 = vmatprep.mubr.msk.bf16.mxu1 %vm125_vm1, %v3697_v25 }
0x2506   :  { %5878 = vmatmul.mubr.msk.bf16.vlgmr.msra.gmra.mrb[68].mxu1 %vm125_vm1, %v3698_v17 }
0x2507   :  { %5882 = vmatpush3.bf16.xpose.msra.mxu1 %v3775_v35  ;;  %5885 = vmatprep.mubr.msk.bf16.mxu1 %vm386_vm2, %v3761_v26 }
0x2508   :  { %5990 = vmatprep.subr.msk.bf16.mxu1 %vm386_vm2, %v3767_v47 }
0x250f   :  { %5884 = vmatpush3.bf16.xpose.msra.mxu1 %v3778_v8 }
0x2516   :  { %5886 = vmatmul.mubr.msk.bf16.vlgmr.msra.gmra.mrb[72].mxu1 %vm386_vm2, %v3763_v59 }
0x25d9   :  { %v7848_v16 = vpop.f32.mrb[68].mxu1 }
0x25da   :  { %v7850_v15 = vpop.f32.mrb[69].mxu1 }
0x25db   :  { %v7852_v0 = vpop.f32.mrb[70].mxu1 }
0x25dc   :  { %v7856_v52 = vpop.f32.mrb[71].mxu1 }
0x25dd   :  { %v6120_v19 = vpack.i.bf16 %v7856_v52, %v7850_v15 }
0x25e9   :  { %v5887_v32 = vpop.f32.mrb[72].mxu1 }
0x25ea   :  { %v3814_v36 = vpop.f32.mrb[73].mxu1  ;;  %v3823_v31 = vadd.f32 %v5887_v32, %v6902_v46 }
0x25eb   :  { %v3815_v55 = vadd.f32 %v3814_v36, %v6902_v46  ;;  %v5888_v42 = vpop.f32.mrb[74].mxu1 }
0x25ec   :  { %v3817_v3 = vpop.f32.mrb[75].mxu1  ;;  %v3826_v25 = vadd.f32 %v5888_v42, %v6902_v46  ;;  %v3835_v17 = vsel %vm125_vm1, %v3823_v31, -inf }
0x25ed   :  { %v3818_v61 = vadd.f32 %v3817_v3, %v6902_v46  ;;  %v3829_v14 = vsel %vm125_vm1, %v3815_v55, -inf }
0x25ee   :  { %3830 = vmax.xlane.f32.xlu0 %v3829_v14  ;;  %v3838_v35 = vsel %vm125_vm1, %v3826_v25, -inf }
0x25ef   :  { %v3832_v2 = vsel %vm125_vm1, %v3818_v61, -inf }
0x25f0   :  { %3833 = vmax.xlane.f32.xlu1 %v3832_v2 }
0x25f2   :  { %3836 = vmax.xlane.f32.xlu0 %v3835_v17 }
0x25f6   :  { %3839 = vmax.xlane.f32.xlu0 %v3838_v35 }
0x2601   :  { %3877 = vrot.lane.b32.xlu1 %v7582_v58, %s8355_s26 }
0x267b   :  { %v3831_v26 = vpop.xlane.xlu0 %3830 }
0x267c   :  { %v3841_v47 = vsub.f32 %v3815_v55, %v3831_v26 }
0x267d   :  { %v3834_v8 = vpop.xlane.xlu1 %3833 }
0x267e   :  { %v3845_v36 = vmul.f32 1.442695, %v3841_v47  ;;  %v3842_v3 = vsub.f32 %v3818_v61, %v3834_v8 }
0x267f   :  { %v3837_v59 = vpop.xlane.xlu0 %3836 }
0x2680   :  { %v3843_v32 = vsub.f32 %v3823_v31, %v3837_v59  ;;  %v3847_v42 = vmul.f32 1.442695, %v3842_v3 }
0x2682   :  { %v3849_v14 = vmul.f32 1.442695, %v3843_v32 }
0x2683   :  { %v3840_v2 = vpop.xlane.xlu0 %3839 }
0x2684   :  { %6462 = vpow2.f32 %v3849_v14  ;;  %v3844_v46 = vsub.f32 %v3826_v25, %v3840_v2 }
0x2685   :  { %6464 = vpow2.f32 %v3845_v36 }
0x2686   :  { %v3851_v17 = vmul.f32 1.442695, %v3844_v46 }
0x2688   :  { %6466 = vpow2.f32 %v3851_v17 }
0x2689   :  { %6468 = vpow2.f32 %v3847_v42 }
0x268e   :  { %v6463_v35 = vpop.eup %6462 }
0x268f   :  { %v3859_v9 = vsel %vm125_vm1, %v6463_v35, 0.0  ;;  %v6465_v58 = vpop.eup %6464 }
0x2690   :  { %3860 = vadd.xlane.f32.xlu0 %v3859_v9  ;;  %v3853_v26 = vsel %vm125_vm1, %v6465_v58, 0.0  ;;  %v3878_v9 = vpop.permute.xlu1 %3877 }
0x2692   :  { %v6467_v55 = vpop.eup %6466 }
0x2693   :  { %v3862_v31 = vsel %vm125_vm1, %v6467_v55, 0.0  ;;  %v6469_v61 = vpop.eup %6468 }
0x2694   :  { %3854 = vadd.xlane.f32.xlu0 %v3853_v26  ;;  %3863 = vadd.xlane.f32.xlu1 %v3862_v31  ;;  %v3856_v25 = vsel %vm125_vm1, %v6469_v61, 0.0 }
0x2698   :  { %3857 = vadd.xlane.f32.xlu1 %v3856_v25 }
0x26a9   :  { %3940 = vrot.lane.b32.xlu1 %v7600_v1, %s8353_s8 }
0x26aa   :  { %3875 = vrot.lane.b32.xlu0 %v7584_v38, %s8355_s26 }
0x26ad   :  { %3942 = vrot.lane.b32.xlu1 %v7598_v41, %s8353_s8 }
0x26ae   :  { %3936 = vrot.lane.b32.xlu0 %v7600_v1, %s8354_s4 }
0x26b1   :  { %3938 = vrot.lane.b32.xlu1 %v7598_v41, %s8354_s4 }
0x271d   :  { %v3861_v47 = vpop.xlane.xlu0 %3860 }
0x2721   :  { %v3864_v8 = vpop.xlane.xlu1 %3863  ;;  %v3855_v59 = vpop.xlane.xlu0 %3854 }
0x2722   :  { %6470 = vrcp.f32 %v3864_v8 }
0x2723   :  { %6472 = vrcp.f32 %v3855_v59 }
0x2724   :  { %6474 = vrcp.f32 %v3861_v47 }
0x2725   :  { %v3858_v32 = vpop.xlane.xlu1 %3857  ;;  %v3876_v36 = vpop.permute.xlu0 %3875 }
0x2726   :  { %6476 = vrcp.f32 %v3858_v32  ;;  %5889 = vmatprep.subr.bf16.mxu0 %v3876_v36 }
0x2727   :  { %5890 = vmatpush3.bf16.msra.mxu0 %v3876_v36 }
0x2728   :  { %5891 = vmatprep.subr.bf16.mxu0 %v3878_v9 }
0x2729   :  { %v3941_v38 = vpop.permute.xlu1 %3940  ;;  %v3937_v59 = vpop.permute.xlu0 %3936 }
0x272a   :  { %v3951_v8 = vsel %vm386_vm2, %v3941_v38, 0 }
0x272b   :  { %5892 = vmatpush3.bf16.msra.mxu0 %v3878_v9 }
0x272c   :  { %5991 = vmatprep.subr.msk.bf16.mxu0 %vm386_vm2, %v3941_v38  ;;  %v6471_v3 = vpop.eup %6470 }
0x272d   :  { %v6473_v14 = vpop.eup %6472  ;;  %v3872_v42 = vmul.f32 %v6471_v3, %v6467_v55  ;;  %v3943_v9 = vpop.permute.xlu1 %3942 }
0x272e   :  { %v6475_v2 = vpop.eup %6474  ;;  %v3869_v17 = vmul.f32 %v6473_v14, %v6465_v58  ;;  %v3954_v55 = vsel %vm386_vm2, %v3943_v9, 0 }
0x272f   :  { %v3871_v31 = vmul.f32 %v6475_v2, %v6463_v35 }
0x2730   :  { %v6477_v46 = vpop.eup %6476 }
0x2731   :  { %v3870_v26 = vmul.f32 %v6477_v46, %v6469_v61  ;;  %v3874_v47 = vpack.c.bf16 %v3872_v42, %v3871_v31  ;;  %v3939_v58 = vpop.permute.xlu1 %3938 }
0x2733   :  { %v3873_v25 = vpack.c.bf16 %v3870_v26, %v3869_v17 }
0x2735   :  { %5893 = vmatprep.mubr.msk.bf16.mxu0 %vm125_vm1, %v3873_v25 }
0x2736   :  { %5894 = vmatmul.mubr.msk.bf16.vlgmr.msra.gmra.mrb[80].mxu0 %vm125_vm1, %v3874_v47 }
0x2737   :  { %5898 = vmatpush3.bf16.xpose.msra.mxu0 %v3951_v8  ;;  %5901 = vmatprep.mubr.msk.bf16.mxu0 %vm386_vm2, %v3937_v59 }
0x2738   :  { %5992 = vmatprep.subr.msk.bf16.mxu0 %vm386_vm2, %v3943_v9 }
0x273f   :  { %5900 = vmatpush3.bf16.xpose.msra.mxu0 %v3954_v55 }
0x2746   :  { %5902 = vmatmul.mubr.msk.bf16.vlgmr.msra.gmra.mrb[84].mxu0 %vm386_vm2, %v3939_v58 }
0x2809   :  { %v5895_v35 = vpop.f32.mrb[80].mxu0 }
0x280a   :  { %v3921_v61 = vpop.f32.mrb[81].mxu0 }
0x280b   :  { %v5896_v32 = vpop.f32.mrb[82].mxu0 }
0x280c   :  { %v6105_v36 = vpack.i.bf16 %v5896_v32, %v5895_v35  ;;  %v3924_v38 = vpop.f32.mrb[83].mxu0 }
0x280d   :  { %v6100_v3 = vpack.i.bf16 %v3924_v38, %v3921_v61 }
0x2819   :  { %v5903_v14 = vpop.f32.mrb[84].mxu0 }
0x281a   :  { %v3990_v2 = vpop.f32.mrb[85].mxu0  ;;  %v3999_v26 = vadd.f32 %v5903_v14, %v6916_v5 }
0x281b   :  { %v3991_v46 = vadd.f32 %v3990_v2, %v6916_v5  ;;  %v5904_v42 = vpop.f32.mrb[86].mxu0 }
0x281c   :  { %v3993_v17 = vpop.f32.mrb[87].mxu0  ;;  %v4002_v8 = vadd.f32 %v5904_v42, %v6916_v5  ;;  %v4011_v59 = vsel %vm125_vm1, %v3999_v26, -inf }
0x281d   :  { %v3994_v31 = vadd.f32 %v3993_v17, %v6916_v5  ;;  %v4005_v25 = vsel %vm125_vm1, %v3991_v46, -inf }
0x281e   :  { %4006 = vmax.xlane.f32.xlu0 %v4005_v25  ;;  %v4014_v9 = vsel %vm125_vm1, %v4002_v8, -inf }
0x281f   :  { %v4008_v47 = vsel %vm125_vm1, %v3994_v31, -inf }
0x2820   :  { %4009 = vmax.xlane.f32.xlu1 %v4008_v47 }
0x2822   :  { %4012 = vmax.xlane.f32.xlu0 %v4011_v59 }
0x2826   :  { %4015 = vmax.xlane.f32.xlu0 %v4014_v9 }
0x28ab   :  { %v4007_v55 = vpop.xlane.xlu0 %4006 }
0x28ac   :  { %v4017_v58 = vsub.f32 %v3991_v46, %v4007_v55 }
0x28ad   :  { %v4010_v35 = vpop.xlane.xlu1 %4009 }
0x28ae   :  { %v4021_v38 = vmul.f32 1.442695, %v4017_v58  ;;  %v4018_v14 = vsub.f32 %v3994_v31, %v4010_v35 }
0x28af   :  { %v4013_v61 = vpop.xlane.xlu0 %4012 }
0x28b0   :  { %v4019_v32 = vsub.f32 %v3999_v26, %v4013_v61  ;;  %v4023_v47 = vmul.f32 1.442695, %v4018_v14 }
0x28b2   :  { %v4025_v2 = vmul.f32 1.442695, %v4019_v32 }
0x28b3   :  { %v4016_v17 = vpop.xlane.xlu0 %4015 }
0x28b4   :  { %6478 = vpow2.f32 %v4025_v2  ;;  %v4020_v25 = vsub.f32 %v4002_v8, %v4016_v17 }
0x28b5   :  { %6480 = vpow2.f32 %v4021_v38 }
0x28b6   :  { %v4027_v5 = vmul.f32 1.442695, %v4020_v25 }
0x28b8   :  { %6482 = vpow2.f32 %v4027_v5 }
0x28b9   :  { %6484 = vpow2.f32 %v4023_v47 }
0x28be   :  { %v6479_v42 = vpop.eup %6478 }
0x28bf   :  { %v4035_v59 = vsel %vm125_vm1, %v6479_v42, 0.0  ;;  %v6481_v9 = vpop.eup %6480 }
0x28c0   :  { %4036 = vadd.xlane.f32.xlu0 %v4035_v59  ;;  %v4029_v55 = vsel %vm125_vm1, %v6481_v9, 0.0 }
0x28c2   :  { %v6483_v46 = vpop.eup %6482 }
0x28c3   :  { %v4038_v26 = vsel %vm125_vm1, %v6483_v46, 0.0  ;;  %v6485_v31 = vpop.eup %6484 }
0x28c4   :  { %4030 = vadd.xlane.f32.xlu0 %v4029_v55  ;;  %4039 = vadd.xlane.f32.xlu1 %v4038_v26  ;;  %v4032_v8 = vsel %vm125_vm1, %v6485_v31, 0.0 }
0x28c8   :  { %4033 = vadd.xlane.f32.xlu1 %v4032_v8 }
0x28d9   :  { %4053 = vrot.lane.b32.xlu1 %v7598_v41, %s8355_s26  ;;  %v8359_v41 = vpack.i.bf16 %v7852_v0, %v7848_v16 }
0x28da   :  { %4051 = vrot.lane.b32.xlu0 %v7600_v1, %s8355_s26 }
0x28dd   :  { %6081 = vrot.lane.b32.xlu1 %v6080_v34, %s8356_s2 }
0x28de   :  { %6091 = vrot.lane.b32.xlu0 %v6090_v13, %s8357_s9 }
0x28e1   :  { %6086 = vrot.lane.b32.xlu1 %v6085_v50, %s8356_s2 }
0x28e2   :  { %6101 = vrot.lane.b32.xlu0 %v6100_v3, %s8358_s0 }
0x28e5   :  { %6096 = vrot.lane.b32.xlu1 %v6095_v39, %s8357_s9 }
0x28e6   :  { %6111 = vrot.lane.b32.xlu0 %v6110_v12, %s8356_s2 }
0x28e9   :  { %6106 = vrot.lane.b32.xlu1 %v6105_v36, %s8358_s0 }
0x28ea   :  { %6121 = vrot.lane.b32.xlu0 %v6120_v19, %s8357_s9 }
0x28ed   :  { %6116 = vrot.lane.b32.xlu1 %v6115_v7, %s8356_s2 }
0x28f1   :  { %6126 = vrot.lane.b32.xlu1 %v8359_v41, %s8357_s9 }
0x294d   :  { %v4037_v1 = vpop.xlane.xlu0 %4036 }
0x2951   :  { %v4040_v4 = vpop.xlane.xlu1 %4039  ;;  %v4031_v44 = vpop.xlane.xlu0 %4030 }
0x2952   :  { %6486 = vrcp.f32 %v4040_v4 }
0x2953   :  { %6488 = vrcp.f32 %v4031_v44 }
0x2954   :  { %6490 = vrcp.f32 %v4037_v1 }
0x2955   :  { %v4034_v49 = vpop.xlane.xlu1 %4033  ;;  %v4052_v50 = vpop.permute.xlu0 %4051 }
0x2956   :  { %6492 = vrcp.f32 %v4034_v49  ;;  %5905 = vmatprep.subr.bf16.mxu1 %v4052_v50 }
0x2957   :  { %5906 = vmatpush3.bf16.msra.mxu1 %v4052_v50 }
0x2959   :  { %v4054_v34 = vpop.permute.xlu1 %4053  ;;  %v6092_v30 = vpop.permute.xlu0 %6091 }
0x295a   :  { %5907 = vmatprep.subr.bf16.mxu1 %v4054_v34  ;;  %v6094_v39 = vunpack.i.h.bf16 %v6092_v30  ;;  %v6093_v24 = vunpack.i.l.bf16 %v6092_v30 }
0x295b   :  { %5908 = vmatpush3.bf16.msra.mxu1 %v4054_v34 }
0x295c   :  { %v6487_v62 = vpop.eup %6486  ;;  %5913 = vmatprep.subr.bf16.mxu1 %v6152_v51 }
0x295d   :  { %v6082_v53 = vpop.permute.xlu1 %6081  ;;  %v6102_v7 = vpop.permute.xlu0 %6101  ;;  %v4048_v56 = vmul.f32 %v6487_v62, %v6483_v46 }
0x295e   :  { %v6489_v11 = vpop.eup %6488  ;;  %v6084_v12 = vunpack.i.h.bf16 %v6082_v53  ;;  %v6083_v45 = vunpack.i.l.bf16 %v6082_v53  ;;  %v6104_v0 = vunpack.i.h.bf16 %v6102_v7  ;;  %v6103_v52 = vunpack.i.l.bf16 %v6102_v7  ;;  %v7973_v7 = vld [vmem:[%s8350_s29 + $0x1] ss:$0 sm:$0xff] }
0x295f   :  { %v6491_v21 = vpop.eup %6490  ;;  %v4045_v58 = vmul.f32 %v6489_v11, %v6481_v9 }
0x2960   :  { %v6493_v13 = vpop.eup %6492  ;;  %v4161_v16 = vsel %vm386_vm2, %v7674_v57, %v6084_v12  ;;  %v4160_v15 = vsel %vm386_vm2, %v7670_v18, %v6083_v45  ;;  %v4047_v61 = vmul.f32 %v6491_v21, %v6479_v42  ;;  %v6153_v18 = vld [vmem:[%s8349_s28 + $0x18] sm:$0xff]  }
0x2961   :  { %v4164_v19 = vsel %vm1843_vm3, %v4160_v15, %v6093_v24  ;;  %v4165_v36 = vsel %vm1843_vm3, %v4161_v16, %v6094_v39  ;;  %v6087_v3 = vpop.permute.xlu1 %6086  ;;  %v4046_v35 = vmul.f32 %v6493_v13, %v6485_v31 }
0x2962   :  { %v4168_v32 = vsel %vm1848_vm4, %v4164_v19, %v6103_v52  ;;  %v4169_v38 = vsel %vm1848_vm4, %v4165_v36, %v6104_v0  ;;  %v4050_v57 = vpack.c.bf16 %v4048_v56, %v4047_v61  ;;  %v6089_v25 = vunpack.i.h.bf16 %v6087_v3  ;;  %v6112_v0 = vpop.permute.xlu0 %6111 }
0x2963   :  { %v4232_v14 = vpack.c.bf16 %v4169_v38, %v4168_v32  ;;  %v4049_v2 = vpack.c.bf16 %v4046_v35, %v4045_v58  ;;  %v6088_v47 = vunpack.i.l.bf16 %v6087_v3  ;;  %v6114_v19 = vunpack.i.h.bf16 %v6112_v0 }
0x2964   :  { %v4163_v9 = vsel %vm386_vm2, %v7672_v28, %v6089_v25  ;;  %v6113_v36 = vunpack.i.l.bf16 %v6112_v0 }
0x2965   :  { %v6097_v17 = vpop.permute.xlu1 %6096  ;;  %5909 = vmatprep.mubr.msk.bf16.mxu1 %vm125_vm1, %v4049_v2  ;;  %v4162_v46 = vsel %vm386_vm2, %v7668_v40, %v6088_v47 }
0x2966   :  { %5910 = vmatmul.mubr.msk.bf16.vlgmr.msra.gmra.mrb[76].mxu1 %vm125_vm1, %v4050_v57  ;;  %v6099_v5 = vunpack.i.h.bf16 %v6097_v17  ;;  %v6098_v42 = vunpack.i.l.bf16 %v6097_v17  ;;  %v6122_v3 = vpop.permute.xlu0 %6121  ;;  %v4220_v2 = vsel %vm386_vm2, %v7678_v23, %v6113_v36 }
0x2967   :  { %5917 = vmatprep.mubr.msk.bf16.mxu1 %vm125_vm1, %v4232_v14  ;;  %5914 = vmatpush3.bf16.msra.mxu1 %v6152_v51  ;;  %v6124_v32 = vunpack.i.h.bf16 %v6122_v3  ;;  %v6123_v38 = vunpack.i.l.bf16 %v6122_v3  ;;  %v4221_v14 = vsel %vm386_vm2, %v7682_v27, %v6114_v19 }
0x2968   :  { %5915 = vmatprep.subr.bf16.mxu1 %v6153_v18  ;;  %v4166_v31 = vsel %vm1843_vm3, %v4162_v46, %v6098_v42  ;;  %v4167_v8 = vsel %vm1843_vm3, %v4163_v9, %v6099_v5 }
0x2969   :  { %v6107_v59 = vpop.permute.xlu1 %6106  ;;  %v4224_v27 = vsel %vm1843_vm3, %v4220_v2, %v6123_v38  ;;  %v4225_v23 = vsel %vm1843_vm3, %v4221_v14, %v6124_v32 }
0x296a   :  { %v6109_v55 = vunpack.i.h.bf16 %v6107_v59  ;;  %v6108_v26 = vunpack.i.l.bf16 %v6107_v59 }
0x296b   :  { %5916 = vmatpush3.bf16.msra.mxu1 %v6153_v18 }
0x296c   :  { %v4170_v41 = vsel %vm1848_vm4, %v4166_v31, %v6108_v26  ;;  %v4171_v1 = vsel %vm1848_vm4, %v4167_v8, %v6109_v55 }
0x296d   :  { %v4233_v4 = vpack.c.bf16 %v4171_v1, %v4170_v41 }
0x296f   :  { %5918 = vmatmul.mubr.msk.bf16.vlgmr.msra.gmra.mrb[80].mxu1 %vm125_vm1, %v4233_v4 }
0x2a39   :  { %v5911_v44 = vpop.f32.mrb[76].mxu1 }
0x2a3a   :  { %v4097_v49 = vpop.f32.mrb[77].mxu1 }
0x2a3b   :  { %v5912_v28 = vpop.f32.mrb[78].mxu1 }
0x2a3c   :  { %v6135_v50 = vpack.i.bf16 %v5912_v28, %v5911_v44  ;;  %v4100_v51 = vpop.f32.mrb[79].mxu1 }
0x2a3d   :  { %v6130_v40 = vpack.i.bf16 %v4100_v51, %v4097_v49 }
0x2a3e   :  { %6136 = vrot.lane.b32.xlu1 %v6135_v50, %s8358_s0 }
0x2a3f   :  { %6131 = vrot.lane.b32.xlu0 %v6130_v40, %s8358_s0 }
0x2a42   :  { %v5919_v34 = vpop.f32.mrb[80].mxu1 }
0x2a43   :  { %v4307_v30 = vpop.f32.mrb[81].mxu1  ;;  %v4316_v12 = vadd.f32 %v5919_v34, %v7973_v7 }
0x2a44   :  { %v5920_v62 = vpop.f32.mrb[82].mxu1  ;;  %v4308_v11 = vadd.f32 %v7973_v7, %v4307_v30 }
0x2a45   :  { %v4310_v53 = vpop.f32.mrb[83].mxu1  ;;  %v7980_v56 = vadd.f32 %v4316_v12, %v7553_v48  ;;  %v4319_v39 = vadd.f32 %v5920_v62, %v7973_v7 }
0x2a46   :  { %v4338_v45 = vadd.f32 %v4308_v11, %v7547_v22  ;;  %v4311_v21 = vadd.f32 %v7973_v7, %v4310_v53 }
0x2a47   :  { %v7988_v16 = vadd.f32 %v4319_v39, %v7555_v20  ;;  %v4356_v22 = vsel %vm125_vm1, %v7980_v56, 0.0 }
0x2a48   :  { %v7984_v24 = vadd.f32 %v4311_v21, %v7549_v60  ;;  %v4350_v13 = vsel %vm125_vm1, %v4338_v45, 0.0  ;;  %v6117_v60 = vpop.permute.xlu1 %6116 }
0x2a49   :  { %v4359_v48 = vsel %vm125_vm1, %v7988_v16, 0.0  ;;  %v6119_v20 = vunpack.i.h.bf16 %v6117_v60  ;;  %v6118_v58 = vunpack.i.l.bf16 %v6117_v60 }
0x2a4a   :  { %v4353_v15 = vsel %vm125_vm1, %v7984_v24, 0.0 }
0x2a4b   :  { %v4223_v18 = vsel %vm386_vm2, %v7680_v63, %v6119_v20  ;;  %v4222_v17 = vsel %vm386_vm2, %v7676_v6, %v6118_v58  ;;  %v6154_v20 = vld [vmem:[%s8292_s13 + $0x10] sm:$0xff]   ;;  %v6155_v58 = vld [vmem:[%s8292_s13 + $0x18] sm:$0xff]  }
0x2a4c   :  { %v6127_v52 = vpop.permute.xlu1 %6126  ;;  %5925 = vmatprep.subr.bf16.mxu0 %v6154_v20 }
0x2a4d   :  { %v6129_v35 = vunpack.i.h.bf16 %v6127_v52  ;;  %v6128_v61 = vunpack.i.l.bf16 %v6127_v52  ;;  %5926 = vmatpush3.bf16.msra.mxu0 %v6154_v20 }
0x2a4e   :  { %5927 = vmatprep.subr.bf16.mxu0 %v6155_v58 }
0x2a4f   :  { %v4226_v42 = vsel %vm1843_vm3, %v4222_v17, %v6128_v61  ;;  %v4227_v59 = vsel %vm1843_vm3, %v4223_v18, %v6129_v35 }
0x2a51   :  { %5928 = vmatpush3.bf16.msra.mxu0 %v6155_v58 }
0x2a5e   :  { %4351 = vadd.xlane.f32.xlu0 %v4350_v13 }
0x2a62   :  { %4354 = vadd.xlane.f32.xlu1 %v4353_v15  ;;  %4357 = vadd.xlane.f32.xlu0 %v4356_v22 }
0x2a66   :  { %4360 = vadd.xlane.f32.xlu0 %v4359_v48 }
0x2ab0   :  { %v6137_v57 = vpop.permute.xlu1 %6136 }
0x2ab1   :  { %v6139_v25 = vunpack.i.h.bf16 %v6137_v57  ;;  %v6138_v47 = vunpack.i.l.bf16 %v6137_v57  ;;  %v6132_v5 = vpop.permute.xlu0 %6131 }
0x2ab2   :  { %v6134_v9 = vunpack.i.h.bf16 %v6132_v5  ;;  %v6133_v46 = vunpack.i.l.bf16 %v6132_v5 }
0x2ab3   :  { %v4231_v55 = vsel %vm1848_vm4, %v4227_v59, %v6139_v25  ;;  %v4230_v63 = vsel %vm1848_vm4, %v4226_v42, %v6138_v47 }
0x2ab4   :  { %v4235_v26 = vpack.c.bf16 %v4231_v55, %v4230_v63  ;;  %v4228_v6 = vsel %vm1848_vm4, %v4224_v27, %v6133_v46  ;;  %v4229_v31 = vsel %vm1848_vm4, %v4225_v23, %v6134_v9 }
0x2ab5   :  { %v4234_v8 = vpack.c.bf16 %v4229_v31, %v4228_v6 }
0x2ab7   :  { %5921 = vmatprep.mubr.msk.bf16.mxu1 %vm125_vm1, %v4234_v8 }
0x2ab8   :  { %5922 = vmatmul.mubr.msk.bf16.gmra.mrb[84].mxu1 %vm125_vm1, %v4235_v26 }
0x2aeb   :  { %v4352_v41 = vpop.xlane.xlu0 %4351 }
0x2aec   :  { %v4374_v44 = vmul.f32 0.03125, %v4352_v41 }
0x2aee   :  { %v8019_v12 = vsub.f32 %v4338_v45, %v4374_v44 }
0x2aef   :  { %v4358_v1 = vpop.xlane.xlu0 %4357  ;;  %v4355_v49 = vpop.xlane.xlu1 %4354 }
0x2af0   :  { %v4375_v30 = vmul.f32 0.03125, %v4355_v49  ;;  %v4376_v39 = vmul.f32 0.03125, %v4358_v1 }
0x2af2   :  { %v8025_v48 = vsub.f32 %v7984_v24, %v4375_v30 }
0x2af3   :  { %v4361_v21 = vpop.xlane.xlu0 %4360 }
0x2af4   :  { %v4377_v60 = vmul.f32 0.03125, %v4361_v21 }
0x2b8b   :  { %v5923_v4 = vpop.f32.mrb[84].mxu1 }
0x2b8c   :  { %v4323_v28 = vpop.f32.mrb[85].mxu1  ;;  %v4332_v50 = vadd.f32 %v5923_v4, %v7973_v7 }
0x2b8d   :  { %v4324_v51 = vadd.f32 %v7973_v7, %v4323_v28  ;;  %v5924_v40 = vpop.f32.mrb[86].mxu1 }
0x2b8e   :  { %v4326_v34 = vpop.f32.mrb[87].mxu1  ;;  %v4335_v53 = vadd.f32 %v5924_v40, %v7973_v7  ;;  %v4344_v13 = vadd.f32 %v4332_v50, %v7572_v29  ;;  %v8036_v29 = vsub.f32 %v7988_v16, %v4377_v60 }
0x2b8f   :  { %v4342_v62 = vadd.f32 %v4324_v51, %v7564_v54  ;;  %v4327_v11 = vadd.f32 %v7973_v7, %v4326_v34  ;;  %v8030_v7 = vsub.f32 %v7980_v56, %v4376_v39  ;;  %v8078_v34 = vld [vmem:[%s8290_s11 + $0x1] ss:$0 sm:$0xff]  ;;  %s8360_s11 = sld [smem:[#allocation17_spill]] }
0x2b90   :  { %v4345_v54 = vadd.f32 %v4335_v53, %v7574_v33  ;;  %v4368_v45 = vsel %vm125_vm1, %v4344_v13, 0.0  ;;  %v4391_v33 = vmul.f32 %v8025_v48, %v8025_v48  ;;  %v4393_v36 = vmul.f32 %v8036_v29, %v8036_v29  ;;  %v5357_v39 = vld [vmem:[%s8291_s12 + $0x1] ss:$0 sm:$0xff] }
0x2b91   :  { %v4343_v15 = vadd.f32 %v4327_v11, %v7566_v10  ;;  %v4362_v22 = vsel %vm125_vm1, %v4342_v62, 0.0  ;;  %v4390_v10 = vmul.f32 %v8019_v12, %v8019_v12  ;;  %v4392_v56 = vmul.f32 %v8030_v7, %v8030_v7 }
0x2b92   :  { %4363 = vadd.xlane.f32.xlu0 %v4362_v22  ;;  %v4371_v24 = vsel %vm125_vm1, %v4345_v54, 0.0  ;;  %v4401_v19 = vsel %vm125_vm1, %v4391_v33, 0.0  ;;  %v4407_v3 = vsel %vm125_vm1, %v4393_v36, 0.0  ;;  %v6157_v33 = vld [vmem:[%s8294_s15 + $0x28] sm:$0xff]  }
0x2b93   :  { %v4365_v0 = vsel %vm125_vm1, %v4343_v15, 0.0  ;;  %v4398_v52 = vsel %vm125_vm1, %v4390_v10, 0.0  ;;  %v4404_v16 = vsel %vm125_vm1, %v4392_v56, 0.0 }
0x2b94   :  { %4366 = vadd.xlane.f32.xlu1 %v4365_v0 }
0x2b96   :  { %4369 = vadd.xlane.f32.xlu0 %v4368_v45 }
0x2b98   :  { %4372 = vadd.xlane.f32.xlu1 %v4371_v24 }
0x2b9a   :  { %4399 = vadd.xlane.f32.xlu0 %v4398_v52  ;;  %v6158_v52 = vld [vmem:[%s8294_s15 + $0x30] sm:$0xff]  }
0x2b9c   :  { %4402 = vadd.xlane.f32.xlu1 %v4401_v19 }
0x2b9e   :  { %4405 = vadd.xlane.f32.xlu0 %v4404_v16  ;;  %v6159_v16 = vld [vmem:[%s8294_s15 + $0x38] sm:$0xff]  }
0x2ba0   :  { %4408 = vadd.xlane.f32.xlu1 %v4407_v3 }
0x2c1f   :  { %v4364_v35 = vpop.xlane.xlu0 %4363 }
0x2c20   :  { %v4378_v61 = vmul.f32 0.03125, %v4364_v35 }
0x2c21   :  { %v4367_v32 = vpop.xlane.xlu1 %4366 }
0x2c22   :  { %v8055_v38 = vsub.f32 %v4342_v62, %v4378_v61  ;;  %v4379_v14 = vmul.f32 0.03125, %v4367_v32 }
0x2c23   :  { %v4370_v2 = vpop.xlane.xlu0 %4369 }
0x2c24   :  { %v8057_v57 = vsub.f32 %v4343_v15, %v4379_v14  ;;  %v4380_v18 = vmul.f32 0.03125, %v4370_v2  ;;  %v4394_v17 = vmul.f32 %v8055_v38, %v8055_v38 }
0x2c25   :  { %v4373_v25 = vpop.xlane.xlu1 %4372 }
0x2c26   :  { %v8061_v47 = vsub.f32 %v4344_v13, %v4380_v18  ;;  %v4381_v5 = vmul.f32 0.03125, %v4373_v25  ;;  %v4410_v42 = vsel %vm125_vm1, %v4394_v17, 0.0  ;;  %v4395_v59 = vmul.f32 %v8057_v57, %v8057_v57 }
0x2c27   :  { %4411 = vadd.xlane.f32.xlu0 %v4410_v42  ;;  %v4400_v9 = vpop.xlane.xlu0 %4399 }
0x2c28   :  { %v8066_v46 = vsub.f32 %v4345_v54, %v4381_v5  ;;  %v4422_v27 = vmul.f32 0.03125, %v4400_v9  ;;  %v4413_v23 = vsel %vm125_vm1, %v4395_v59, 0.0  ;;  %v4396_v55 = vmul.f32 %v8061_v47, %v8061_v47 }
0x2c29   :  { %v4403_v63 = vpop.xlane.xlu1 %4402  ;;  %4414 = vadd.xlane.f32.xlu1 %v4413_v23 }
0x2c2a   :  { %v4430_v26 = vadd.f32 1e-12, %v4422_v27  ;;  %v4423_v6 = vmul.f32 0.03125, %v4403_v63  ;;  %v4416_v31 = vsel %vm125_vm1, %v4396_v55, 0.0  ;;  %v4397_v8 = vmul.f32 %v8066_v46, %v8066_v46 }
0x2c2b   :  { %4417 = vadd.xlane.f32.xlu0 %v4416_v31  ;;  %v4406_v41 = vpop.xlane.xlu0 %4405 }
0x2c2c   :  { %6494 = vrsqrt.f32 %v4430_v26  ;;  %v4431_v1 = vadd.f32 1e-12, %v4423_v6  ;;  %v4424_v4 = vmul.f32 0.03125, %v4406_v41  ;;  %v4419_v44 = vsel %vm125_vm1, %v4397_v8, 0.0  ;;  %v5363_v41 = vld [vmem:[%s8293_s14 + $0x1] ss:$0 sm:$0xff] }
0x2c2d   :  { %4420 = vadd.xlane.f32.xlu1 %v4419_v44  ;;  %v4409_v49 = vpop.xlane.xlu1 %4408 }
0x2c2e   :  { %6496 = vrsqrt.f32 %v4431_v1  ;;  %v4432_v28 = vadd.f32 1e-12, %v4424_v4  ;;  %v4425_v50 = vmul.f32 0.03125, %v4409_v49 }
0x2c30   :  { %6498 = vrsqrt.f32 %v4432_v28  ;;  %v4433_v51 = vadd.f32 1e-12, %v4425_v50 }
0x2c32   :  { %6500 = vrsqrt.f32 %v4433_v51 }
0x2c36   :  { %v6495_v40 = vpop.eup %6494 }
0x2c37   :  { %v4446_v30 = vmul.f32 %v6495_v40, %v8019_v12 }
0x2c38   :  { %v6497_v62 = vpop.eup %6496 }
0x2c39   :  { %v4447_v53 = vmul.f32 %v6497_v62, %v8025_v48  ;;  %v4460_v11 = vmul.f32 %v8078_v34, %v4446_v30 }
0x2c3a   :  { %v6499_v21 = vpop.eup %6498 }
0x2c3b   :  { %v4448_v13 = vmul.f32 %v6499_v21, %v8030_v7  ;;  %v4461_v15 = vmul.f32 %v8078_v34, %v4447_v53  ;;  %v8090_v12 = vadd.f32 %v5357_v39, %v4460_v11 }
0x2c3c   :  { %v6501_v22 = vpop.eup %6500 }
0x2c3d   :  { %v4462_v60 = vmul.f32 %v8078_v34, %v4448_v13  ;;  %v4449_v54 = vmul.f32 %v6501_v22, %v8036_v29  ;;  %v8092_v0 = vadd.f32 %v5357_v39, %v4461_v15  ;;  %v6156_v29 = vld [vmem:[%s8294_s15 + $0x20] sm:$0xff]  }
0x2c3e   :  { %5937 = vmatprep.subr.bf16.mxu1 %v6156_v29 }
0x2c3f   :  { %v4463_v48 = vmul.f32 %v8078_v34, %v4449_v54  ;;  %v4482_v45 = vpack.c.bf16 %v8092_v0, %v8090_v12  ;;  %v8098_v10 = vadd.f32 %v5357_v39, %v4462_v60  ;;  %5938 = vmatpush3.bf16.msra.mxu1 %v6156_v29 }
0x2c40   :  { %5939 = vmatprep.subr.bf16.mxu1 %v6157_v33 }
0x2c41   :  { %5929 = vmatprep.mubr.msk.bf16.mxu0 %vm125_vm1, %v4482_v45  ;;  %v8100_v7 = vadd.f32 %v5357_v39, %v4463_v48 }
0x2c43   :  { %v4483_v24 = vpack.c.bf16 %v8100_v7, %v8098_v10  ;;  %5940 = vmatpush3.bf16.msra.mxu1 %v6157_v33 }
0x2c44   :  { %5941 = vmatprep.subr.bf16.mxu1 %v6158_v52 }
0x2c45   :  { %5930 = vmatmul.mubr.msk.bf16.vlgmr.msra.gmra.mrb[88].mxu0 %vm125_vm1, %v4483_v24 }
0x2c47   :  { %5942 = vmatpush3.bf16.msra.mxu1 %v6158_v52 }
0x2c48   :  { %5943 = vmatprep.subr.bf16.mxu1 %v6159_v16 }
0x2c4b   :  { %5944 = vmatpush3.bf16.msra.mxu1 %v6159_v16 }
0x2cb4   :  { %v4412_v56 = vpop.xlane.xlu0 %4411 }
0x2cb5   :  { %v4426_v19 = vmul.f32 0.03125, %v4412_v56 }
0x2cb6   :  { %v4415_v36 = vpop.xlane.xlu1 %4414 }
0x2cb7   :  { %v4434_v3 = vadd.f32 1e-12, %v4426_v19  ;;  %v4427_v20 = vmul.f32 0.03125, %v4415_v36 }
0x2cb8   :  { %v4418_v58 = vpop.xlane.xlu0 %4417 }
0x2cb9   :  { %6502 = vrsqrt.f32 %v4434_v3  ;;  %v4435_v35 = vadd.f32 1e-12, %v4427_v20  ;;  %v4428_v61 = vmul.f32 0.03125, %v4418_v58 }
0x2cba   :  { %v4421_v32 = vpop.xlane.xlu1 %4420 }
0x2cbb   :  { %6504 = vrsqrt.f32 %v4435_v35  ;;  %v4436_v14 = vadd.f32 1e-12, %v4428_v61  ;;  %v4429_v2 = vmul.f32 0.03125, %v4421_v32 }
0x2cbd   :  { %6506 = vrsqrt.f32 %v4436_v14  ;;  %v4437_v18 = vadd.f32 1e-12, %v4429_v2 }
0x2cbf   :  { %6508 = vrsqrt.f32 %v4437_v18 }
0x2cc3   :  { %v6503_v17 = vpop.eup %6502 }
0x2cc4   :  { %v4450_v25 = vmul.f32 %v6503_v17, %v8055_v38 }
0x2cc5   :  { %v6505_v5 = vpop.eup %6504 }
0x2cc6   :  { %v4451_v42 = vmul.f32 %v6505_v5, %v8057_v57  ;;  %v4464_v59 = vmul.f32 %v8078_v34, %v4450_v25 }
0x2cc7   :  { %v6507_v9 = vpop.eup %6506 }
0x2cc8   :  { %v4452_v27 = vmul.f32 %v6507_v9, %v8061_v47  ;;  %v4465_v23 = vmul.f32 %v8078_v34, %v4451_v42  ;;  %v8123_v26 = vadd.f32 %v5357_v39, %v4464_v59 }
0x2cc9   :  { %v6509_v55 = vpop.eup %6508 }
0x2cca   :  { %v4453_v63 = vmul.f32 %v6509_v55, %v8066_v46  ;;  %v8125_v6 = vadd.f32 %v5357_v39, %v4465_v23  ;;  %v4466_v31 = vmul.f32 %v8078_v34, %v4452_v27 }
0x2ccc   :  { %v4484_v38 = vpack.c.bf16 %v8125_v6, %v8123_v26  ;;  %v4467_v57 = vmul.f32 %v8078_v34, %v4453_v63  ;;  %v8132_v8 = vadd.f32 %v5357_v39, %v4466_v31 }
0x2cce   :  { %5933 = vmatprep.mubr.msk.bf16.mxu0 %vm125_vm1, %v4484_v38  ;;  %v8134_v47 = vadd.f32 %v5357_v39, %v4467_v57 }
0x2cd0   :  { %v4485_v46 = vpack.c.bf16 %v8134_v47, %v8132_v8 }
0x2cd2   :  { %5934 = vmatmul.mubr.msk.bf16.gmra.mrb[92].mxu0 %vm125_vm1, %v4485_v46 }
0x2d18   :  { %v5931_v1 = vpop.f32.mrb[88].mxu0 }
0x2d19   :  { %v4566_v4 = vadd.f32 %v5931_v1, %v5363_v41  ;;  %v4557_v44 = vpop.f32.mrb[89].mxu0 }
0x2d1a   :  { %v4558_v49 = vadd.f32 %v5363_v41, %v4557_v44  ;;  %v5932_v28 = vpop.f32.mrb[90].mxu0 }
0x2d1b   :  { %v4598_v50 = vmul.f32 0.044715, %v4566_v4  ;;  %v4569_v51 = vadd.f32 %v5932_v28, %v5363_v41  ;;  %v4560_v40 = vpop.f32.mrb[91].mxu0  ;;  %v4590_v61 = vmul.f32 0.5, %v4566_v4 }
0x2d1c   :  { %v4596_v34 = vmul.f32 0.044715, %v4558_v49  ;;  %v4561_v30 = vadd.f32 %v5363_v41, %v4560_v40  ;;  %v4588_v2 = vmul.f32 0.5, %v4558_v49 }
0x2d1d   :  { %v4606_v62 = vmul.f32 %v4598_v50, %v4566_v4  ;;  %v4599_v53 = vmul.f32 0.044715, %v4569_v51  ;;  %v4591_v32 = vmul.f32 0.5, %v4569_v51 }
0x2d1e   :  { %v4604_v11 = vmul.f32 %v4596_v34, %v4558_v49  ;;  %v4597_v21 = vmul.f32 0.044715, %v4561_v30  ;;  %v4589_v18 = vmul.f32 0.5, %v4561_v30 }
0x2d1f   :  { %v4614_v39 = vmul.f32 %v4606_v62, %v4566_v4  ;;  %v4607_v13 = vmul.f32 %v4599_v53, %v4569_v51 }
0x2d20   :  { %v4612_v15 = vmul.f32 %v4604_v11, %v4558_v49  ;;  %v4605_v22 = vmul.f32 %v4597_v21, %v4561_v30 }
0x2d21   :  { %v4622_v60 = vadd.f32 %v4614_v39, %v4566_v4  ;;  %v4615_v54 = vmul.f32 %v4607_v13, %v4569_v51 }
0x2d22   :  { %v4620_v48 = vadd.f32 %v4612_v15, %v4558_v49  ;;  %v4613_v45 = vmul.f32 %v4605_v22, %v4561_v30 }
0x2d23   :  { %v4630_v24 = vmul.f32 0.7978846, %v4622_v60  ;;  %v4623_v29 = vadd.f32 %v4615_v54, %v4569_v51 }
0x2d24   :  { %v4628_v33 = vmul.f32 0.7978846, %v4620_v48  ;;  %v4621_v52 = vadd.f32 %v4613_v45, %v4561_v30 }
0x2d25   :  { %6510 = vtanh.f32 %v4630_v24  ;;  %v4631_v56 = vmul.f32 0.7978846, %v4623_v29 }
0x2d26   :  { %6512 = vtanh.f32 %v4628_v33  ;;  %v4629_v19 = vmul.f32 0.7978846, %v4621_v52 }
0x2d27   :  { %6514 = vtanh.f32 %v4631_v56 }
0x2d28   :  { %6516 = vtanh.f32 %v4629_v19 }
0x2d2f   :  { %v6511_v36 = vpop.eup %6510 }
0x2d30   :  { %v6513_v16 = vpop.eup %6512  ;;  %v4646_v3 = vadd.f32 1.0, %v6511_v36 }
0x2d31   :  { %v6515_v20 = vpop.eup %6514  ;;  %v4644_v58 = vadd.f32 1.0, %v6513_v16 }
0x2d32   :  { %v6517_v35 = vpop.eup %6516  ;;  %v4647_v14 = vadd.f32 1.0, %v6515_v20  ;;  %v4654_v25 = vmul.f32 %v4646_v3, %v4590_v61 }
0x2d33   :  { %v4645_v17 = vadd.f32 1.0, %v6517_v35  ;;  %v4652_v42 = vmul.f32 %v4644_v58, %v4588_v2 }
0x2d34   :  { %v4655_v5 = vmul.f32 %v4647_v14, %v4591_v32 }
0x2d35   :  { %v4653_v59 = vmul.f32 %v4645_v17, %v4589_v18  ;;  %v5379_v18 = vld [vmem:[%s8295_s16 + $0x1] ss:$0 sm:$0xff] }
0x2d36   :  { %v4661_v9 = vpack.c.bf16 %v4655_v5, %v4654_v25 }
0x2d37   :  { %v4660_v27 = vpack.c.bf16 %v4653_v59, %v4652_v42 }
0x2d39   :  { %5945 = vmatprep.mubr.msk.bf16.mxu1 %vm2378_vm5, %v4660_v27 }
0x2d3a   :  { %5946 = vmatmul.mubr.msk.bf16.vlgmr.msra.gmra.mrb[88].mxu1 %vm2378_vm5, %v4661_v9 }
0x2da5   :  { %v5935_v23 = vpop.f32.mrb[92].mxu0 }
0x2da6   :  { %v4582_v55 = vadd.f32 %v5935_v23, %v5363_v41  ;;  %v4573_v63 = vpop.f32.mrb[93].mxu0 }
0x2da7   :  { %v4574_v31 = vadd.f32 %v5363_v41, %v4573_v63  ;;  %v5936_v38 = vpop.f32.mrb[94].mxu0 }
0x2da8   :  { %v4602_v57 = vmul.f32 0.044715, %v4582_v55  ;;  %v4585_v46 = vadd.f32 %v5936_v38, %v5363_v41  ;;  %v4576_v1 = vpop.f32.mrb[95].mxu0  ;;  %v4594_v56 = vmul.f32 0.5, %v4582_v55 }
0x2da9   :  { %v4600_v4 = vmul.f32 0.044715, %v4574_v31  ;;  %v4577_v44 = vadd.f32 %v5363_v41, %v4576_v1  ;;  %v4592_v16 = vmul.f32 0.5, %v4574_v31 }
0x2daa   :  { %v4610_v49 = vmul.f32 %v4602_v57, %v4582_v55  ;;  %v4603_v28 = vmul.f32 0.044715, %v4585_v46  ;;  %v4595_v19 = vmul.f32 0.5, %v4585_v46 }
0x2dab   :  { %v4608_v50 = vmul.f32 %v4600_v4, %v4574_v31  ;;  %v4601_v51 = vmul.f32 0.044715, %v4577_v44  ;;  %v4593_v3 = vmul.f32 0.5, %v4577_v44 }
0x2dac   :  { %v4618_v40 = vmul.f32 %v4610_v49, %v4582_v55  ;;  %v4611_v34 = vmul.f32 %v4603_v28, %v4585_v46 }
0x2dad   :  { %v4616_v30 = vmul.f32 %v4608_v50, %v4574_v31  ;;  %v4609_v62 = vmul.f32 %v4601_v51, %v4577_v44 }
0x2dae   :  { %v4626_v53 = vadd.f32 %v4618_v40, %v4582_v55  ;;  %v4619_v11 = vmul.f32 %v4611_v34, %v4585_v46 }
0x2daf   :  { %v4624_v21 = vadd.f32 %v4616_v30, %v4574_v31  ;;  %v4617_v39 = vmul.f32 %v4609_v62, %v4577_v44 }
0x2db0   :  { %v4634_v13 = vmul.f32 0.7978846, %v4626_v53  ;;  %v4627_v15 = vadd.f32 %v4619_v11, %v4585_v46 }
0x2db1   :  { %v4632_v22 = vmul.f32 0.7978846, %v4624_v21  ;;  %v4625_v60 = vadd.f32 %v4617_v39, %v4577_v44 }
0x2db2   :  { %6518 = vtanh.f32 %v4634_v13  ;;  %v4635_v54 = vmul.f32 0.7978846, %v4627_v15 }
0x2db3   :  { %6520 = vtanh.f32 %v4632_v22  ;;  %v4633_v41 = vmul.f32 0.7978846, %v4625_v60 }
0x2db4   :  { %6522 = vtanh.f32 %v4635_v54 }
0x2db5   :  { %6524 = vtanh.f32 %v4633_v41 }
0x2dbc   :  { %v6519_v48 = vpop.eup %6518 }
0x2dbd   :  { %v6521_v45 = vpop.eup %6520  ;;  %v4650_v24 = vadd.f32 1.0, %v6519_v48 }
0x2dbe   :  { %v6523_v29 = vpop.eup %6522  ;;  %v4648_v33 = vadd.f32 1.0, %v6521_v45 }
0x2dbf   :  { %v6525_v52 = vpop.eup %6524  ;;  %v4651_v36 = vadd.f32 1.0, %v6523_v29  ;;  %v4658_v58 = vmul.f32 %v4650_v24, %v4594_v56 }
0x2dc0   :  { %v4649_v20 = vadd.f32 1.0, %v6525_v52  ;;  %v4656_v61 = vmul.f32 %v4648_v33, %v4592_v16 }
0x2dc1   :  { %v4659_v35 = vmul.f32 %v4651_v36, %v4595_v19 }
0x2dc2   :  { %v4657_v32 = vmul.f32 %v4649_v20, %v4593_v3 }
0x2dc3   :  { %v4663_v14 = vpack.c.bf16 %v4659_v35, %v4658_v58 }
0x2dc4   :  { %v4662_v2 = vpack.c.bf16 %v4657_v32, %v4656_v61 }
0x2dc6   :  { %5949 = vmatprep.mubr.msk.bf16.mxu1 %vm2378_vm5, %v4662_v2 }
0x2dc7   :  { %5950 = vmatmul.mubr.msk.bf16.gmra.mrb[92].mxu1 %vm2378_vm5, %v4663_v14 }
0x2e0d   :  { %v5947_v17 = vpop.f32.mrb[88].mxu1 }
0x2e0e   :  { %v4760_v25 = vadd.f32 %v5947_v17, %v5379_v18  ;;  %v4751_v5 = vpop.f32.mrb[89].mxu1 }
0x2e0f   :  { %v4752_v42 = vadd.f32 %v5379_v18, %v4751_v5  ;;  %v5948_v59 = vpop.f32.mrb[90].mxu1 }
0x2e10   :  { %v4784_v9 = vadd.f32 %v4760_v25, %v8098_v10  ;;  %v4763_v27 = vadd.f32 %v5948_v59, %v5379_v18  ;;  %v4754_v23 = vpop.f32.mrb[91].mxu1 }
0x2e11   :  { %v4755_v55 = vadd.f32 %v5379_v18, %v4754_v23  ;;  %v4782_v63 = vadd.f32 %v4752_v42, %v8090_v12 }
0x2e12   :  { %v4785_v31 = vadd.f32 %v4763_v27, %v8100_v7  ;;  %v4800_v38 = vsel %vm125_vm1, %v4784_v9, 0.0 }
0x2e13   :  { %4801 = vadd.xlane.f32.xlu0 %v4800_v38  ;;  %v4783_v57 = vadd.f32 %v4755_v55, %v8092_v0  ;;  %v4794_v1 = vsel %vm125_vm1, %v4782_v63, 0.0 }
0x2e14   :  { %v4803_v46 = vsel %vm125_vm1, %v4785_v31, 0.0 }
0x2e15   :  { %4804 = vadd.xlane.f32.xlu1 %v4803_v46  ;;  %v4797_v10 = vsel %vm125_vm1, %v4783_v57, 0.0 }
0x2e17   :  { %4795 = vadd.xlane.f32.xlu0 %v4794_v1 }
0x2e19   :  { %4798 = vadd.xlane.f32.xlu1 %v4797_v10 }
0x2e9a   :  { %v5951_v4 = vpop.f32.mrb[92].mxu1 }
0x2e9b   :  { %v4767_v44 = vpop.f32.mrb[93].mxu1  ;;  %v4776_v49 = vadd.f32 %v5951_v4, %v5379_v18 }
0x2e9c   :  { %v4768_v12 = vadd.f32 %v5379_v18, %v4767_v44  ;;  %v5952_v28 = vpop.f32.mrb[94].mxu1 }
0x2e9d   :  { %v4770_v7 = vpop.f32.mrb[95].mxu1  ;;  %v4779_v51 = vadd.f32 %v5952_v28, %v5379_v18  ;;  %v4788_v0 = vadd.f32 %v4776_v49, %v8132_v8 }
0x2e9e   :  { %v4786_v50 = vadd.f32 %v4768_v12, %v8123_v26  ;;  %v4771_v40 = vadd.f32 %v5379_v18, %v4770_v7 }
0x2e9f   :  { %v4789_v53 = vadd.f32 %v4779_v51, %v8134_v47  ;;  %v4812_v26 = vsel %vm125_vm1, %v4788_v0, 0.0  ;;  %v5390_v51 = vld [vmem:[%s8296_s17 + $0x1] ss:$0 sm:$0xff] }
0x2ea0   :  { %v4787_v34 = vadd.f32 %v4771_v40, %v8125_v6  ;;  %v4802_v30 = vpop.xlane.xlu0 %4801  ;;  %v4806_v62 = vsel %vm125_vm1, %v4786_v50, 0.0 }
0x2ea1   :  { %4807 = vadd.xlane.f32.xlu0 %v4806_v62  ;;  %v4820_v39 = vmul.f32 0.03125, %v4802_v30  ;;  %v4815_v6 = vsel %vm125_vm1, %v4789_v53, 0.0 }
0x2ea2   :  { %v4805_v11 = vpop.xlane.xlu1 %4804  ;;  %v4809_v21 = vsel %vm125_vm1, %v4787_v34, 0.0 }
0x2ea3   :  { %4810 = vadd.xlane.f32.xlu1 %v4809_v21  ;;  %v4821_v15 = vmul.f32 0.03125, %v4805_v11  ;;  %v8165_v60 = vsub.f32 %v4784_v9, %v4820_v39 }
0x2ea4   :  { %v4796_v13 = vpop.xlane.xlu0 %4795 }
0x2ea5   :  { %v4818_v22 = vmul.f32 0.03125, %v4796_v13  ;;  %4813 = vadd.xlane.f32.xlu0 %v4812_v26  ;;  %v8167_v47 = vsub.f32 %v4785_v31, %v4821_v15  ;;  %v4836_v33 = vmul.f32 %v8165_v60, %v8165_v60 }
0x2ea6   :  { %v4799_v8 = vpop.xlane.xlu1 %4798 }
0x2ea7   :  { %v4826_v54 = vsub.f32 %v4782_v63, %v4818_v22  ;;  %v4819_v41 = vmul.f32 0.03125, %v4799_v8  ;;  %4816 = vadd.xlane.f32.xlu1 %v4815_v6  ;;  %v4837_v56 = vmul.f32 %v8167_v47, %v8167_v47  ;;  %v4848_v19 = vsel %vm125_vm1, %v4836_v33, 0.0 }
0x2ea9   :  { %v4827_v48 = vsub.f32 %v4783_v57, %v4819_v41  ;;  %v4834_v45 = vmul.f32 %v4826_v54, %v4826_v54  ;;  %v4851_v36 = vsel %vm125_vm1, %v4837_v56, 0.0  ;;  %v6596_v41 = vmov 0.0  }
0x2eaa   :  { %5953 = vmatprep.subr.bf16.mxu0 %v6596_v41  ;;  %5957 = vmatprep.mubr.msk.bf16.mxu0 %vm6597_vm6, %v6596_v41 }
0x2eab   :  { %v4842_v24 = vsel %vm125_vm1, %v4834_v45, 0.0  ;;  %v4835_v29 = vmul.f32 %v4827_v48, %v4827_v48 }
0x2eac   :  { %4843 = vadd.xlane.f32.xlu0 %v4842_v24 }
0x2ead   :  { %v4845_v52 = vsel %vm125_vm1, %v4835_v29, 0.0 }
0x2eae   :  { %4846 = vadd.xlane.f32.xlu1 %v4845_v52 }
0x2eb0   :  { %4849 = vadd.xlane.f32.xlu0 %v4848_v19 }
0x2eb2   :  { %4852 = vadd.xlane.f32.xlu1 %v4851_v36 }
0x2f2e   :  { %v4808_v16 = vpop.xlane.xlu0 %4807 }
0x2f2f   :  { %v4822_v3 = vmul.f32 0.03125, %v4808_v16 }
0x2f30   :  { %v4811_v20 = vpop.xlane.xlu1 %4810 }
0x2f31   :  { %v8177_v58 = vsub.f32 %v4786_v50, %v4822_v3  ;;  %v4823_v35 = vmul.f32 0.03125, %v4811_v20 }
0x2f32   :  { %v4814_v61 = vpop.xlane.xlu0 %4813 }
0x2f33   :  { %v8179_v32 = vsub.f32 %v4787_v34, %v4823_v35  ;;  %v4824_v14 = vmul.f32 0.03125, %v4814_v61  ;;  %v4838_v2 = vmul.f32 %v8177_v58, %v8177_v58  ;;  %v5391_v34 = vld [vmem:[%s8297_s18 + $0x1] ss:$0 sm:$0xff] }
0x2f34   :  { %v4817_v18 = vpop.xlane.xlu1 %4816 }
0x2f35   :  { %v8183_v17 = vsub.f32 %v4788_v0, %v4824_v14  ;;  %v4825_v25 = vmul.f32 0.03125, %v4817_v18  ;;  %v4854_v5 = vsel %vm125_vm1, %v4838_v2, 0.0  ;;  %v4839_v42 = vmul.f32 %v8179_v32, %v8179_v32 }
0x2f36   :  { %4855 = vadd.xlane.f32.xlu0 %v4854_v5 }
0x2f37   :  { %v8188_v59 = vsub.f32 %v4789_v53, %v4825_v25  ;;  %v4857_v9 = vsel %vm125_vm1, %v4839_v42, 0.0  ;;  %v4840_v27 = vmul.f32 %v8183_v17, %v8183_v17 }
0x2f38   :  { %4858 = vadd.xlane.f32.xlu1 %v4857_v9 }
0x2f39   :  { %v4844_v23 = vpop.xlane.xlu0 %4843  ;;  %v4860_v55 = vsel %vm125_vm1, %v4840_v27, 0.0  ;;  %v4841_v63 = vmul.f32 %v8188_v59, %v8188_v59 }
0x2f3a   :  { %v4866_v31 = vmul.f32 0.03125, %v4844_v23  ;;  %4861 = vadd.xlane.f32.xlu0 %v4860_v55 }
0x2f3b   :  { %v4847_v38 = vpop.xlane.xlu1 %4846  ;;  %v4863_v57 = vsel %vm125_vm1, %v4841_v63, 0.0 }
0x2f3c   :  { %v4874_v46 = vadd.f32 1e-12, %v4866_v31  ;;  %v4867_v1 = vmul.f32 0.03125, %v4847_v38  ;;  %4864 = vadd.xlane.f32.xlu1 %v4863_v57 }
0x2f3d   :  { %v4850_v10 = vpop.xlane.xlu0 %4849 }
0x2f3e   :  { %6526 = vrsqrt.f32 %v4874_v46  ;;  %v4875_v4 = vadd.f32 1e-12, %v4867_v1  ;;  %v4868_v44 = vmul.f32 0.03125, %v4850_v10  ;;  %v5394_v10 = vld [vmem:[%s8360_s11] ss:$0 sm:$0xff] }
0x2f3f   :  { %v4853_v49 = vpop.xlane.xlu1 %4852 }
0x2f40   :  { %6528 = vrsqrt.f32 %v4875_v4  ;;  %v4876_v12 = vadd.f32 1e-12, %v4868_v44  ;;  %v4869_v28 = vmul.f32 0.03125, %v4853_v49 }
0x2f42   :  { %6530 = vrsqrt.f32 %v4876_v12  ;;  %v4877_v7 = vadd.f32 1e-12, %v4869_v28 }
0x2f44   :  { %6532 = vrsqrt.f32 %v4877_v7 }
0x2f48   :  { %v6527_v50 = vpop.eup %6526 }
0x2f49   :  { %v4890_v40 = vmul.f32 %v6527_v50, %v4826_v54 }
0x2f4a   :  { %v6529_v0 = vpop.eup %6528 }
0x2f4b   :  { %v4904_v30 = vmul.f32 %v5390_v51, %v4890_v40  ;;  %v4891_v62 = vmul.f32 %v6529_v0, %v4827_v48 }
0x2f4c   :  { %v6531_v53 = vpop.eup %6530 }
0x2f4d   :  { %v4918_v11 = vadd.f32 %v5391_v34, %v4904_v30  ;;  %v4905_v21 = vmul.f32 %v5390_v51, %v4891_v62  ;;  %v4892_v39 = vmul.f32 %v6531_v53, %v8165_v60  ;;  %v6160_v60 = vld [vmem:[%s8298_s19] sm:$0xff]  }
0x2f4e   :  { %v6533_v13 = vpop.eup %6532  ;;  %5954 = vmatpush3.bf16.msra.mxu0 %v6160_v60  ;;  %v6168_v60 = vld [vmem:[%s8302_s23 + $0x28] ss:$16 sps:$4 sm:$0xff]  }
0x2f4f   :  { %4926 = vst.msk [vmem:[#allocation2] sm:$0xff] %vm125_vm1, %v4918_v11  ;;  %v4919_v26 = vadd.f32 %v5391_v34, %v4905_v21  ;;  %v4906_v15 = vmul.f32 %v5390_v51, %v4892_v39  ;;  %v4893_v22 = vmul.f32 %v6533_v13, %v8167_v47  ;;  %v6161_v47 = vld [vmem:[%s8298_s19 + $0x8] sm:$0xff]   ;;  %5955 = vmatprep.subr.bf16.mxu0 %v6596_v41  ;;  %s5392_s19 = sld [smem:[#allocation5 + $0x1]] }
0x2f50   :  { %v6170_v41 = vld [vmem:[%s8302_s23 + $0x2c] ss:$16 sps:$4 sm:$0xff]  }
0x2f51   :  { %4927 = vst.msk [vmem:[#allocation2 + $0x8] sm:$0xff] %vm125_vm1, %v4919_v26  ;;  %v4920_v8 = vadd.f32 %v5391_v34, %v4906_v15  ;;  %v4907_v6 = vmul.f32 %v5390_v51, %v4893_v22  ;;  %v6164_v22 = vld [vmem:[%s8302_s23 + $0xc] ss:$16 sps:$4 sm:$0xff]  }
0x2f52   :  { %5956 = vmatpush3.bf16.msra.mxu0 %v6161_v47  ;;  %5168 = vmatprep.subr.bf16.mxu1 %v6164_v22  ;;  %v6171_v47 = vld [vmem:[%s8302_s23 + $0x20] ss:$16 sps:$4 sm:$0xff]  }
0x2f53   :  { %4928 = vst.msk [vmem:[#allocation2 + $0x10] sm:$0xff] %vm125_vm1, %v4920_v8  ;;  %v4921_v54 = vadd.f32 %v5391_v34, %v4907_v6  ;;  %v6167_v8 = vld [vmem:[%s8302_s23 + $0x4] ss:$16 sps:$4 sm:$0xff]   ;;  %v6162_v6 = vld [vmem:[%s8302_s23 + $0x8] ss:$16 sps:$4 sm:$0xff]  }
0x2f54   :  { %5127 = vmatprep.subr.bf16.mxu0 %v6167_v8  ;;  %5169 = vmatpush1.bf16.msra.mxu1 %v6162_v6 }
0x2f55   :  { %4929 = vst.msk [vmem:[#allocation2 + $0x18] sm:$0xff] %vm125_vm1, %v4921_v54  ;;  %s5220_s13 = scalar_lea.vmem [#allocation2], %s5392_s19  ;;  %v6165_v54 = vld [vmem:[%s8302_s23] ss:$16 sps:$4 sm:$0xff]   ;;  %5170 = vmatprep.subr.bf16.mxu1 %v6170_v41 }
0x2f58   :  { %5171 = vmatpush1.bf16.msra.mxu1 %v6168_v60 }
0x2fc3   :  { %v4856_v48 = vpop.xlane.xlu0 %4855 }
0x2fc4   :  { %v4870_v45 = vmul.f32 0.03125, %v4856_v48  ;;  %v6173_v48 = vld [vmem:[%s8302_s23 + $0x24] ss:$16 sps:$4 sm:$0xff]  }
0x2fc5   :  { %v4859_v24 = vpop.xlane.xlu1 %4858 }
0x2fc6   :  { %v4878_v29 = vadd.f32 1e-12, %v4870_v45  ;;  %v4871_v33 = vmul.f32 0.03125, %v4859_v24  ;;  %v6598_v45 = vmov 0  }
0x2fc7   :  { %v4862_v52 = vpop.xlane.xlu0 %4861  ;;  %5200 = vmatprep.mubr.bf16.mxu1 %v6598_v45 }
0x2fc8   :  { %6534 = vrsqrt.f32 %v4878_v29  ;;  %v4879_v56 = vadd.f32 1e-12, %v4871_v33  ;;  %v4872_v19 = vmul.f32 0.03125, %v4862_v52 }
0x2fc9   :  { %v4865_v36 = vpop.xlane.xlu1 %4864 }
0x2fca   :  { %6536 = vrsqrt.f32 %v4879_v56  ;;  %v4880_v16 = vadd.f32 1e-12, %v4872_v19  ;;  %v4873_v3 = vmul.f32 0.03125, %v4865_v36  ;;  %v5398_v56 = vld [vmem:[%s8300_s21] ss:$0 sm:$0xff] }
0x2fcb   :  { %v5399_v36 = vld [vmem:[%s8301_s22] ss:$0 sm:$0xff] }
0x2fcc   :  { %6538 = vrsqrt.f32 %v4880_v16  ;;  %v4881_v20 = vadd.f32 1e-12, %v4873_v3 }
0x2fce   :  { %6540 = vrsqrt.f32 %v4881_v20 }
0x2fd2   :  { %v6535_v35 = vpop.eup %6534 }
0x2fd3   :  { %v4894_v61 = vmul.f32 %v6535_v35, %v8177_v58  ;;  %v5074_v35 = vsub.s32 2, %v6896_v43 }
0x2fd4   :  { %v6537_v14 = vpop.eup %6536 }
0x2fd5   :  { %v4908_v2 = vmul.f32 %v5390_v51, %v4894_v61  ;;  %v4895_v18 = vmul.f32 %v6537_v14, %v8179_v32  ;;  %v5062_v61 = vld [vmem:[%s8303_s24] sm:$0xf]  ;;  %v5070_v14 = vsub.s32 1, %v6896_v43 }
0x2fd6   :  { %v6539_v25 = vpop.eup %6538 }
0x2fd7   :  { %v4922_v5 = vadd.f32 %v5391_v34, %v4908_v2  ;;  %v4909_v42 = vmul.f32 %v5390_v51, %v4895_v18  ;;  %v4896_v9 = vmul.f32 %v6539_v25, %v8183_v17  ;;  %v5078_v2 = vsub.s32 3, %v6896_v43 }
0x2fd8   :  { %v6541_v27 = vpop.eup %6540  ;;  %v5067_v18 = vrot.slane %v5062_v61, %v6899_v37  ;;  %v5075_v25 = vrot.slane %v5062_v61, %v5074_v35 }
0x2fd9   :  { %4930 = vst.msk [vmem:[#allocation2 + $0x20] sm:$0xff] %vm125_vm1, %v4922_v5  ;;  %v4923_v23 = vadd.f32 %v5391_v34, %v4909_v42  ;;  %v4910_v55 = vmul.f32 %v5390_v51, %v4896_v9  ;;  %v4897_v63 = vmul.f32 %v6541_v27, %v8188_v59  ;;  %v5071_v5 = vrot.slane %v5062_v61, %v5070_v14 }
0x2fda   :  { %v5079_v42 = vrot.slane %v5062_v61, %v5078_v2 }
0x2fdb   :  { %4931 = vst.msk [vmem:[#allocation2 + $0x28] sm:$0xff] %vm125_vm1, %v4923_v23  ;;  %v4924_v31 = vadd.f32 %v5391_v34, %v4910_v55  ;;  %v4911_v58 = vmul.f32 %v5390_v51, %v4897_v63 }
0x2fdd   :  { %4932 = vst.msk [vmem:[#allocation2 + $0x30] sm:$0xff] %vm125_vm1, %v4924_v31  ;;  %v4925_v32 = vadd.f32 %v5391_v34, %v4911_v58 }
0x2fdf   :  { %4933 = vst.msk [vmem:[#allocation2 + $0x38] sm:$0xff] %vm125_vm1, %v4925_v32 }
0x2fe6   :  { %v5393_v17 = vld [vmem:[%s5220_s13 + $0x20] sm:$0x1] }
0x2fe7   :  { %v4942_v38 = vrot.slane %v5393_v17, 7  ;;  %v4936_v57 = vld [vmem:[%s4935_s10] sm:$0x1] }
0x2fe9   :  { %v4945_v46 = vsel %vm4944_vm7, %v4936_v57, %v4942_v38 }
0x2fea   :  { %v4947_v59 = vsel %vm4946_vm8, %v4945_v46, 0.0 }
0x2feb   :  { %v4948_v1 = vpack.c.bf16 %v4947_v59, %v4947_v59 }
0x2fed   :  { %5958 = vmatmul.mubr.msk.bf16.vlgmr.msra.gmra.mrb[96].mxu0 %vm125_vm1, %v4948_v1 }
0x2fee   :  { %5128 = vmatpush1.bf16.msra.mxu0 %v6165_v54  ;;  %5159 = vmatprep.mubr.bf16.mxu0 %v6598_v45 }
0x2fef   :  { %5129 = vmatprep.subr.bf16.mxu0 %v6173_v48 }
0x2ff2   :  { %5130 = vmatpush1.bf16.msra.mxu0 %v6171_v47 }
0x30c0   :  { %v5009_v4 = vpop.f32.mrb[96].mxu0 }
0x30c1   :  { %v5010_v44 = vadd.f32 %v5394_v10, %v5009_v4  ;;  %v5959_v49 = vpop.f32.mrb[97].mxu0 }
0x30c2   :  { %v5012_v12 = vpop.f32.mrb[98].mxu0 }
0x30c3   :  { %v5016_v28 = vmul.f32 0.044715, %v5010_v44  ;;  %v5960_v7 = vpop.f32.mrb[99].mxu0  ;;  %v5015_v30 = vmul.f32 0.5, %v5010_v44 }
0x30c5   :  { %v5017_v50 = vmul.f32 %v5016_v28, %v5010_v44 }
0x30c7   :  { %v5018_v51 = vmul.f32 %v5017_v50, %v5010_v44 }
0x30c9   :  { %v5019_v40 = vadd.f32 %v5018_v51, %v5010_v44 }
0x30cb   :  { %v5020_v0 = vmul.f32 0.7978846, %v5019_v40 }
0x30cd   :  { %6542 = vtanh.f32 %v5020_v0 }
0x30d7   :  { %v6543_v34 = vpop.eup %6542 }
0x30d8   :  { %v5022_v62 = vadd.f32 1.0, %v6543_v34 }
0x30da   :  { %v5023_v53 = vmul.f32 %v5022_v62, %v5015_v30 }
0x30dc   :  { %v5026_v11 = vsel %vm125_vm1, %v5023_v53, 0.0 }
0x30dd   :  { %5027 = vadd.xlane.f32.xlu0 %v5026_v11 }
0x316a   :  { %v5028_v21 = vpop.xlane.xlu0 %5027 }
0x316b   :  { %v5029_v39 = vmul.f32 0.03125, %v5028_v21 }
0x316d   :  { %v5030_v13 = vsub.f32 %v5023_v53, %v5029_v39 }
0x316f   :  { %v5031_v26 = vmul.f32 %v5030_v13, %v5030_v13 }
0x3171   :  { %v5032_v15 = vsel %vm125_vm1, %v5031_v26, 0.0 }
0x3172   :  { %5033 = vadd.xlane.f32.xlu1 %v5032_v15 }
0x31ff   :  { %v5034_v24 = vpop.xlane.xlu1 %5033 }
0x3200   :  { %v5035_v29 = vmul.f32 0.03125, %v5034_v24 }
0x3202   :  { %v5036_v33 = vadd.f32 1e-12, %v5035_v29 }
0x3204   :  { %6544 = vrsqrt.f32 %v5036_v33 }
0x320e   :  { %v6545_v52 = vpop.eup %6544 }
0x320f   :  { %v5038_v19 = vmul.f32 %v6545_v52, %v5030_v13 }
0x3211   :  { %v5045_v16 = vmul.f32 %v5398_v56, %v5038_v19 }
0x3213   :  { %v5052_v3 = vadd.f32 %v5399_v36, %v5045_v16 }
0x3215   :  { %v5053_v20 = vpack.c.bf16 %v5052_v3, %v5052_v3 }
0x3217   :  { %5408 = vmatmul.mubr.msk.bf16.vlgmr.msra.gmra.mrb[100].mxu0 %vm125_vm1, %v5053_v20  ;;  %5409 = vmatmul.mubr.msk.bf16.vlgmr.msra.gmra.mrb[96].mxu1 %vm125_vm1, %v5053_v20 }
0x32ea   :  { %v5161_v9 = vpop.f32.mrb[100].mxu0  ;;  %v5202_v27 = vpop.f32.mrb[96].mxu1 }
0x32eb   :  { %v5162_v23 = vadd.f32 %v5161_v9, %v5067_v18  ;;  %v5203_v55 = vadd.f32 %v5202_v27, %v5075_v25  ;;  %v5163_v63 = vpop.f32.mrb[101].mxu0  ;;  %v5204_v31 = vpop.f32.mrb[97].mxu1 }
0x32ec   :  { %v5164_v58 = vadd.f32 %v5163_v63, %v5071_v5  ;;  %v5205_v32 = vadd.f32 %v5204_v31, %v5079_v42  ;;  %v5165_v17 = vpop.f32.mrb[102].mxu0  ;;  %v5206_v38 = vpop.f32.mrb[98].mxu1 }
0x32ed   :  { %5209 = vst [vmem:[%s8304_s25] sm:$0xff] %v5162_v23  ;;  %5211 = vst [vmem:[%s8304_s25 + $0x10] sm:$0xff] %v5203_v55  ;;  %v5166_v43 = vpop.f32.mrb[103].mxu0  ;;  %v5207_v37 = vpop.f32.mrb[99].mxu1 }
0x32ee   :  { %5210 = vst [vmem:[%s8304_s25 + $0x8] sm:$0xff] %v5164_v58  ;;  %5212 = vst [vmem:[%s8304_s25 + $0x18] sm:$0xff] %v5205_v32 }

</bundles_post_ra>
